<compile_context>
chip_gen: v7x
topology: tpu7x:2x2x1
jax: 0.10.0
libtpu: 0.0.40
codegen_flags: <defaults>
</compile_context>

<pallas_src>
import functools

import jax
import jax.numpy as jnp
from jax.experimental import pallas as pl
from jax.experimental.pallas import tpu as pltpu


# ---------------------------------------------------------------------------
# In-kernel math helpers (exp/log/arith only -> always lower on Mosaic).
# ---------------------------------------------------------------------------
def _softplus(x):
    return jnp.maximum(x, 0.0) + jnp.log(1.0 + jnp.exp(-jnp.abs(x)))


def _digamma(x):
    """digamma(x) for x > 0: 8-step recurrence + asymptotic series.
    Exact f32 divides kept on purpose: this feeds the loss and the EUP cost is
    already amortised because the caller batches all alphas into one array."""
    acc = jnp.zeros_like(x)
    z = x
    for _ in range(8):
        acc = acc + 1.0 / z
        z = z + 1.0
    inv = 1.0 / z
    inv2 = inv * inv
    psi = (jnp.log(z) - 0.5 * inv
           - inv2 * (1.0 / 12.0 - inv2 * (1.0 / 120.0 - inv2 * (1.0 / 252.0))))
    return psi - acc


def _lgamma(x):
    """lgamma(x) for x > 0: 8-step recurrence + Stirling series."""
    shift = jnp.zeros_like(x)
    z = x
    for _ in range(8):
        shift = shift + jnp.log(z)
        z = z + 1.0
    inv = 1.0 / z
    inv2 = inv * inv
    half_log_2pi = 0.9189385332046727
    lg = ((z - 0.5) * jnp.log(z) - z + half_log_2pi
          + inv * (1.0 / 12.0 - inv2 * (1.0 / 360.0 - inv2 * (1.0 / 1260.0))))
    return lg - shift


def _fuse(a1, a2, beta, method, num_classes):
    """Dempster-style opinion fusion ('constraint' / 'cumulative').
    Divisions use the approx EUP reciprocal (~2^-12 rel error, fine for alpha
    fusion) so the divide chain does not load the VPU."""
    s1 = jnp.sum(a1, axis=1, keepdims=True)
    s2 = jnp.sum(a2, axis=1, keepdims=True)
    inv_s1 = pl.reciprocal(s1, approx=True)
    inv_s2 = pl.reciprocal(s2, approx=True)
    b1 = (a1 - beta) * inv_s1
    b2 = (a2 - beta) * inv_s2
    u1 = num_classes * inv_s1
    u2 = num_classes * inv_s2
    if method == 'constraint':
        # bmm(b1,b2^T).sum((1,2)) - (b1*b2).sum(1) == sum(b1)*sum(b2) - sum(b1*b2)
        bp = (jnp.sum(b1, axis=1, keepdims=True) * jnp.sum(b2, axis=1, keepdims=True)
              - jnp.sum(b1 * b2, axis=1, keepdims=True))
        inv_conflict = pl.reciprocal(1.0 - bp, approx=True)
        fb = (b1 * b2 + b1 * u2 + b2 * u1) * inv_conflict
        fu = u1 * u2 * inv_conflict
    elif method == 'cumulative':
        inv_cu = pl.reciprocal(u1 + u2 - u1 * u2, approx=True)
        fb = (b1 * u2 + b2 * u1) * inv_cu
        fu = u1 * u2 * inv_cu
    else:
        raise ValueError(f'Invalid combination method: {method}')
    fs = num_classes * pl.reciprocal(fu, approx=True)
    return fb * fs + beta


# ---------------------------------------------------------------------------
# Single fused kernel: local evidence + global evidence + opinion fusion + EDL.
# Runs on one TB-row batch tile per grid step.
# ---------------------------------------------------------------------------
def _merit_kernel(*refs, num_views, num_classes, inv_hw, methods, has_global,
                  mxu_bf16, pack_width):
    if has_global:
        (x_ref, gpool_ref, w01_ref, b01_ref, w2_ref, b2_ref,
         wg_ref, bg_ref, beta_ref, onehot_ref, out_ref) = refs
    else:
        (x_ref, w01_ref, b01_ref, w2_ref, b2_ref,
         beta_ref, onehot_ref, out_ref) = refs

    V, C = num_views, num_classes
    beta = beta_ref[...]                          # [1, C]
    onehot = onehot_ref[...]                      # [TB, C]
    TB = onehot.shape[0]
    dot_dtype = jnp.bfloat16 if mxu_bf16 else jnp.float32

    w01 = w01_ref[...]                            # [V, F]
    b01 = b01_ref[...]                            # [V, F]
    b2 = b2_ref[...]                              # [1, V*C]

    # ---- local heads: GAP (upsample folded out) -> folded conv1x1+Linear ->
    #      ReLU -> per-view fc on the MXU -> softplus evidence -> +beta -------
    # TODO(synk): the 34-layer ResNet residual trunk is not translated; it is
    #             approximated by the (folded) Linear+ReLU on GAP features.
    alphas = []
    for v in range(V):
        xv = x_ref[:, v, :]                                          # [TB, HW]
        gap_v = jnp.sum(xv, axis=-1, keepdims=True) * inv_hw         # [TB, 1]
        h_v = jnp.maximum(gap_v * w01[v:v + 1, :] + b01[v:v + 1, :], 0.0)  # [TB, F]
        e_v = jnp.dot(h_v.astype(dot_dtype), w2_ref[v].astype(dot_dtype),
                      preferred_element_type=jnp.float32) + b2[:, v * C:(v + 1) * C]
        alphas.append(_softplus(e_v) + beta)                         # [TB, C]

    # ---- global head (ViT patch-embed + head folded to one [PD, C] matmul) --
    if has_global:
        logits = jnp.dot(gpool_ref[...].astype(dot_dtype),
                         wg_ref[...].astype(dot_dtype),
                         preferred_element_type=jnp.float32) + bg_ref[...]
        alphas.append(_softplus(logits) + beta)                      # [TB, C]

    # ---- opinion fusion chain (static unroll; methods are compile-time) -----
    combined = alphas[0]
    for step in range(1, len(alphas)):
        combined = _fuse(combined, alphas[step], beta, methods[step - 1], C)

    # ---- EDL loss, batched: ONE digamma/lgamma pass over all alphas ---------
    n = len(alphas) + 1
    all_a = jnp.stack(alphas + [combined], axis=0)                   # [n, TB, C]
    y = onehot[None, :, :]                                           # [1, TB, C]
    beta3 = beta[None, :, :]                                         # [1, 1, C]

    s = jnp.sum(all_a, axis=2, keepdims=True)                        # [n, TB, 1]
    # NOTE: matches the reference precedence exactly: sum over classes first,
    # then multiply by the one-hot label (ce has shape [B, C]).
    ce_all = y * jnp.sum(_digamma(s) - _digamma(all_a), axis=2, keepdims=True)

    alp = y * beta3 + (1.0 - y) * all_a
    s_alp = jnp.sum(alp, axis=2, keepdims=True)
    ln_b = _lgamma(s_alp) - jnp.sum(_lgamma(alp), axis=2, keepdims=True)
    ln_b_uni = (jnp.sum(_lgamma(beta), axis=1, keepdims=True)
                - _lgamma(jnp.sum(beta, axis=1, keepdims=True)))     # [1, 1]
    kl_all = (jnp.sum((alp - beta3) * (_digamma(alp) - _digamma(s_alp)),
                      axis=2, keepdims=True) + ln_b + ln_b_uni)      # [n, TB, 1]

    ce_t = ce_all[0]
    kl_t = kl_all[0]
    for g in range(1, n):
        ce_t = ce_t + ce_all[g]
        kl_t = kl_t + kl_all[g]

    # ---- single lane-dense packed store (128-lane-padded slab) --------------
    pieces = [jnp.concatenate(alphas[:V], axis=1)]                   # [TB, V*C]
    if has_global:
        pieces.append(alphas[V])
    pieces += [combined, ce_t, kl_t]
    used = V * C + (C if has_global else 0) + C + C + 1
    if pack_width > used:
        pieces.append(jnp.zeros((TB, pack_width - used), jnp.float32))
    out_ref[...] = jnp.concatenate(pieces, axis=1)


# ---------------------------------------------------------------------------
# Plain-JAX glue
# ---------------------------------------------------------------------------
def _patchify(g, patch):
    # vit-pytorch: 'b c (h p1) (w p2) -> b (h w) (p1 p2 c)'
    b, c, h, w = g.shape
    nh, nw = h // patch, w // patch
    gp = g.reshape(b, c, nh, patch, nw, patch)
    gp = jnp.transpose(gp, (0, 2, 4, 3, 5, 1))
    return gp.reshape(b, nh * nw, patch * patch * c)


def _nbytes(*arrs):
    return int(sum(int(a.size) * a.dtype.itemsize for a in arrs))


class MeritPallas:
    """MERIT forward pass with the full post-backbone pipeline fused into one
    Pallas TPU kernel (batch-gridded, weights VMEM-resident)."""

    VIT_DIM = 1024
    VIT_PATCH = 16
    TRUNK_FEATURES = 512   # resnet34 fc in_features

    COMBINE_STRATEGIES = {'hybrid': ('cumulative', 'constraint'),
                          'BCF': ('constraint', 'constraint'),
                          'CBF': ('cumulative', 'cumulative')}

    def __init__(self, num_classes, in_channel, num_local_views, train_prior,
                 test_prior, lambda_epochs, glb, combine, window_size, key,
                 mxu_bf16=True, batch_tile=128):
        assert len(train_prior) == num_classes and len(test_prior) == num_classes
        if combine not in self.COMBINE_STRATEGIES:
            raise ValueError(f'Invalid combine method: {combine}')
        assert batch_tile % 8 == 0
        self.num_classes = num_classes
        self.in_channel = in_channel
        self.num_local_views = num_local_views
        self.lambda_epochs = lambda_epochs
        self.glb = glb
        self.combine = combine
        self.window_size = window_size
        self.mxu_bf16 = mxu_bf16          # bf16 MXU inputs, f32 accumulation
        self.batch_tile = int(batch_tile)
        self.train_beta = jnp.asarray(train_prior, jnp.float32) * num_classes
        self.test_beta = jnp.asarray(test_prior, jnp.float32) * num_classes
        self.local_method, self.global_method = self.COMBINE_STRATEGIES[combine]

        keys = jax.random.split(key, num_local_views + 1)
        self.local_params = []
        for i in range(num_local_views):
            ks = jax.random.split(keys[i], 6)
            self.local_params.append({
                # local views are single-channel slices (local_data[:, i:i+1])
                'w_pre': jax.random.normal(ks[0], (3, in_channel), jnp.float32) * 0.5,
                'b_pre': jax.random.normal(ks[1], (1, 3), jnp.float32) * 0.1,
                'w1': jax.random.normal(ks[2], (3, self.TRUNK_FEATURES), jnp.float32) * 0.2,
                'b1': jax.random.normal(ks[3], (1, self.TRUNK_FEATURES), jnp.float32) * 0.1,
                'w2': jax.random.normal(ks[4], (self.TRUNK_FEATURES, num_classes), jnp.float32) * 0.05,
                'b2': jax.random.normal(ks[5], (1, num_classes), jnp.float32) * 0.1,
            })

        # Fold the degenerate linear chain conv1x1 -> Linear(3, F) at init
        # (exact: no nonlinearity in between):
        #   h_v = relu(gap_v * w01_v + b01_v)
        #   w01_v = w_pre[:, 0] @ w1 ,  b01_v = b_pre @ w1 + b1
        w01_rows, b01_rows = [], []
        for p in self.local_params:
            w01_rows.append(p['w_pre'][:, 0:1].T @ p['w1'])          # [1, F]
            b01_rows.append(p['b_pre'] @ p['w1'] + p['b1'])          # [1, F]
        self._w01 = jnp.concatenate(w01_rows, axis=0)                # [V, F]
        self._b01 = jnp.concatenate(b01_rows, axis=0)                # [V, F]
        # Per-view fc weights kept dense [V, F, C] (no block-diag zero FLOPs).
        self._w2 = jnp.stack([p['w2'] for p in self.local_params], axis=0)        # [V, F, C]
        self._b2 = jnp.concatenate([p['b2'] for p in self.local_params], axis=1)  # [1, V*C]

        if glb:
            patch_dim = self.VIT_PATCH * self.VIT_PATCH * in_channel
            kg = jax.random.split(keys[-1], 4)
            self.global_params = {
                'w_emb': jax.random.normal(kg[0], (patch_dim, self.VIT_DIM), jnp.float32) * 0.05,
                'b_emb': jax.random.normal(kg[1], (1, self.VIT_DIM), jnp.float32) * 0.05,
                'w_head': jax.random.normal(kg[2], (self.VIT_DIM, num_classes), jnp.float32) * 0.03,
                'b_head': jax.random.normal(kg[3], (1, num_classes), jnp.float32) * 0.1,
            }
            # TODO(synk): the 6-layer / 16-head transformer encoder (and the
            #             vit.pth load, dropout) is not translated; with only
            #             patch-embed + mean-pool + head left, the two linears
            #             fold into a single [PD, C] map (exact, revisit if the
            #             encoder ever lands).
            self._wg = self.global_params['w_emb'] @ self.global_params['w_head']  # [PD, C]
            self._bg = (self.global_params['b_emb'] @ self.global_params['w_head']
                        + self.global_params['b_head'])                             # [1, C]

    # ---- single fused pallas_call ----
    def _fused_forward(self, x_flat, gpool, beta2d, onehot):
        B, V, HW = x_flat.shape
        C = self.num_classes
        F = self.TRUNK_FEATURES
        TB = B if B <= self.batch_tile else self.batch_tile
        grid = (pl.cdiv(B, TB),)
        used = V * C + (C if self.glb else 0) + C + C + 1
        pack_w = max(128, ((used + 127) // 128) * 128)
        methods = tuple([self.local_method] * (V - 1)
                        + ([self.global_method] if self.glb else []))
        kernel = functools.partial(
            _merit_kernel, num_views=V, num_classes=C, inv_hw=1.0 / HW,
            methods=methods, has_global=self.glb, mxu_bf16=self.mxu_bf16,
            pack_width=pack_w)

        row2 = lambda i: (i, 0)
        row3 = lambda i: (i, 0, 0)
        const2 = lambda i: (0, 0)         # weights: DMA'd once, VMEM-resident
        const3 = lambda i: (0, 0, 0)

        inputs = [x_flat]
        in_specs = [pl.BlockSpec((TB, V, HW), row3)]
        if self.glb:
            PD = gpool.shape[1]
            inputs.append(gpool)
            in_specs.append(pl.BlockSpec((TB, PD), row2))
        inputs += [self._w01, self._b01, self._w2, self._b2]
        in_specs += [pl.BlockSpec((V, F), const2),
                     pl.BlockSpec((V, F), const2),
                     pl.BlockSpec((V, F, C), const3),
                     pl.BlockSpec((1, V * C), const2)]
        if self.glb:
            inputs += [self._wg, self._bg]
            in_specs += [pl.BlockSpec(self._wg.shape, const2),
                         pl.BlockSpec((1, C), const2)]
        inputs += [beta2d, onehot]
        in_specs += [pl.BlockSpec((1, C), const2),
                     pl.BlockSpec((TB, C), row2)]

        n_alphas = V + (1 if self.glb else 0) + 1
        pd = gpool.shape[1] if self.glb else 0
        cost = pl.CostEstimate(
            flops=int(B * (V * HW + 4 * V * F + 2 * V * F * C + 2 * pd * C
                           + 80 * n_alphas * C)),
            transcendentals=int(B * (2 * (n_alphas - 1) * C
                                     + 30 * n_alphas * (C + 1))),
            bytes_accessed=_nbytes(*inputs) + 4 * B * pack_w)

        return pl.pallas_call(
            kernel,
            grid=grid,
            in_specs=in_specs,
            out_specs=pl.BlockSpec((TB, pack_w), row2),
            out_shape=jax.ShapeDtypeStruct((B, pack_w), jnp.float32),
            compiler_params=pltpu.CompilerParams(
                dimension_semantics=("parallel",)),
            cost_estimate=cost,
        )(*inputs)

    # ---- full forward ----
    def __call__(self, data, label, global_step, training=True):
        local_data, global_data = data
        B = local_data.shape[0]
        V = self.num_local_views
        C = self.num_classes
        HW = local_data.shape[2] * local_data.shape[3]

        beta = self.train_beta if training else self.test_beta
        beta2d = beta.reshape(1, C)

        # GAP(conv1x1(nearest_upsample(x, 224))) == conv1x1(GAP(x)) exactly
        # (224 = 14*16): the upsample + 224x224 intermediates are eliminated.
        x_flat = local_data.astype(jnp.float32).reshape(B, V, HW)
        onehot = jax.nn.one_hot(label, C, dtype=jnp.float32)

        gpool = None
        if self.glb:
            # Patch mean-pool done in XLA (P x smaller kernel input; the mean
            # commutes with the folded linear patch-embed + head).
            patches = _patchify(global_data.astype(jnp.float32), self.VIT_PATCH)
            gpool = jnp.mean(patches, axis=1)                         # [B, PD]

        packed = self._fused_forward(x_flat, gpool, beta2d, onehot)

        alpha = {}
        for i in range(V):
            alpha[f'local_{i}'] = packed[:, i * C:(i + 1) * C]
        off = V * C
        if self.glb:
            alpha['global'] = packed[:, off:off + C]
            off += C
        alpha['combined'] = packed[:, off:off + C]
        off += C
        ce_total = packed[:, off:off + C]
        off += C
        kl_total = packed[:, off:off + 1]

        annealing_coef = min(1.0, global_step / self.lambda_epochs)
        ce_mean = jnp.mean(ce_total)
        kl_mean = jnp.mean(kl_total)
        loss = {'ce': ce_mean, 'kl': kl_mean,
                'total': ce_mean + annealing_coef * kl_mean}
        return alpha, loss


if __name__ == "__main__":
    key = jax.random.PRNGKey(0)
    k_model, k_local, k_global, k_label = jax.random.split(key, 4)

    num_classes = 4
    in_channel = 1
    num_local_views = 2
    window_size = 32
    batch = 2

    model = MeritPallas(
        num_classes=num_classes, in_channel=in_channel,
        num_local_views=num_local_views,
        train_prior=[0.1, 0.2, 0.3, 0.4],
        test_prior=[0.25, 0.25, 0.25, 0.25],
        lambda_epochs=10, glb=True, combine='hybrid',
        window_size=window_size, key=k_model)

    local_data = jax.random.normal(
        k_local, (batch, num_local_views, 16, 16), jnp.float32)
    global_data = jax.random.normal(
        k_global, (batch, in_channel, window_size, window_size), jnp.float32)
    label = jax.random.randint(k_label, (batch,), 0, num_classes)

    alpha, loss = model((local_data, global_data), label, global_step=3)
    jax.block_until_ready((alpha, loss))
    print("KERNEL_OK")
</pallas_src>

<mosaic_0001>
module attributes {stable_mosaic.version = 11 : i64} {
  func.func @_merit_kernel(%arg0: i32, %arg1: memref<2x2x256xf32, #tpu.memory_space<vmem>>, %arg2: memref<2x256xf32, #tpu.memory_space<vmem>>, %arg3: memref<2x512xf32, #tpu.memory_space<vmem>>, %arg4: memref<2x512xf32, #tpu.memory_space<vmem>>, %arg5: memref<2x512x4xf32, #tpu.memory_space<vmem>>, %arg6: memref<1x8xf32, #tpu.memory_space<vmem>>, %arg7: memref<256x4xf32, #tpu.memory_space<vmem>>, %arg8: memref<1x4xf32, #tpu.memory_space<vmem>>, %arg9: memref<1x4xf32, #tpu.memory_space<vmem>>, %arg10: memref<2x4xf32, #tpu.memory_space<vmem>>, %arg11: memref<2x128xf32, #tpu.memory_space<vmem>>) attributes {dimension_semantics = [#tpu.dimension_semantics<parallel>], iteration_bounds = array<i64: 1>, scalar_prefetch = 0 : i64, scratch_operands = 0 : i64, tpu.core_type = #tpu.core_type<tc>, window_params = [{transform_indices = @transform_0, window_bounds = array<i64: 2, 2, 256>}, {transform_indices = @transform_1, window_bounds = array<i64: 2, 256>}, {pipeline_mode = #tpu.pipeline_mode<synchronous>, transform_indices = @transform_2, window_bounds = array<i64: 2, 512>}, {pipeline_mode = #tpu.pipeline_mode<synchronous>, transform_indices = @transform_3, window_bounds = array<i64: 2, 512>}, {pipeline_mode = #tpu.pipeline_mode<synchronous>, transform_indices = @transform_4, window_bounds = array<i64: 2, 512, 4>}, {pipeline_mode = #tpu.pipeline_mode<synchronous>, transform_indices = @transform_5, window_bounds = array<i64: 1, 8>}, {pipeline_mode = #tpu.pipeline_mode<synchronous>, transform_indices = @transform_6, window_bounds = array<i64: 256, 4>}, {pipeline_mode = #tpu.pipeline_mode<synchronous>, transform_indices = @transform_7, window_bounds = array<i64: 1, 4>}, {pipeline_mode = #tpu.pipeline_mode<synchronous>, transform_indices = @transform_8, window_bounds = array<i64: 1, 4>}, {transform_indices = @transform_9, window_bounds = array<i64: 2, 4>}, {transform_indices = @transform_10, window_bounds = array<i64: 2, 128>}]} {
    %c0 = arith.constant 0 : index
    %c0_0 = arith.constant 0 : index
    %0 = vector.load %arg9[%c0, %c0_0] : memref<1x4xf32, #tpu.memory_space<vmem>>, vector<1x4xf32>
    %c0_1 = arith.constant 0 : index
    %c0_2 = arith.constant 0 : index
    %1 = vector.load %arg10[%c0_1, %c0_2] : memref<2x4xf32, #tpu.memory_space<vmem>>, vector<2x4xf32>
    %c0_3 = arith.constant 0 : index
    %c0_4 = arith.constant 0 : index
    %2 = vector.load %arg3[%c0_3, %c0_4] : memref<2x512xf32, #tpu.memory_space<vmem>>, vector<2x512xf32>
    %c0_5 = arith.constant 0 : index
    %c0_6 = arith.constant 0 : index
    %3 = vector.load %arg4[%c0_5, %c0_6] : memref<2x512xf32, #tpu.memory_space<vmem>>, vector<2x512xf32>
    %c0_7 = arith.constant 0 : index
    %c0_8 = arith.constant 0 : index
    %4 = vector.load %arg6[%c0_7, %c0_8] : memref<1x8xf32, #tpu.memory_space<vmem>>, vector<1x8xf32>
    %c0_9 = arith.constant 0 : index
    %c0_10 = arith.constant 0 : index
    %c0_11 = arith.constant 0 : index
    %5 = vector.load %arg1[%c0_9, %c0_10, %c0_11] : memref<2x2x256xf32, #tpu.memory_space<vmem>>, vector<2x1x256xf32>
    %6 = vector.shape_cast %5 : vector<2x1x256xf32> to vector<2x256xf32>
    %cst = arith.constant dense<0.000000e+00> : vector<2xf32>
    %7 = vector.multi_reduction <add>, %6, %cst [1] : vector<2x256xf32> to vector<2xf32>
    %8 = vector.shape_cast %7 : vector<2xf32> to vector<2x1xf32>
    %cst_12 = arith.constant 3.906250e-03 : f32
    %9 = vector.broadcast %cst_12 : f32 to vector<2x1xf32>
    %10 = arith.mulf %8, %9 : vector<2x1xf32>
    %11 = vector.extract_strided_slice %2 {offsets = [0, 0], sizes = [1, 512], strides = [1, 1]} : vector<2x512xf32> to vector<1x512xf32>
    %12 = vector.broadcast %10 : vector<2x1xf32> to vector<2x512xf32>
    %13 = vector.broadcast %11 : vector<1x512xf32> to vector<2x512xf32>
    %14 = arith.mulf %12, %13 : vector<2x512xf32>
    %15 = vector.extract_strided_slice %3 {offsets = [0, 0], sizes = [1, 512], strides = [1, 1]} : vector<2x512xf32> to vector<1x512xf32>
    %16 = vector.broadcast %15 : vector<1x512xf32> to vector<2x512xf32>
    %17 = arith.addf %14, %16 : vector<2x512xf32>
    %cst_13 = arith.constant 0.000000e+00 : f32
    %18 = vector.broadcast %cst_13 : f32 to vector<2x512xf32>
    %19 = arith.maximumf %17, %18 : vector<2x512xf32>
    %20 = arith.truncf %19 : vector<2x512xf32> to vector<2x512xbf16>
    %c0_14 = arith.constant 0 : index
    %c0_15 = arith.constant 0 : index
    %c0_16 = arith.constant 0 : index
    %21 = vector.load %arg5[%c0_14, %c0_15, %c0_16] : memref<2x512x4xf32, #tpu.memory_space<vmem>>, vector<1x512x4xf32>
    %22 = vector.shape_cast %21 : vector<1x512x4xf32> to vector<512x4xf32>
    %23 = arith.truncf %22 : vector<512x4xf32> to vector<512x4xbf16>
    %cst_17 = arith.constant dense<0.000000e+00> : vector<2x4xf32>
    %24 = tpu.matmul %20, %23, %cst_17 {dimension_numbers = #tpu.dot_dimension_numbers<[1], [0], [0], [1], [0, 0, 1, 1], [], []>} : vector<2x512xbf16>, vector<512x4xbf16>, vector<2x4xf32> -> vector<2x4xf32>
    %25 = vector.extract_strided_slice %4 {offsets = [0, 0], sizes = [1, 4], strides = [1, 1]} : vector<1x8xf32> to vector<1x4xf32>
    %26 = vector.broadcast %25 : vector<1x4xf32> to vector<2x4xf32>
    %27 = arith.addf %24, %26 : vector<2x4xf32>
    %cst_18 = arith.constant 0.000000e+00 : f32
    %28 = vector.broadcast %cst_18 : f32 to vector<2x4xf32>
    %29 = arith.maximumf %27, %28 : vector<2x4xf32>
    %30 = math.absf %27 : vector<2x4xf32>
    %cst_19 = arith.constant 0.000000e+00 : f32
    %31 = vector.broadcast %cst_19 : f32 to vector<2x4xf32>
    %32 = arith.subf %31, %30 : vector<2x4xf32>
    %33 = math.exp %32 : vector<2x4xf32>
    %cst_20 = arith.constant 1.000000e+00 : f32
    %34 = vector.broadcast %cst_20 : f32 to vector<2x4xf32>
    %35 = arith.addf %34, %33 : vector<2x4xf32>
    %36 = math.log %35 : vector<2x4xf32>
    %37 = arith.addf %29, %36 : vector<2x4xf32>
    %38 = vector.broadcast %0 : vector<1x4xf32> to vector<2x4xf32>
    %39 = arith.addf %37, %38 : vector<2x4xf32>
    %c0_21 = arith.constant 0 : index
    %c1 = arith.constant 1 : index
    %c0_22 = arith.constant 0 : index
    %40 = vector.load %arg1[%c0_21, %c1, %c0_22] : memref<2x2x256xf32, #tpu.memory_space<vmem>>, vector<2x1x256xf32>
    %41 = vector.shape_cast %40 : vector<2x1x256xf32> to vector<2x256xf32>
    %cst_23 = arith.constant dense<0.000000e+00> : vector<2xf32>
    %42 = vector.multi_reduction <add>, %41, %cst_23 [1] : vector<2x256xf32> to vector<2xf32>
    %43 = vector.shape_cast %42 : vector<2xf32> to vector<2x1xf32>
    %cst_24 = arith.constant 3.906250e-03 : f32
    %44 = vector.broadcast %cst_24 : f32 to vector<2x1xf32>
    %45 = arith.mulf %43, %44 : vector<2x1xf32>
    %46 = vector.extract_strided_slice %2 {offsets = [1, 0], sizes = [1, 512], strides = [1, 1]} : vector<2x512xf32> to vector<1x512xf32>
    %47 = vector.broadcast %45 : vector<2x1xf32> to vector<2x512xf32>
    %48 = vector.broadcast %46 : vector<1x512xf32> to vector<2x512xf32>
    %49 = arith.mulf %47, %48 : vector<2x512xf32>
    %50 = vector.extract_strided_slice %3 {offsets = [1, 0], sizes = [1, 512], strides = [1, 1]} : vector<2x512xf32> to vector<1x512xf32>
    %51 = vector.broadcast %50 : vector<1x512xf32> to vector<2x512xf32>
    %52 = arith.addf %49, %51 : vector<2x512xf32>
    %cst_25 = arith.constant 0.000000e+00 : f32
    %53 = vector.broadcast %cst_25 : f32 to vector<2x512xf32>
    %54 = arith.maximumf %52, %53 : vector<2x512xf32>
    %55 = arith.truncf %54 : vector<2x512xf32> to vector<2x512xbf16>
    %c1_26 = arith.constant 1 : index
    %c0_27 = arith.constant 0 : index
    %c0_28 = arith.constant 0 : index
    %56 = vector.load %arg5[%c1_26, %c0_27, %c0_28] : memref<2x512x4xf32, #tpu.memory_space<vmem>>, vector<1x512x4xf32>
    %57 = vector.shape_cast %56 : vector<1x512x4xf32> to vector<512x4xf32>
    %58 = arith.truncf %57 : vector<512x4xf32> to vector<512x4xbf16>
    %cst_29 = arith.constant dense<0.000000e+00> : vector<2x4xf32>
    %59 = tpu.matmul %55, %58, %cst_29 {dimension_numbers = #tpu.dot_dimension_numbers<[1], [0], [0], [1], [0, 0, 1, 1], [], []>} : vector<2x512xbf16>, vector<512x4xbf16>, vector<2x4xf32> -> vector<2x4xf32>
    %60 = vector.extract_strided_slice %4 {offsets = [0, 4], sizes = [1, 4], strides = [1, 1]} : vector<1x8xf32> to vector<1x4xf32>
    %61 = vector.broadcast %60 : vector<1x4xf32> to vector<2x4xf32>
    %62 = arith.addf %59, %61 : vector<2x4xf32>
    %cst_30 = arith.constant 0.000000e+00 : f32
    %63 = vector.broadcast %cst_30 : f32 to vector<2x4xf32>
    %64 = arith.maximumf %62, %63 : vector<2x4xf32>
    %65 = math.absf %62 : vector<2x4xf32>
    %cst_31 = arith.constant 0.000000e+00 : f32
    %66 = vector.broadcast %cst_31 : f32 to vector<2x4xf32>
    %67 = arith.subf %66, %65 : vector<2x4xf32>
    %68 = math.exp %67 : vector<2x4xf32>
    %cst_32 = arith.constant 1.000000e+00 : f32
    %69 = vector.broadcast %cst_32 : f32 to vector<2x4xf32>
    %70 = arith.addf %69, %68 : vector<2x4xf32>
    %71 = math.log %70 : vector<2x4xf32>
    %72 = arith.addf %64, %71 : vector<2x4xf32>
    %73 = vector.broadcast %0 : vector<1x4xf32> to vector<2x4xf32>
    %74 = arith.addf %72, %73 : vector<2x4xf32>
    %c0_33 = arith.constant 0 : index
    %c0_34 = arith.constant 0 : index
    %75 = vector.load %arg2[%c0_33, %c0_34] : memref<2x256xf32, #tpu.memory_space<vmem>>, vector<2x256xf32>
    %76 = arith.truncf %75 : vector<2x256xf32> to vector<2x256xbf16>
    %c0_35 = arith.constant 0 : index
    %c0_36 = arith.constant 0 : index
    %77 = vector.load %arg7[%c0_35, %c0_36] : memref<256x4xf32, #tpu.memory_space<vmem>>, vector<256x4xf32>
    %78 = arith.truncf %77 : vector<256x4xf32> to vector<256x4xbf16>
    %cst_37 = arith.constant dense<0.000000e+00> : vector<2x4xf32>
    %79 = tpu.matmul %76, %78, %cst_37 {dimension_numbers = #tpu.dot_dimension_numbers<[1], [0], [0], [1], [0, 0, 1, 1], [], []>} : vector<2x256xbf16>, vector<256x4xbf16>, vector<2x4xf32> -> vector<2x4xf32>
    %c0_38 = arith.constant 0 : index
    %c0_39 = arith.constant 0 : index
    %80 = vector.load %arg8[%c0_38, %c0_39] : memref<1x4xf32, #tpu.memory_space<vmem>>, vector<1x4xf32>
    %81 = vector.broadcast %80 : vector<1x4xf32> to vector<2x4xf32>
    %82 = arith.addf %79, %81 : vector<2x4xf32>
    %cst_40 = arith.constant 0.000000e+00 : f32
    %83 = vector.broadcast %cst_40 : f32 to vector<2x4xf32>
    %84 = arith.maximumf %82, %83 : vector<2x4xf32>
    %85 = math.absf %82 : vector<2x4xf32>
    %cst_41 = arith.constant 0.000000e+00 : f32
    %86 = vector.broadcast %cst_41 : f32 to vector<2x4xf32>
    %87 = arith.subf %86, %85 : vector<2x4xf32>
    %88 = math.exp %87 : vector<2x4xf32>
    %cst_42 = arith.constant 1.000000e+00 : f32
    %89 = vector.broadcast %cst_42 : f32 to vector<2x4xf32>
    %90 = arith.addf %89, %88 : vector<2x4xf32>
    %91 = math.log %90 : vector<2x4xf32>
    %92 = arith.addf %84, %91 : vector<2x4xf32>
    %93 = vector.broadcast %0 : vector<1x4xf32> to vector<2x4xf32>
    %94 = arith.addf %92, %93 : vector<2x4xf32>
    %cst_43 = arith.constant dense<0.000000e+00> : vector<2xf32>
    %95 = vector.multi_reduction <add>, %39, %cst_43 [1] : vector<2x4xf32> to vector<2xf32>
    %96 = vector.shape_cast %95 : vector<2xf32> to vector<2x1xf32>
    %cst_44 = arith.constant dense<0.000000e+00> : vector<2xf32>
    %97 = vector.multi_reduction <add>, %74, %cst_44 [1] : vector<2x4xf32> to vector<2xf32>
    %98 = vector.shape_cast %97 : vector<2xf32> to vector<2x1xf32>
    %99 = tpu.reciprocal %96 {approx = true} : vector<2x1xf32> -> vector<2x1xf32>
    %100 = tpu.reciprocal %98 {approx = true} : vector<2x1xf32> -> vector<2x1xf32>
    %101 = vector.broadcast %0 : vector<1x4xf32> to vector<2x4xf32>
    %102 = arith.subf %39, %101 : vector<2x4xf32>
    %103 = vector.broadcast %99 : vector<2x1xf32> to vector<2x4xf32>
    %104 = arith.mulf %102, %103 : vector<2x4xf32>
    %105 = vector.broadcast %0 : vector<1x4xf32> to vector<2x4xf32>
    %106 = arith.subf %74, %105 : vector<2x4xf32>
    %107 = vector.broadcast %100 : vector<2x1xf32> to vector<2x4xf32>
    %108 = arith.mulf %106, %107 : vector<2x4xf32>
    %cst_45 = arith.constant 4.000000e+00 : f32
    %109 = vector.broadcast %cst_45 : f32 to vector<2x1xf32>
    %110 = arith.mulf %109, %99 : vector<2x1xf32>
    %cst_46 = arith.constant 4.000000e+00 : f32
    %111 = vector.broadcast %cst_46 : f32 to vector<2x1xf32>
    %112 = arith.mulf %111, %100 : vector<2x1xf32>
    %113 = arith.addf %110, %112 : vector<2x1xf32>
    %114 = arith.mulf %110, %112 : vector<2x1xf32>
    %115 = arith.subf %113, %114 : vector<2x1xf32>
    %116 = tpu.reciprocal %115 {approx = true} : vector<2x1xf32> -> vector<2x1xf32>
    %117 = vector.broadcast %112 : vector<2x1xf32> to vector<2x4xf32>
    %118 = arith.mulf %104, %117 : vector<2x4xf32>
    %119 = vector.broadcast %110 : vector<2x1xf32> to vector<2x4xf32>
    %120 = arith.mulf %108, %119 : vector<2x4xf32>
    %121 = arith.addf %118, %120 : vector<2x4xf32>
    %122 = vector.broadcast %116 : vector<2x1xf32> to vector<2x4xf32>
    %123 = arith.mulf %121, %122 : vector<2x4xf32>
    %124 = arith.mulf %110, %112 : vector<2x1xf32>
    %125 = arith.mulf %124, %116 : vector<2x1xf32>
    %126 = tpu.reciprocal %125 {approx = true} : vector<2x1xf32> -> vector<2x1xf32>
    %cst_47 = arith.constant 4.000000e+00 : f32
    %127 = vector.broadcast %cst_47 : f32 to vector<2x1xf32>
    %128 = arith.mulf %127, %126 : vector<2x1xf32>
    %129 = vector.broadcast %128 : vector<2x1xf32> to vector<2x4xf32>
    %130 = arith.mulf %123, %129 : vector<2x4xf32>
    %131 = vector.broadcast %0 : vector<1x4xf32> to vector<2x4xf32>
    %132 = arith.addf %130, %131 : vector<2x4xf32>
    %cst_48 = arith.constant dense<0.000000e+00> : vector<2xf32>
    %133 = vector.multi_reduction <add>, %132, %cst_48 [1] : vector<2x4xf32> to vector<2xf32>
    %134 = vector.shape_cast %133 : vector<2xf32> to vector<2x1xf32>
    %cst_49 = arith.constant dense<0.000000e+00> : vector<2xf32>
    %135 = vector.multi_reduction <add>, %94, %cst_49 [1] : vector<2x4xf32> to vector<2xf32>
    %136 = vector.shape_cast %135 : vector<2xf32> to vector<2x1xf32>
    %137 = tpu.reciprocal %134 {approx = true} : vector<2x1xf32> -> vector<2x1xf32>
    %138 = tpu.reciprocal %136 {approx = true} : vector<2x1xf32> -> vector<2x1xf32>
    %139 = vector.broadcast %0 : vector<1x4xf32> to vector<2x4xf32>
    %140 = arith.subf %132, %139 : vector<2x4xf32>
    %141 = vector.broadcast %137 : vector<2x1xf32> to vector<2x4xf32>
    %142 = arith.mulf %140, %141 : vector<2x4xf32>
    %143 = vector.broadcast %0 : vector<1x4xf32> to vector<2x4xf32>
    %144 = arith.subf %94, %143 : vector<2x4xf32>
    %145 = vector.broadcast %138 : vector<2x1xf32> to vector<2x4xf32>
    %146 = arith.mulf %144, %145 : vector<2x4xf32>
    %cst_50 = arith.constant 4.000000e+00 : f32
    %147 = vector.broadcast %cst_50 : f32 to vector<2x1xf32>
    %148 = arith.mulf %147, %137 : vector<2x1xf32>
    %cst_51 = arith.constant 4.000000e+00 : f32
    %149 = vector.broadcast %cst_51 : f32 to vector<2x1xf32>
    %150 = arith.mulf %149, %138 : vector<2x1xf32>
    %cst_52 = arith.constant dense<0.000000e+00> : vector<2xf32>
    %151 = vector.multi_reduction <add>, %142, %cst_52 [1] : vector<2x4xf32> to vector<2xf32>
    %152 = vector.shape_cast %151 : vector<2xf32> to vector<2x1xf32>
    %cst_53 = arith.constant dense<0.000000e+00> : vector<2xf32>
    %153 = vector.multi_reduction <add>, %146, %cst_53 [1] : vector<2x4xf32> to vector<2xf32>
    %154 = vector.shape_cast %153 : vector<2xf32> to vector<2x1xf32>
    %155 = arith.mulf %152, %154 : vector<2x1xf32>
    %156 = arith.mulf %142, %146 : vector<2x4xf32>
    %cst_54 = arith.constant dense<0.000000e+00> : vector<2xf32>
    %157 = vector.multi_reduction <add>, %156, %cst_54 [1] : vector<2x4xf32> to vector<2xf32>
    %158 = vector.shape_cast %157 : vector<2xf32> to vector<2x1xf32>
    %159 = arith.subf %155, %158 : vector<2x1xf32>
    %cst_55 = arith.constant 1.000000e+00 : f32
    %160 = vector.broadcast %cst_55 : f32 to vector<2x1xf32>
    %161 = arith.subf %160, %159 : vector<2x1xf32>
    %162 = tpu.reciprocal %161 {approx = true} : vector<2x1xf32> -> vector<2x1xf32>
    %163 = arith.mulf %142, %146 : vector<2x4xf32>
    %164 = vector.broadcast %150 : vector<2x1xf32> to vector<2x4xf32>
    %165 = arith.mulf %142, %164 : vector<2x4xf32>
    %166 = arith.addf %163, %165 : vector<2x4xf32>
    %167 = vector.broadcast %148 : vector<2x1xf32> to vector<2x4xf32>
    %168 = arith.mulf %146, %167 : vector<2x4xf32>
    %169 = arith.addf %166, %168 : vector<2x4xf32>
    %170 = vector.broadcast %162 : vector<2x1xf32> to vector<2x4xf32>
    %171 = arith.mulf %169, %170 : vector<2x4xf32>
    %172 = arith.mulf %148, %150 : vector<2x1xf32>
    %173 = arith.mulf %172, %162 : vector<2x1xf32>
    %174 = tpu.reciprocal %173 {approx = true} : vector<2x1xf32> -> vector<2x1xf32>
    %cst_56 = arith.constant 4.000000e+00 : f32
    %175 = vector.broadcast %cst_56 : f32 to vector<2x1xf32>
    %176 = arith.mulf %175, %174 : vector<2x1xf32>
    %177 = vector.broadcast %176 : vector<2x1xf32> to vector<2x4xf32>
    %178 = arith.mulf %171, %177 : vector<2x4xf32>
    %179 = vector.broadcast %0 : vector<1x4xf32> to vector<2x4xf32>
    %180 = arith.addf %178, %179 : vector<2x4xf32>
    %181 = vector.shape_cast %39 : vector<2x4xf32> to vector<1x2x4xf32>
    %182 = vector.shape_cast %74 : vector<2x4xf32> to vector<1x2x4xf32>
    %183 = vector.shape_cast %94 : vector<2x4xf32> to vector<1x2x4xf32>
    %184 = vector.shape_cast %180 : vector<2x4xf32> to vector<1x2x4xf32>
    %185 = tpu.concatenate %181, %182, %183, %184 in 0 : vector<1x2x4xf32>, vector<1x2x4xf32>, vector<1x2x4xf32>, vector<1x2x4xf32> -> vector<4x2x4xf32>
    %186 = vector.shape_cast %1 : vector<2x4xf32> to vector<1x2x4xf32>
    %187 = vector.shape_cast %0 : vector<1x4xf32> to vector<1x1x4xf32>
    %cst_57 = arith.constant dense<0.000000e+00> : vector<4x2xf32>
    %188 = vector.multi_reduction <add>, %185, %cst_57 [2] : vector<4x2x4xf32> to vector<4x2xf32>
    %189 = vector.shape_cast %188 : vector<4x2xf32> to vector<4x2x1xf32>
    %cst_58 = arith.constant 0.000000e+00 : f32
    %190 = vector.broadcast %cst_58 : f32 to vector<4x2x1xf32>
    %cst_59 = arith.constant 1.000000e+00 : f32
    %191 = vector.broadcast %cst_59 : f32 to vector<4x2x1xf32>
    %192 = arith.divf %191, %189 : vector<4x2x1xf32>
    %193 = arith.addf %190, %192 : vector<4x2x1xf32>
    %cst_60 = arith.constant 1.000000e+00 : f32
    %194 = vector.broadcast %cst_60 : f32 to vector<4x2x1xf32>
    %195 = arith.addf %189, %194 : vector<4x2x1xf32>
    %cst_61 = arith.constant 1.000000e+00 : f32
    %196 = vector.broadcast %cst_61 : f32 to vector<4x2x1xf32>
    %197 = arith.divf %196, %195 : vector<4x2x1xf32>
    %198 = arith.addf %193, %197 : vector<4x2x1xf32>
    %cst_62 = arith.constant 1.000000e+00 : f32
    %199 = vector.broadcast %cst_62 : f32 to vector<4x2x1xf32>
    %200 = arith.addf %195, %199 : vector<4x2x1xf32>
    %cst_63 = arith.constant 1.000000e+00 : f32
    %201 = vector.broadcast %cst_63 : f32 to vector<4x2x1xf32>
    %202 = arith.divf %201, %200 : vector<4x2x1xf32>
    %203 = arith.addf %198, %202 : vector<4x2x1xf32>
    %cst_64 = arith.constant 1.000000e+00 : f32
    %204 = vector.broadcast %cst_64 : f32 to vector<4x2x1xf32>
    %205 = arith.addf %200, %204 : vector<4x2x1xf32>
    %cst_65 = arith.constant 1.000000e+00 : f32
    %206 = vector.broadcast %cst_65 : f32 to vector<4x2x1xf32>
    %207 = arith.divf %206, %205 : vector<4x2x1xf32>
    %208 = arith.addf %203, %207 : vector<4x2x1xf32>
    %cst_66 = arith.constant 1.000000e+00 : f32
    %209 = vector.broadcast %cst_66 : f32 to vector<4x2x1xf32>
    %210 = arith.addf %205, %209 : vector<4x2x1xf32>
    %cst_67 = arith.constant 1.000000e+00 : f32
    %211 = vector.broadcast %cst_67 : f32 to vector<4x2x1xf32>
    %212 = arith.divf %211, %210 : vector<4x2x1xf32>
    %213 = arith.addf %208, %212 : vector<4x2x1xf32>
    %cst_68 = arith.constant 1.000000e+00 : f32
    %214 = vector.broadcast %cst_68 : f32 to vector<4x2x1xf32>
    %215 = arith.addf %210, %214 : vector<4x2x1xf32>
    %cst_69 = arith.constant 1.000000e+00 : f32
    %216 = vector.broadcast %cst_69 : f32 to vector<4x2x1xf32>
    %217 = arith.divf %216, %215 : vector<4x2x1xf32>
    %218 = arith.addf %213, %217 : vector<4x2x1xf32>
    %cst_70 = arith.constant 1.000000e+00 : f32
    %219 = vector.broadcast %cst_70 : f32 to vector<4x2x1xf32>
    %220 = arith.addf %215, %219 : vector<4x2x1xf32>
    %cst_71 = arith.constant 1.000000e+00 : f32
    %221 = vector.broadcast %cst_71 : f32 to vector<4x2x1xf32>
    %222 = arith.divf %221, %220 : vector<4x2x1xf32>
    %223 = arith.addf %218, %222 : vector<4x2x1xf32>
    %cst_72 = arith.constant 1.000000e+00 : f32
    %224 = vector.broadcast %cst_72 : f32 to vector<4x2x1xf32>
    %225 = arith.addf %220, %224 : vector<4x2x1xf32>
    %cst_73 = arith.constant 1.000000e+00 : f32
    %226 = vector.broadcast %cst_73 : f32 to vector<4x2x1xf32>
    %227 = arith.divf %226, %225 : vector<4x2x1xf32>
    %228 = arith.addf %223, %227 : vector<4x2x1xf32>
    %cst_74 = arith.constant 1.000000e+00 : f32
    %229 = vector.broadcast %cst_74 : f32 to vector<4x2x1xf32>
    %230 = arith.addf %225, %229 : vector<4x2x1xf32>
    %cst_75 = arith.constant 1.000000e+00 : f32
    %231 = vector.broadcast %cst_75 : f32 to vector<4x2x1xf32>
    %232 = arith.divf %231, %230 : vector<4x2x1xf32>
    %233 = arith.mulf %232, %232 : vector<4x2x1xf32>
    %234 = math.log %230 : vector<4x2x1xf32>
    %cst_76 = arith.constant 5.000000e-01 : f32
    %235 = vector.broadcast %cst_76 : f32 to vector<4x2x1xf32>
    %236 = arith.mulf %235, %232 : vector<4x2x1xf32>
    %237 = arith.subf %234, %236 : vector<4x2x1xf32>
    %cst_77 = arith.constant 0.0039682542 : f32
    %238 = vector.broadcast %cst_77 : f32 to vector<4x2x1xf32>
    %239 = arith.mulf %233, %238 : vector<4x2x1xf32>
    %cst_78 = arith.constant 0.00833333377 : f32
    %240 = vector.broadcast %cst_78 : f32 to vector<4x2x1xf32>
    %241 = arith.subf %240, %239 : vector<4x2x1xf32>
    %242 = arith.mulf %233, %241 : vector<4x2x1xf32>
    %cst_79 = arith.constant 0.0833333358 : f32
    %243 = vector.broadcast %cst_79 : f32 to vector<4x2x1xf32>
    %244 = arith.subf %243, %242 : vector<4x2x1xf32>
    %245 = arith.mulf %233, %244 : vector<4x2x1xf32>
    %246 = arith.subf %237, %245 : vector<4x2x1xf32>
    %247 = arith.subf %246, %228 : vector<4x2x1xf32>
    %cst_80 = arith.constant 0.000000e+00 : f32
    %248 = vector.broadcast %cst_80 : f32 to vector<4x2x4xf32>
    %cst_81 = arith.constant 1.000000e+00 : f32
    %249 = vector.broadcast %cst_81 : f32 to vector<4x2x4xf32>
    %250 = arith.divf %249, %185 : vector<4x2x4xf32>
    %251 = arith.addf %248, %250 : vector<4x2x4xf32>
    %cst_82 = arith.constant 1.000000e+00 : f32
    %252 = vector.broadcast %cst_82 : f32 to vector<4x2x4xf32>
    %253 = arith.addf %185, %252 : vector<4x2x4xf32>
    %cst_83 = arith.constant 1.000000e+00 : f32
    %254 = vector.broadcast %cst_83 : f32 to vector<4x2x4xf32>
    %255 = arith.divf %254, %253 : vector<4x2x4xf32>
    %256 = arith.addf %251, %255 : vector<4x2x4xf32>
    %cst_84 = arith.constant 1.000000e+00 : f32
    %257 = vector.broadcast %cst_84 : f32 to vector<4x2x4xf32>
    %258 = arith.addf %253, %257 : vector<4x2x4xf32>
    %cst_85 = arith.constant 1.000000e+00 : f32
    %259 = vector.broadcast %cst_85 : f32 to vector<4x2x4xf32>
    %260 = arith.divf %259, %258 : vector<4x2x4xf32>
    %261 = arith.addf %256, %260 : vector<4x2x4xf32>
    %cst_86 = arith.constant 1.000000e+00 : f32
    %262 = vector.broadcast %cst_86 : f32 to vector<4x2x4xf32>
    %263 = arith.addf %258, %262 : vector<4x2x4xf32>
    %cst_87 = arith.constant 1.000000e+00 : f32
    %264 = vector.broadcast %cst_87 : f32 to vector<4x2x4xf32>
    %265 = arith.divf %264, %263 : vector<4x2x4xf32>
    %266 = arith.addf %261, %265 : vector<4x2x4xf32>
    %cst_88 = arith.constant 1.000000e+00 : f32
    %267 = vector.broadcast %cst_88 : f32 to vector<4x2x4xf32>
    %268 = arith.addf %263, %267 : vector<4x2x4xf32>
    %cst_89 = arith.constant 1.000000e+00 : f32
    %269 = vector.broadcast %cst_89 : f32 to vector<4x2x4xf32>
    %270 = arith.divf %269, %268 : vector<4x2x4xf32>
    %271 = arith.addf %266, %270 : vector<4x2x4xf32>
    %cst_90 = arith.constant 1.000000e+00 : f32
    %272 = vector.broadcast %cst_90 : f32 to vector<4x2x4xf32>
    %273 = arith.addf %268, %272 : vector<4x2x4xf32>
    %cst_91 = arith.constant 1.000000e+00 : f32
    %274 = vector.broadcast %cst_91 : f32 to vector<4x2x4xf32>
    %275 = arith.divf %274, %273 : vector<4x2x4xf32>
    %276 = arith.addf %271, %275 : vector<4x2x4xf32>
    %cst_92 = arith.constant 1.000000e+00 : f32
    %277 = vector.broadcast %cst_92 : f32 to vector<4x2x4xf32>
    %278 = arith.addf %273, %277 : vector<4x2x4xf32>
    %cst_93 = arith.constant 1.000000e+00 : f32
    %279 = vector.broadcast %cst_93 : f32 to vector<4x2x4xf32>
    %280 = arith.divf %279, %278 : vector<4x2x4xf32>
    %281 = arith.addf %276, %280 : vector<4x2x4xf32>
    %cst_94 = arith.constant 1.000000e+00 : f32
    %282 = vector.broadcast %cst_94 : f32 to vector<4x2x4xf32>
    %283 = arith.addf %278, %282 : vector<4x2x4xf32>
    %cst_95 = arith.constant 1.000000e+00 : f32
    %284 = vector.broadcast %cst_95 : f32 to vector<4x2x4xf32>
    %285 = arith.divf %284, %283 : vector<4x2x4xf32>
    %286 = arith.addf %281, %285 : vector<4x2x4xf32>
    %cst_96 = arith.constant 1.000000e+00 : f32
    %287 = vector.broadcast %cst_96 : f32 to vector<4x2x4xf32>
    %288 = arith.addf %283, %287 : vector<4x2x4xf32>
    %cst_97 = arith.constant 1.000000e+00 : f32
    %289 = vector.broadcast %cst_97 : f32 to vector<4x2x4xf32>
    %290 = arith.divf %289, %288 : vector<4x2x4xf32>
    %291 = arith.mulf %290, %290 : vector<4x2x4xf32>
    %292 = math.log %288 : vector<4x2x4xf32>
    %cst_98 = arith.constant 5.000000e-01 : f32
    %293 = vector.broadcast %cst_98 : f32 to vector<4x2x4xf32>
    %294 = arith.mulf %293, %290 : vector<4x2x4xf32>
    %295 = arith.subf %292, %294 : vector<4x2x4xf32>
    %cst_99 = arith.constant 0.0039682542 : f32
    %296 = vector.broadcast %cst_99 : f32 to vector<4x2x4xf32>
    %297 = arith.mulf %291, %296 : vector<4x2x4xf32>
    %cst_100 = arith.constant 0.00833333377 : f32
    %298 = vector.broadcast %cst_100 : f32 to vector<4x2x4xf32>
    %299 = arith.subf %298, %297 : vector<4x2x4xf32>
    %300 = arith.mulf %291, %299 : vector<4x2x4xf32>
    %cst_101 = arith.constant 0.0833333358 : f32
    %301 = vector.broadcast %cst_101 : f32 to vector<4x2x4xf32>
    %302 = arith.subf %301, %300 : vector<4x2x4xf32>
    %303 = arith.mulf %291, %302 : vector<4x2x4xf32>
    %304 = arith.subf %295, %303 : vector<4x2x4xf32>
    %305 = arith.subf %304, %286 : vector<4x2x4xf32>
    %306 = vector.broadcast %247 : vector<4x2x1xf32> to vector<4x2x4xf32>
    %307 = arith.subf %306, %305 : vector<4x2x4xf32>
    %cst_102 = arith.constant dense<0.000000e+00> : vector<4x2xf32>
    %308 = vector.multi_reduction <add>, %307, %cst_102 [2] : vector<4x2x4xf32> to vector<4x2xf32>
    %309 = vector.shape_cast %308 : vector<4x2xf32> to vector<4x2x1xf32>
    %310 = vector.broadcast %186 : vector<1x2x4xf32> to vector<4x2x4xf32>
    %311 = vector.broadcast %309 : vector<4x2x1xf32> to vector<4x2x4xf32>
    %312 = arith.mulf %310, %311 : vector<4x2x4xf32>
    %313 = vector.broadcast %187 : vector<1x1x4xf32> to vector<1x2x4xf32>
    %314 = arith.mulf %186, %313 : vector<1x2x4xf32>
    %cst_103 = arith.constant 1.000000e+00 : f32
    %315 = vector.broadcast %cst_103 : f32 to vector<1x2x4xf32>
    %316 = arith.subf %315, %186 : vector<1x2x4xf32>
    %317 = vector.broadcast %316 : vector<1x2x4xf32> to vector<4x2x4xf32>
    %318 = arith.mulf %317, %185 : vector<4x2x4xf32>
    %319 = vector.broadcast %314 : vector<1x2x4xf32> to vector<4x2x4xf32>
    %320 = arith.addf %319, %318 : vector<4x2x4xf32>
    %cst_104 = arith.constant dense<0.000000e+00> : vector<4x2xf32>
    %321 = vector.multi_reduction <add>, %320, %cst_104 [2] : vector<4x2x4xf32> to vector<4x2xf32>
    %322 = vector.shape_cast %321 : vector<4x2xf32> to vector<4x2x1xf32>
    %cst_105 = arith.constant 0.000000e+00 : f32
    %323 = vector.broadcast %cst_105 : f32 to vector<4x2x1xf32>
    %324 = math.log %322 : vector<4x2x1xf32>
    %325 = arith.addf %323, %324 : vector<4x2x1xf32>
    %cst_106 = arith.constant 1.000000e+00 : f32
    %326 = vector.broadcast %cst_106 : f32 to vector<4x2x1xf32>
    %327 = arith.addf %322, %326 : vector<4x2x1xf32>
    %328 = math.log %327 : vector<4x2x1xf32>
    %329 = arith.addf %325, %328 : vector<4x2x1xf32>
    %cst_107 = arith.constant 1.000000e+00 : f32
    %330 = vector.broadcast %cst_107 : f32 to vector<4x2x1xf32>
    %331 = arith.addf %327, %330 : vector<4x2x1xf32>
    %332 = math.log %331 : vector<4x2x1xf32>
    %333 = arith.addf %329, %332 : vector<4x2x1xf32>
    %cst_108 = arith.constant 1.000000e+00 : f32
    %334 = vector.broadcast %cst_108 : f32 to vector<4x2x1xf32>
    %335 = arith.addf %331, %334 : vector<4x2x1xf32>
    %336 = math.log %335 : vector<4x2x1xf32>
    %337 = arith.addf %333, %336 : vector<4x2x1xf32>
    %cst_109 = arith.constant 1.000000e+00 : f32
    %338 = vector.broadcast %cst_109 : f32 to vector<4x2x1xf32>
    %339 = arith.addf %335, %338 : vector<4x2x1xf32>
    %340 = math.log %339 : vector<4x2x1xf32>
    %341 = arith.addf %337, %340 : vector<4x2x1xf32>
    %cst_110 = arith.constant 1.000000e+00 : f32
    %342 = vector.broadcast %cst_110 : f32 to vector<4x2x1xf32>
    %343 = arith.addf %339, %342 : vector<4x2x1xf32>
    %344 = math.log %343 : vector<4x2x1xf32>
    %345 = arith.addf %341, %344 : vector<4x2x1xf32>
    %cst_111 = arith.constant 1.000000e+00 : f32
    %346 = vector.broadcast %cst_111 : f32 to vector<4x2x1xf32>
    %347 = arith.addf %343, %346 : vector<4x2x1xf32>
    %348 = math.log %347 : vector<4x2x1xf32>
    %349 = arith.addf %345, %348 : vector<4x2x1xf32>
    %cst_112 = arith.constant 1.000000e+00 : f32
    %350 = vector.broadcast %cst_112 : f32 to vector<4x2x1xf32>
    %351 = arith.addf %347, %350 : vector<4x2x1xf32>
    %352 = math.log %351 : vector<4x2x1xf32>
    %353 = arith.addf %349, %352 : vector<4x2x1xf32>
    %cst_113 = arith.constant 1.000000e+00 : f32
    %354 = vector.broadcast %cst_113 : f32 to vector<4x2x1xf32>
    %355 = arith.addf %351, %354 : vector<4x2x1xf32>
    %cst_114 = arith.constant 1.000000e+00 : f32
    %356 = vector.broadcast %cst_114 : f32 to vector<4x2x1xf32>
    %357 = arith.divf %356, %355 : vector<4x2x1xf32>
    %358 = arith.mulf %357, %357 : vector<4x2x1xf32>
    %cst_115 = arith.constant 5.000000e-01 : f32
    %359 = vector.broadcast %cst_115 : f32 to vector<4x2x1xf32>
    %360 = arith.subf %355, %359 : vector<4x2x1xf32>
    %361 = math.log %355 : vector<4x2x1xf32>
    %362 = arith.mulf %360, %361 : vector<4x2x1xf32>
    %363 = arith.subf %362, %355 : vector<4x2x1xf32>
    %cst_116 = arith.constant 0.918938517 : f32
    %364 = vector.broadcast %cst_116 : f32 to vector<4x2x1xf32>
    %365 = arith.addf %363, %364 : vector<4x2x1xf32>
    %cst_117 = arith.constant 7.93650805E-4 : f32
    %366 = vector.broadcast %cst_117 : f32 to vector<4x2x1xf32>
    %367 = arith.mulf %358, %366 : vector<4x2x1xf32>
    %cst_118 = arith.constant 0.00277777785 : f32
    %368 = vector.broadcast %cst_118 : f32 to vector<4x2x1xf32>
    %369 = arith.subf %368, %367 : vector<4x2x1xf32>
    %370 = arith.mulf %358, %369 : vector<4x2x1xf32>
    %cst_119 = arith.constant 0.0833333358 : f32
    %371 = vector.broadcast %cst_119 : f32 to vector<4x2x1xf32>
    %372 = arith.subf %371, %370 : vector<4x2x1xf32>
    %373 = arith.mulf %357, %372 : vector<4x2x1xf32>
    %374 = arith.addf %365, %373 : vector<4x2x1xf32>
    %375 = arith.subf %374, %353 : vector<4x2x1xf32>
    %cst_120 = arith.constant 0.000000e+00 : f32
    %376 = vector.broadcast %cst_120 : f32 to vector<4x2x4xf32>
    %377 = math.log %320 : vector<4x2x4xf32>
    %378 = arith.addf %376, %377 : vector<4x2x4xf32>
    %cst_121 = arith.constant 1.000000e+00 : f32
    %379 = vector.broadcast %cst_121 : f32 to vector<4x2x4xf32>
    %380 = arith.addf %320, %379 : vector<4x2x4xf32>
    %381 = math.log %380 : vector<4x2x4xf32>
    %382 = arith.addf %378, %381 : vector<4x2x4xf32>
    %cst_122 = arith.constant 1.000000e+00 : f32
    %383 = vector.broadcast %cst_122 : f32 to vector<4x2x4xf32>
    %384 = arith.addf %380, %383 : vector<4x2x4xf32>
    %385 = math.log %384 : vector<4x2x4xf32>
    %386 = arith.addf %382, %385 : vector<4x2x4xf32>
    %cst_123 = arith.constant 1.000000e+00 : f32
    %387 = vector.broadcast %cst_123 : f32 to vector<4x2x4xf32>
    %388 = arith.addf %384, %387 : vector<4x2x4xf32>
    %389 = math.log %388 : vector<4x2x4xf32>
    %390 = arith.addf %386, %389 : vector<4x2x4xf32>
    %cst_124 = arith.constant 1.000000e+00 : f32
    %391 = vector.broadcast %cst_124 : f32 to vector<4x2x4xf32>
    %392 = arith.addf %388, %391 : vector<4x2x4xf32>
    %393 = math.log %392 : vector<4x2x4xf32>
    %394 = arith.addf %390, %393 : vector<4x2x4xf32>
    %cst_125 = arith.constant 1.000000e+00 : f32
    %395 = vector.broadcast %cst_125 : f32 to vector<4x2x4xf32>
    %396 = arith.addf %392, %395 : vector<4x2x4xf32>
    %397 = math.log %396 : vector<4x2x4xf32>
    %398 = arith.addf %394, %397 : vector<4x2x4xf32>
    %cst_126 = arith.constant 1.000000e+00 : f32
    %399 = vector.broadcast %cst_126 : f32 to vector<4x2x4xf32>
    %400 = arith.addf %396, %399 : vector<4x2x4xf32>
    %401 = math.log %400 : vector<4x2x4xf32>
    %402 = arith.addf %398, %401 : vector<4x2x4xf32>
    %cst_127 = arith.constant 1.000000e+00 : f32
    %403 = vector.broadcast %cst_127 : f32 to vector<4x2x4xf32>
    %404 = arith.addf %400, %403 : vector<4x2x4xf32>
    %405 = math.log %404 : vector<4x2x4xf32>
    %406 = arith.addf %402, %405 : vector<4x2x4xf32>
    %cst_128 = arith.constant 1.000000e+00 : f32
    %407 = vector.broadcast %cst_128 : f32 to vector<4x2x4xf32>
    %408 = arith.addf %404, %407 : vector<4x2x4xf32>
    %cst_129 = arith.constant 1.000000e+00 : f32
    %409 = vector.broadcast %cst_129 : f32 to vector<4x2x4xf32>
    %410 = arith.divf %409, %408 : vector<4x2x4xf32>
    %411 = arith.mulf %410, %410 : vector<4x2x4xf32>
    %cst_130 = arith.constant 5.000000e-01 : f32
    %412 = vector.broadcast %cst_130 : f32 to vector<4x2x4xf32>
    %413 = arith.subf %408, %412 : vector<4x2x4xf32>
    %414 = math.log %408 : vector<4x2x4xf32>
    %415 = arith.mulf %413, %414 : vector<4x2x4xf32>
    %416 = arith.subf %415, %408 : vector<4x2x4xf32>
    %cst_131 = arith.constant 0.918938517 : f32
    %417 = vector.broadcast %cst_131 : f32 to vector<4x2x4xf32>
    %418 = arith.addf %416, %417 : vector<4x2x4xf32>
    %cst_132 = arith.constant 7.93650805E-4 : f32
    %419 = vector.broadcast %cst_132 : f32 to vector<4x2x4xf32>
    %420 = arith.mulf %411, %419 : vector<4x2x4xf32>
    %cst_133 = arith.constant 0.00277777785 : f32
    %421 = vector.broadcast %cst_133 : f32 to vector<4x2x4xf32>
    %422 = arith.subf %421, %420 : vector<4x2x4xf32>
    %423 = arith.mulf %411, %422 : vector<4x2x4xf32>
    %cst_134 = arith.constant 0.0833333358 : f32
    %424 = vector.broadcast %cst_134 : f32 to vector<4x2x4xf32>
    %425 = arith.subf %424, %423 : vector<4x2x4xf32>
    %426 = arith.mulf %410, %425 : vector<4x2x4xf32>
    %427 = arith.addf %418, %426 : vector<4x2x4xf32>
    %428 = arith.subf %427, %406 : vector<4x2x4xf32>
    %cst_135 = arith.constant dense<0.000000e+00> : vector<4x2xf32>
    %429 = vector.multi_reduction <add>, %428, %cst_135 [2] : vector<4x2x4xf32> to vector<4x2xf32>
    %430 = vector.shape_cast %429 : vector<4x2xf32> to vector<4x2x1xf32>
    %431 = arith.subf %375, %430 : vector<4x2x1xf32>
    %cst_136 = arith.constant 0.000000e+00 : f32
    %432 = vector.broadcast %cst_136 : f32 to vector<1x4xf32>
    %433 = math.log %0 : vector<1x4xf32>
    %434 = arith.addf %432, %433 : vector<1x4xf32>
    %cst_137 = arith.constant 1.000000e+00 : f32
    %435 = vector.broadcast %cst_137 : f32 to vector<1x4xf32>
    %436 = arith.addf %0, %435 : vector<1x4xf32>
    %437 = math.log %436 : vector<1x4xf32>
    %438 = arith.addf %434, %437 : vector<1x4xf32>
    %cst_138 = arith.constant 1.000000e+00 : f32
    %439 = vector.broadcast %cst_138 : f32 to vector<1x4xf32>
    %440 = arith.addf %436, %439 : vector<1x4xf32>
    %441 = math.log %440 : vector<1x4xf32>
    %442 = arith.addf %438, %441 : vector<1x4xf32>
    %cst_139 = arith.constant 1.000000e+00 : f32
    %443 = vector.broadcast %cst_139 : f32 to vector<1x4xf32>
    %444 = arith.addf %440, %443 : vector<1x4xf32>
    %445 = math.log %444 : vector<1x4xf32>
    %446 = arith.addf %442, %445 : vector<1x4xf32>
    %cst_140 = arith.constant 1.000000e+00 : f32
    %447 = vector.broadcast %cst_140 : f32 to vector<1x4xf32>
    %448 = arith.addf %444, %447 : vector<1x4xf32>
    %449 = math.log %448 : vector<1x4xf32>
    %450 = arith.addf %446, %449 : vector<1x4xf32>
    %cst_141 = arith.constant 1.000000e+00 : f32
    %451 = vector.broadcast %cst_141 : f32 to vector<1x4xf32>
    %452 = arith.addf %448, %451 : vector<1x4xf32>
    %453 = math.log %452 : vector<1x4xf32>
    %454 = arith.addf %450, %453 : vector<1x4xf32>
    %cst_142 = arith.constant 1.000000e+00 : f32
    %455 = vector.broadcast %cst_142 : f32 to vector<1x4xf32>
    %456 = arith.addf %452, %455 : vector<1x4xf32>
    %457 = math.log %456 : vector<1x4xf32>
    %458 = arith.addf %454, %457 : vector<1x4xf32>
    %cst_143 = arith.constant 1.000000e+00 : f32
    %459 = vector.broadcast %cst_143 : f32 to vector<1x4xf32>
    %460 = arith.addf %456, %459 : vector<1x4xf32>
    %461 = math.log %460 : vector<1x4xf32>
    %462 = arith.addf %458, %461 : vector<1x4xf32>
    %cst_144 = arith.constant 1.000000e+00 : f32
    %463 = vector.broadcast %cst_144 : f32 to vector<1x4xf32>
    %464 = arith.addf %460, %463 : vector<1x4xf32>
    %cst_145 = arith.constant 1.000000e+00 : f32
    %465 = vector.broadcast %cst_145 : f32 to vector<1x4xf32>
    %466 = arith.divf %465, %464 : vector<1x4xf32>
    %467 = arith.mulf %466, %466 : vector<1x4xf32>
    %cst_146 = arith.constant 5.000000e-01 : f32
    %468 = vector.broadcast %cst_146 : f32 to vector<1x4xf32>
    %469 = arith.subf %464, %468 : vector<1x4xf32>
    %470 = math.log %464 : vector<1x4xf32>
    %471 = arith.mulf %469, %470 : vector<1x4xf32>
    %472 = arith.subf %471, %464 : vector<1x4xf32>
    %cst_147 = arith.constant 0.918938517 : f32
    %473 = vector.broadcast %cst_147 : f32 to vector<1x4xf32>
    %474 = arith.addf %472, %473 : vector<1x4xf32>
    %cst_148 = arith.constant 7.93650805E-4 : f32
    %475 = vector.broadcast %cst_148 : f32 to vector<1x4xf32>
    %476 = arith.mulf %467, %475 : vector<1x4xf32>
    %cst_149 = arith.constant 0.00277777785 : f32
    %477 = vector.broadcast %cst_149 : f32 to vector<1x4xf32>
    %478 = arith.subf %477, %476 : vector<1x4xf32>
    %479 = arith.mulf %467, %478 : vector<1x4xf32>
    %cst_150 = arith.constant 0.0833333358 : f32
    %480 = vector.broadcast %cst_150 : f32 to vector<1x4xf32>
    %481 = arith.subf %480, %479 : vector<1x4xf32>
    %482 = arith.mulf %466, %481 : vector<1x4xf32>
    %483 = arith.addf %474, %482 : vector<1x4xf32>
    %484 = arith.subf %483, %462 : vector<1x4xf32>
    %cst_151 = arith.constant dense<0.000000e+00> : vector<1xf32>
    %485 = vector.multi_reduction <add>, %484, %cst_151 [1] : vector<1x4xf32> to vector<1xf32>
    %486 = vector.shape_cast %485 : vector<1xf32> to vector<1x1xf32>
    %cst_152 = arith.constant dense<0.000000e+00> : vector<1xf32>
    %487 = vector.multi_reduction <add>, %0, %cst_152 [1] : vector<1x4xf32> to vector<1xf32>
    %488 = vector.shape_cast %487 : vector<1xf32> to vector<1x1xf32>
    %cst_153 = arith.constant 0.000000e+00 : f32
    %489 = vector.broadcast %cst_153 : f32 to vector<1x1xf32>
    %490 = math.log %488 : vector<1x1xf32>
    %491 = arith.addf %489, %490 : vector<1x1xf32>
    %cst_154 = arith.constant 1.000000e+00 : f32
    %492 = vector.broadcast %cst_154 : f32 to vector<1x1xf32>
    %493 = arith.addf %488, %492 : vector<1x1xf32>
    %494 = math.log %493 : vector<1x1xf32>
    %495 = arith.addf %491, %494 : vector<1x1xf32>
    %cst_155 = arith.constant 1.000000e+00 : f32
    %496 = vector.broadcast %cst_155 : f32 to vector<1x1xf32>
    %497 = arith.addf %493, %496 : vector<1x1xf32>
    %498 = math.log %497 : vector<1x1xf32>
    %499 = arith.addf %495, %498 : vector<1x1xf32>
    %cst_156 = arith.constant 1.000000e+00 : f32
    %500 = vector.broadcast %cst_156 : f32 to vector<1x1xf32>
    %501 = arith.addf %497, %500 : vector<1x1xf32>
    %502 = math.log %501 : vector<1x1xf32>
    %503 = arith.addf %499, %502 : vector<1x1xf32>
    %cst_157 = arith.constant 1.000000e+00 : f32
    %504 = vector.broadcast %cst_157 : f32 to vector<1x1xf32>
    %505 = arith.addf %501, %504 : vector<1x1xf32>
    %506 = math.log %505 : vector<1x1xf32>
    %507 = arith.addf %503, %506 : vector<1x1xf32>
    %cst_158 = arith.constant 1.000000e+00 : f32
    %508 = vector.broadcast %cst_158 : f32 to vector<1x1xf32>
    %509 = arith.addf %505, %508 : vector<1x1xf32>
    %510 = math.log %509 : vector<1x1xf32>
    %511 = arith.addf %507, %510 : vector<1x1xf32>
    %cst_159 = arith.constant 1.000000e+00 : f32
    %512 = vector.broadcast %cst_159 : f32 to vector<1x1xf32>
    %513 = arith.addf %509, %512 : vector<1x1xf32>
    %514 = math.log %513 : vector<1x1xf32>
    %515 = arith.addf %511, %514 : vector<1x1xf32>
    %cst_160 = arith.constant 1.000000e+00 : f32
    %516 = vector.broadcast %cst_160 : f32 to vector<1x1xf32>
    %517 = arith.addf %513, %516 : vector<1x1xf32>
    %518 = math.log %517 : vector<1x1xf32>
    %519 = arith.addf %515, %518 : vector<1x1xf32>
    %cst_161 = arith.constant 1.000000e+00 : f32
    %520 = vector.broadcast %cst_161 : f32 to vector<1x1xf32>
    %521 = arith.addf %517, %520 : vector<1x1xf32>
    %cst_162 = arith.constant 1.000000e+00 : f32
    %522 = vector.broadcast %cst_162 : f32 to vector<1x1xf32>
    %523 = arith.divf %522, %521 : vector<1x1xf32>
    %524 = arith.mulf %523, %523 : vector<1x1xf32>
    %cst_163 = arith.constant 5.000000e-01 : f32
    %525 = vector.broadcast %cst_163 : f32 to vector<1x1xf32>
    %526 = arith.subf %521, %525 : vector<1x1xf32>
    %527 = math.log %521 : vector<1x1xf32>
    %528 = arith.mulf %526, %527 : vector<1x1xf32>
    %529 = arith.subf %528, %521 : vector<1x1xf32>
    %cst_164 = arith.constant 0.918938517 : f32
    %530 = vector.broadcast %cst_164 : f32 to vector<1x1xf32>
    %531 = arith.addf %529, %530 : vector<1x1xf32>
    %cst_165 = arith.constant 7.93650805E-4 : f32
    %532 = vector.broadcast %cst_165 : f32 to vector<1x1xf32>
    %533 = arith.mulf %524, %532 : vector<1x1xf32>
    %cst_166 = arith.constant 0.00277777785 : f32
    %534 = vector.broadcast %cst_166 : f32 to vector<1x1xf32>
    %535 = arith.subf %534, %533 : vector<1x1xf32>
    %536 = arith.mulf %524, %535 : vector<1x1xf32>
    %cst_167 = arith.constant 0.0833333358 : f32
    %537 = vector.broadcast %cst_167 : f32 to vector<1x1xf32>
    %538 = arith.subf %537, %536 : vector<1x1xf32>
    %539 = arith.mulf %523, %538 : vector<1x1xf32>
    %540 = arith.addf %531, %539 : vector<1x1xf32>
    %541 = arith.subf %540, %519 : vector<1x1xf32>
    %542 = arith.subf %486, %541 : vector<1x1xf32>
    %543 = vector.broadcast %187 : vector<1x1x4xf32> to vector<4x2x4xf32>
    %544 = arith.subf %320, %543 : vector<4x2x4xf32>
    %cst_168 = arith.constant 0.000000e+00 : f32
    %545 = vector.broadcast %cst_168 : f32 to vector<4x2x4xf32>
    %cst_169 = arith.constant 1.000000e+00 : f32
    %546 = vector.broadcast %cst_169 : f32 to vector<4x2x4xf32>
    %547 = arith.divf %546, %320 : vector<4x2x4xf32>
    %548 = arith.addf %545, %547 : vector<4x2x4xf32>
    %cst_170 = arith.constant 1.000000e+00 : f32
    %549 = vector.broadcast %cst_170 : f32 to vector<4x2x4xf32>
    %550 = arith.addf %320, %549 : vector<4x2x4xf32>
    %cst_171 = arith.constant 1.000000e+00 : f32
    %551 = vector.broadcast %cst_171 : f32 to vector<4x2x4xf32>
    %552 = arith.divf %551, %550 : vector<4x2x4xf32>
    %553 = arith.addf %548, %552 : vector<4x2x4xf32>
    %cst_172 = arith.constant 1.000000e+00 : f32
    %554 = vector.broadcast %cst_172 : f32 to vector<4x2x4xf32>
    %555 = arith.addf %550, %554 : vector<4x2x4xf32>
    %cst_173 = arith.constant 1.000000e+00 : f32
    %556 = vector.broadcast %cst_173 : f32 to vector<4x2x4xf32>
    %557 = arith.divf %556, %555 : vector<4x2x4xf32>
    %558 = arith.addf %553, %557 : vector<4x2x4xf32>
    %cst_174 = arith.constant 1.000000e+00 : f32
    %559 = vector.broadcast %cst_174 : f32 to vector<4x2x4xf32>
    %560 = arith.addf %555, %559 : vector<4x2x4xf32>
    %cst_175 = arith.constant 1.000000e+00 : f32
    %561 = vector.broadcast %cst_175 : f32 to vector<4x2x4xf32>
    %562 = arith.divf %561, %560 : vector<4x2x4xf32>
    %563 = arith.addf %558, %562 : vector<4x2x4xf32>
    %cst_176 = arith.constant 1.000000e+00 : f32
    %564 = vector.broadcast %cst_176 : f32 to vector<4x2x4xf32>
    %565 = arith.addf %560, %564 : vector<4x2x4xf32>
    %cst_177 = arith.constant 1.000000e+00 : f32
    %566 = vector.broadcast %cst_177 : f32 to vector<4x2x4xf32>
    %567 = arith.divf %566, %565 : vector<4x2x4xf32>
    %568 = arith.addf %563, %567 : vector<4x2x4xf32>
    %cst_178 = arith.constant 1.000000e+00 : f32
    %569 = vector.broadcast %cst_178 : f32 to vector<4x2x4xf32>
    %570 = arith.addf %565, %569 : vector<4x2x4xf32>
    %cst_179 = arith.constant 1.000000e+00 : f32
    %571 = vector.broadcast %cst_179 : f32 to vector<4x2x4xf32>
    %572 = arith.divf %571, %570 : vector<4x2x4xf32>
    %573 = arith.addf %568, %572 : vector<4x2x4xf32>
    %cst_180 = arith.constant 1.000000e+00 : f32
    %574 = vector.broadcast %cst_180 : f32 to vector<4x2x4xf32>
    %575 = arith.addf %570, %574 : vector<4x2x4xf32>
    %cst_181 = arith.constant 1.000000e+00 : f32
    %576 = vector.broadcast %cst_181 : f32 to vector<4x2x4xf32>
    %577 = arith.divf %576, %575 : vector<4x2x4xf32>
    %578 = arith.addf %573, %577 : vector<4x2x4xf32>
    %cst_182 = arith.constant 1.000000e+00 : f32
    %579 = vector.broadcast %cst_182 : f32 to vector<4x2x4xf32>
    %580 = arith.addf %575, %579 : vector<4x2x4xf32>
    %cst_183 = arith.constant 1.000000e+00 : f32
    %581 = vector.broadcast %cst_183 : f32 to vector<4x2x4xf32>
    %582 = arith.divf %581, %580 : vector<4x2x4xf32>
    %583 = arith.addf %578, %582 : vector<4x2x4xf32>
    %cst_184 = arith.constant 1.000000e+00 : f32
    %584 = vector.broadcast %cst_184 : f32 to vector<4x2x4xf32>
    %585 = arith.addf %580, %584 : vector<4x2x4xf32>
    %cst_185 = arith.constant 1.000000e+00 : f32
    %586 = vector.broadcast %cst_185 : f32 to vector<4x2x4xf32>
    %587 = arith.divf %586, %585 : vector<4x2x4xf32>
    %588 = arith.mulf %587, %587 : vector<4x2x4xf32>
    %589 = math.log %585 : vector<4x2x4xf32>
    %cst_186 = arith.constant 5.000000e-01 : f32
    %590 = vector.broadcast %cst_186 : f32 to vector<4x2x4xf32>
    %591 = arith.mulf %590, %587 : vector<4x2x4xf32>
    %592 = arith.subf %589, %591 : vector<4x2x4xf32>
    %cst_187 = arith.constant 0.0039682542 : f32
    %593 = vector.broadcast %cst_187 : f32 to vector<4x2x4xf32>
    %594 = arith.mulf %588, %593 : vector<4x2x4xf32>
    %cst_188 = arith.constant 0.00833333377 : f32
    %595 = vector.broadcast %cst_188 : f32 to vector<4x2x4xf32>
    %596 = arith.subf %595, %594 : vector<4x2x4xf32>
    %597 = arith.mulf %588, %596 : vector<4x2x4xf32>
    %cst_189 = arith.constant 0.0833333358 : f32
    %598 = vector.broadcast %cst_189 : f32 to vector<4x2x4xf32>
    %599 = arith.subf %598, %597 : vector<4x2x4xf32>
    %600 = arith.mulf %588, %599 : vector<4x2x4xf32>
    %601 = arith.subf %592, %600 : vector<4x2x4xf32>
    %602 = arith.subf %601, %583 : vector<4x2x4xf32>
    %cst_190 = arith.constant 0.000000e+00 : f32
    %603 = vector.broadcast %cst_190 : f32 to vector<4x2x1xf32>
    %cst_191 = arith.constant 1.000000e+00 : f32
    %604 = vector.broadcast %cst_191 : f32 to vector<4x2x1xf32>
    %605 = arith.divf %604, %322 : vector<4x2x1xf32>
    %606 = arith.addf %603, %605 : vector<4x2x1xf32>
    %cst_192 = arith.constant 1.000000e+00 : f32
    %607 = vector.broadcast %cst_192 : f32 to vector<4x2x1xf32>
    %608 = arith.addf %322, %607 : vector<4x2x1xf32>
    %cst_193 = arith.constant 1.000000e+00 : f32
    %609 = vector.broadcast %cst_193 : f32 to vector<4x2x1xf32>
    %610 = arith.divf %609, %608 : vector<4x2x1xf32>
    %611 = arith.addf %606, %610 : vector<4x2x1xf32>
    %cst_194 = arith.constant 1.000000e+00 : f32
    %612 = vector.broadcast %cst_194 : f32 to vector<4x2x1xf32>
    %613 = arith.addf %608, %612 : vector<4x2x1xf32>
    %cst_195 = arith.constant 1.000000e+00 : f32
    %614 = vector.broadcast %cst_195 : f32 to vector<4x2x1xf32>
    %615 = arith.divf %614, %613 : vector<4x2x1xf32>
    %616 = arith.addf %611, %615 : vector<4x2x1xf32>
    %cst_196 = arith.constant 1.000000e+00 : f32
    %617 = vector.broadcast %cst_196 : f32 to vector<4x2x1xf32>
    %618 = arith.addf %613, %617 : vector<4x2x1xf32>
    %cst_197 = arith.constant 1.000000e+00 : f32
    %619 = vector.broadcast %cst_197 : f32 to vector<4x2x1xf32>
    %620 = arith.divf %619, %618 : vector<4x2x1xf32>
    %621 = arith.addf %616, %620 : vector<4x2x1xf32>
    %cst_198 = arith.constant 1.000000e+00 : f32
    %622 = vector.broadcast %cst_198 : f32 to vector<4x2x1xf32>
    %623 = arith.addf %618, %622 : vector<4x2x1xf32>
    %cst_199 = arith.constant 1.000000e+00 : f32
    %624 = vector.broadcast %cst_199 : f32 to vector<4x2x1xf32>
    %625 = arith.divf %624, %623 : vector<4x2x1xf32>
    %626 = arith.addf %621, %625 : vector<4x2x1xf32>
    %cst_200 = arith.constant 1.000000e+00 : f32
    %627 = vector.broadcast %cst_200 : f32 to vector<4x2x1xf32>
    %628 = arith.addf %623, %627 : vector<4x2x1xf32>
    %cst_201 = arith.constant 1.000000e+00 : f32
    %629 = vector.broadcast %cst_201 : f32 to vector<4x2x1xf32>
    %630 = arith.divf %629, %628 : vector<4x2x1xf32>
    %631 = arith.addf %626, %630 : vector<4x2x1xf32>
    %cst_202 = arith.constant 1.000000e+00 : f32
    %632 = vector.broadcast %cst_202 : f32 to vector<4x2x1xf32>
    %633 = arith.addf %628, %632 : vector<4x2x1xf32>
    %cst_203 = arith.constant 1.000000e+00 : f32
    %634 = vector.broadcast %cst_203 : f32 to vector<4x2x1xf32>
    %635 = arith.divf %634, %633 : vector<4x2x1xf32>
    %636 = arith.addf %631, %635 : vector<4x2x1xf32>
    %cst_204 = arith.constant 1.000000e+00 : f32
    %637 = vector.broadcast %cst_204 : f32 to vector<4x2x1xf32>
    %638 = arith.addf %633, %637 : vector<4x2x1xf32>
    %cst_205 = arith.constant 1.000000e+00 : f32
    %639 = vector.broadcast %cst_205 : f32 to vector<4x2x1xf32>
    %640 = arith.divf %639, %638 : vector<4x2x1xf32>
    %641 = arith.addf %636, %640 : vector<4x2x1xf32>
    %cst_206 = arith.constant 1.000000e+00 : f32
    %642 = vector.broadcast %cst_206 : f32 to vector<4x2x1xf32>
    %643 = arith.addf %638, %642 : vector<4x2x1xf32>
    %cst_207 = arith.constant 1.000000e+00 : f32
    %644 = vector.broadcast %cst_207 : f32 to vector<4x2x1xf32>
    %645 = arith.divf %644, %643 : vector<4x2x1xf32>
    %646 = arith.mulf %645, %645 : vector<4x2x1xf32>
    %647 = math.log %643 : vector<4x2x1xf32>
    %cst_208 = arith.constant 5.000000e-01 : f32
    %648 = vector.broadcast %cst_208 : f32 to vector<4x2x1xf32>
    %649 = arith.mulf %648, %645 : vector<4x2x1xf32>
    %650 = arith.subf %647, %649 : vector<4x2x1xf32>
    %cst_209 = arith.constant 0.0039682542 : f32
    %651 = vector.broadcast %cst_209 : f32 to vector<4x2x1xf32>
    %652 = arith.mulf %646, %651 : vector<4x2x1xf32>
    %cst_210 = arith.constant 0.00833333377 : f32
    %653 = vector.broadcast %cst_210 : f32 to vector<4x2x1xf32>
    %654 = arith.subf %653, %652 : vector<4x2x1xf32>
    %655 = arith.mulf %646, %654 : vector<4x2x1xf32>
    %cst_211 = arith.constant 0.0833333358 : f32
    %656 = vector.broadcast %cst_211 : f32 to vector<4x2x1xf32>
    %657 = arith.subf %656, %655 : vector<4x2x1xf32>
    %658 = arith.mulf %646, %657 : vector<4x2x1xf32>
    %659 = arith.subf %650, %658 : vector<4x2x1xf32>
    %660 = arith.subf %659, %641 : vector<4x2x1xf32>
    %661 = vector.broadcast %660 : vector<4x2x1xf32> to vector<4x2x4xf32>
    %662 = arith.subf %602, %661 : vector<4x2x4xf32>
    %663 = arith.mulf %544, %662 : vector<4x2x4xf32>
    %cst_212 = arith.constant dense<0.000000e+00> : vector<4x2xf32>
    %664 = vector.multi_reduction <add>, %663, %cst_212 [2] : vector<4x2x4xf32> to vector<4x2xf32>
    %665 = vector.shape_cast %664 : vector<4x2xf32> to vector<4x2x1xf32>
    %666 = arith.addf %665, %431 : vector<4x2x1xf32>
    %667 = vector.shape_cast %542 : vector<1x1xf32> to vector<1x1x1xf32>
    %668 = vector.broadcast %667 : vector<1x1x1xf32> to vector<4x2x1xf32>
    %669 = arith.addf %666, %668 : vector<4x2x1xf32>
    %670 = vector.extract_strided_slice %312 {offsets = [0, 0, 0], sizes = [1, 2, 4], strides = [1, 1, 1]} : vector<4x2x4xf32> to vector<1x2x4xf32>
    %671 = vector.shape_cast %670 : vector<1x2x4xf32> to vector<2x4xf32>
    %672 = vector.extract_strided_slice %669 {offsets = [0, 0, 0], sizes = [1, 2, 1], strides = [1, 1, 1]} : vector<4x2x1xf32> to vector<1x2x1xf32>
    %673 = vector.shape_cast %672 : vector<1x2x1xf32> to vector<2x1xf32>
    %674 = vector.extract_strided_slice %312 {offsets = [1, 0, 0], sizes = [1, 2, 4], strides = [1, 1, 1]} : vector<4x2x4xf32> to vector<1x2x4xf32>
    %675 = vector.shape_cast %674 : vector<1x2x4xf32> to vector<2x4xf32>
    %676 = arith.addf %671, %675 : vector<2x4xf32>
    %677 = vector.extract_strided_slice %669 {offsets = [1, 0, 0], sizes = [1, 2, 1], strides = [1, 1, 1]} : vector<4x2x1xf32> to vector<1x2x1xf32>
    %678 = vector.shape_cast %677 : vector<1x2x1xf32> to vector<2x1xf32>
    %679 = arith.addf %673, %678 : vector<2x1xf32>
    %680 = vector.extract_strided_slice %312 {offsets = [2, 0, 0], sizes = [1, 2, 4], strides = [1, 1, 1]} : vector<4x2x4xf32> to vector<1x2x4xf32>
    %681 = vector.shape_cast %680 : vector<1x2x4xf32> to vector<2x4xf32>
    %682 = arith.addf %676, %681 : vector<2x4xf32>
    %683 = vector.extract_strided_slice %669 {offsets = [2, 0, 0], sizes = [1, 2, 1], strides = [1, 1, 1]} : vector<4x2x1xf32> to vector<1x2x1xf32>
    %684 = vector.shape_cast %683 : vector<1x2x1xf32> to vector<2x1xf32>
    %685 = arith.addf %679, %684 : vector<2x1xf32>
    %686 = vector.extract_strided_slice %312 {offsets = [3, 0, 0], sizes = [1, 2, 4], strides = [1, 1, 1]} : vector<4x2x4xf32> to vector<1x2x4xf32>
    %687 = vector.shape_cast %686 : vector<1x2x4xf32> to vector<2x4xf32>
    %688 = arith.addf %682, %687 : vector<2x4xf32>
    %689 = vector.extract_strided_slice %669 {offsets = [3, 0, 0], sizes = [1, 2, 1], strides = [1, 1, 1]} : vector<4x2x1xf32> to vector<1x2x1xf32>
    %690 = vector.shape_cast %689 : vector<1x2x1xf32> to vector<2x1xf32>
    %691 = arith.addf %685, %690 : vector<2x1xf32>
    %692 = tpu.concatenate %39, %74 in 1 : vector<2x4xf32>, vector<2x4xf32> -> vector<2x8xf32>
    %cst_213 = arith.constant 0.000000e+00 : f32
    %693 = vector.broadcast %cst_213 : f32 to vector<2x107xf32>
    %694 = tpu.concatenate %692, %94, %180, %688, %691, %693 in 1 : vector<2x8xf32>, vector<2x4xf32>, vector<2x4xf32>, vector<2x4xf32>, vector<2x1xf32>, vector<2x107xf32> -> vector<2x128xf32>
    %c0_214 = arith.constant 0 : index
    %c0_215 = arith.constant 0 : index
    %695 = vector.load %arg11[%c0_214, %c0_215] : memref<2x128xf32, #tpu.memory_space<vmem>>, vector<2x128xf32>
    tpu.vector_store %arg11[%c0_214, %c0_215], %694 {strides = array<i32>} : memref<2x128xf32, #tpu.memory_space<vmem>>, vector<2x128xf32>,
    return
  }
  func.func @transform_0(%arg0: i32) -> (i32, i32, i32) {
    %c0_i32 = arith.constant 0 : i32
    %c0_i32_0 = arith.constant 0 : i32
    %c0_i32_1 = arith.constant 0 : i32
    return %arg0, %c0_i32, %c0_i32_0 : i32, i32, i32
  }
  func.func @transform_1(%arg0: i32) -> (i32, i32) {
    %c0_i32 = arith.constant 0 : i32
    %c0_i32_0 = arith.constant 0 : i32
    return %arg0, %c0_i32 : i32, i32
  }
  func.func @transform_2(%arg0: i32) -> (i32, i32) {
    %c0_i32 = arith.constant 0 : i32
    %c0_i32_0 = arith.constant 0 : i32
    %c0_i32_1 = arith.constant 0 : i32
    return %c0_i32, %c0_i32_0 : i32, i32
  }
  func.func @transform_3(%arg0: i32) -> (i32, i32) {
    %c0_i32 = arith.constant 0 : i32
    %c0_i32_0 = arith.constant 0 : i32
    %c0_i32_1 = arith.constant 0 : i32
    return %c0_i32, %c0_i32_0 : i32, i32
  }
  func.func @transform_4(%arg0: i32) -> (i32, i32, i32) {
    %c0_i32 = arith.constant 0 : i32
    %c0_i32_0 = arith.constant 0 : i32
    %c0_i32_1 = arith.constant 0 : i32
    %c0_i32_2 = arith.constant 0 : i32
    return %c0_i32, %c0_i32_0, %c0_i32_1 : i32, i32, i32
  }
  func.func @transform_5(%arg0: i32) -> (i32, i32) {
    %c0_i32 = arith.constant 0 : i32
    %c0_i32_0 = arith.constant 0 : i32
    %c0_i32_1 = arith.constant 0 : i32
    return %c0_i32, %c0_i32_0 : i32, i32
  }
  func.func @transform_6(%arg0: i32) -> (i32, i32) {
    %c0_i32 = arith.constant 0 : i32
    %c0_i32_0 = arith.constant 0 : i32
    %c0_i32_1 = arith.constant 0 : i32
    return %c0_i32, %c0_i32_0 : i32, i32
  }
  func.func @transform_7(%arg0: i32) -> (i32, i32) {
    %c0_i32 = arith.constant 0 : i32
    %c0_i32_0 = arith.constant 0 : i32
    %c0_i32_1 = arith.constant 0 : i32
    return %c0_i32, %c0_i32_0 : i32, i32
  }
  func.func @transform_8(%arg0: i32) -> (i32, i32) {
    %c0_i32 = arith.constant 0 : i32
    %c0_i32_0 = arith.constant 0 : i32
    %c0_i32_1 = arith.constant 0 : i32
    return %c0_i32, %c0_i32_0 : i32, i32
  }
  func.func @transform_9(%arg0: i32) -> (i32, i32) {
    %c0_i32 = arith.constant 0 : i32
    %c0_i32_0 = arith.constant 0 : i32
    return %arg0, %c0_i32 : i32, i32
  }
  func.func @transform_10(%arg0: i32) -> (i32, i32) {
    %c0_i32 = arith.constant 0 : i32
    %c0_i32_0 = arith.constant 0 : i32
    return %arg0, %c0_i32 : i32, i32
  }
}

</mosaic_0001>

<bundles_post_ra>
// kernel: tpu_custom_call.1
= control target key start
LH: loop header
LB: loop body
LE: loop exit
PB: predicated region body
PF: predicated region fallthrough
CT: control target
= control target key end

     0   :  { %v51_v2 = vlaneseq  ;;  %v2868_v4 = vmov 1966171168   ;;  %vm72_vm0 = vcmask 1041408   ;;  %s4360_s0 = inlined_call_operand.vmem [shape: f32[2,2,256], index: 0, kind: input, shape index: {}]   ;;  %s4361_s1 = inlined_call_operand.vmem [shape: f32[2,256], index: 1, kind: input, shape index: {}]   ;;  %s4362_s2 = inlined_call_operand.vmem [shape: f32[2,512], index: 2, kind: input, shape index: {}]   ;;  %s4363_s3 = inlined_call_operand.vmem [shape: f32[2,512], index: 3, kind: input, shape index: {}]   ;;  %s4364_s4 = inlined_call_operand.vmem [shape: f32[2,512,4], index: 4, kind: input, shape index: {}]   ;;  %s4365_s5 = inlined_call_operand.vmem [shape: f32[1,8], index: 5, kind: input, shape index: {}]   ;;  %s4366_s6 = inlined_call_operand.vmem [shape: f32[256,4], index: 6, kind: input, shape index: {}]   ;;  %s4367_s7 = inlined_call_operand.vmem [shape: f32[1,4], index: 7, kind: input, shape index: {}]   ;;  %s4368_s8 = inlined_call_operand.vmem [shape: f32[1,4], index: 8, kind: input, shape index: {}]   ;;  %s4369_s9 = inlined_call_operand.vmem [shape: f32[2,4], index: 9, kind: input, shape index: {}]   ;;  %s4370_s10 = inlined_call_operand.hbm [shape: f32[2,128], index: 10, kind: output, shape index: {}]  }
   0x1   :  { %v42_v0 = vld [vmem:[%s4360_s0] ss:$2 sm:$0x3]  ;;  %v2134_v1 = vld [vmem:[%s4360_s0 + $0x4] ss:$2 sm:$0x3]  ;;  %v49_v5 = vunpack.c.l.s4 %v2868_v4 }
   0x2   :  { %v2136_v3 = vld [vmem:[%s4360_s0 + $0x1] ss:$2 sm:$0x3]  ;;  %v2939_v6 = vshrl.u32 %v51_v2, 7  ;;  %v186_v9 = vld [vmem:[%s4364_s4 + $0x88] sm:$0xff]  ;;  %v47_v14 = vcombine.low %v42_v0, %v2134_v1  ;;  %v187_v23 = vld [vmem:[%s4364_s4 + $0x90] sm:$0xff] }
   0x3   :  { %v2137_v7 = vld [vmem:[%s4360_s0 + $0x5] ss:$2 sm:$0x3]  ;;  %v218_v12 = vld [vmem:[%s4364_s4 + $0x188] sm:$0xff]  ;;  %v50_v15 = vunpack.c.0.s8 %v49_v5  ;;  %v188_v24 = vld [vmem:[%s4364_s4 + $0x98] sm:$0xff] }
   0x4   :  { %v185_v8 = vld [vmem:[%s4364_s4 + $0x80] sm:$0xff]  ;;  %v373_v16 = vcombine.low %v2136_v3, %v2137_v7  ;;  %v170_v18 = vld [vmem:[%s4364_s4 + $0x8] sm:$0xff]  ;;  %v219_v25 = vld [vmem:[%s4364_s4 + $0x190] sm:$0xff]  ;;  %v242_v27 = vpack.c.bf16 %v188_v24, %v187_v23 }
   0x5   :  { %v241_v10 = vpack.c.bf16 %v186_v9, %v185_v8  ;;  %v217_v11 = vld [vmem:[%s4364_s4 + $0x180] sm:$0xff]  ;;  %v202_v20 = vld [vmem:[%s4364_s4 + $0x108] sm:$0xff]  ;;  %v53_v26 = vsub.s32 %v50_v15, %v2939_v6  ;;  %v220_v28 = vld [vmem:[%s4364_s4 + $0x198] sm:$0xff] }
   0x6   :  { %v169_v13 = vld [vmem:[%s4364_s4] sm:$0xff]  ;;  %v257_v17 = vpack.c.bf16 %v218_v12, %v217_v11  ;;  %v171_v29 = vld [vmem:[%s4364_s4 + $0x10] sm:$0xff]  ;;  %v172_v30 = vld [vmem:[%s4364_s4 + $0x18] sm:$0xff]  ;;  %v258_v31 = vpack.c.bf16 %v220_v28, %v219_v25 }
   0x7   :  { %v201_v19 = vld [vmem:[%s4364_s4 + $0x100] sm:$0xff]  ;;  %2214 = vmatprep.subr.bf16.mxu0 %v241_v10  ;;  %v233_v21 = vpack.c.bf16 %v170_v18, %v169_v13  ;;  %v234_v32 = vpack.c.bf16 %v172_v30, %v171_v29  ;;  %v203_v33 = vld [vmem:[%s4364_s4 + $0x110] sm:$0xff]  ;;  %v204_v34 = vld [vmem:[%s4364_s4 + $0x118] sm:$0xff]  ;;  %v54_v36 = vrot.slane %v47_v14, %v53_v26  ;;  %v380_v37 = vrot.slane %v373_v16, %v53_v26 }
   0x8   :  { %v249_v22 = vpack.c.bf16 %v202_v20, %v201_v19  ;;  %2236 = vmatprep.subr.bf16.mxu1 %v257_v17  ;;  %v189_v35 = vld [vmem:[%s4364_s4 + $0xa0] sm:$0xff]  ;;  %v250_v38 = vpack.c.bf16 %v204_v34, %v203_v33  ;;  %v190_v39 = vld [vmem:[%s4364_s4 + $0xa8] sm:$0xff]  ;;  %v191_v52 = vld [vmem:[%s4364_s4 + $0xb0] sm:$0xff] }
   0x9   :  { %2215 = vmatpush3.bf16.msra.mxu0 %v233_v21  ;;  %v221_v40 = vld [vmem:[%s4364_s4 + $0x1a0] sm:$0xff]  ;;  %v222_v41 = vld [vmem:[%s4364_s4 + $0x1a8] sm:$0xff]  ;;  %v243_v42 = vpack.c.bf16 %v190_v39, %v189_v35  ;;  %v55_v47 = vcombine.high %v54_v36, %v54_v36  ;;  %v62_v48 = vrot.slane %v54_v36, %v53_v26  ;;  %v381_v49 = vcombine.high %v380_v37, %v380_v37  ;;  %v192_v53 = vld [vmem:[%s4364_s4 + $0xb8] sm:$0xff] }
   0xa   :  { %2237 = vmatpush3.bf16.msra.mxu1 %v249_v22  ;;  %2216 = vmatprep.subr.bf16.mxu0 %v242_v27  ;;  %v259_v43 = vpack.c.bf16 %v222_v41, %v221_v40  ;;  %v173_v44 = vld [vmem:[%s4364_s4 + $0x20] sm:$0xff]  ;;  %v174_v45 = vld [vmem:[%s4364_s4 + $0x28] sm:$0xff]  ;;  %v388_v50 = vrot.slane %v380_v37, %v53_v26  ;;  %v223_v56 = vld [vmem:[%s4364_s4 + $0x1b0] sm:$0xff]  ;;  %v244_v62 = vpack.c.bf16 %v192_v53, %v191_v52 }
   0xb   :  { %2238 = vmatprep.subr.bf16.mxu1 %v258_v31  ;;  %v205_v46 = vld [vmem:[%s4364_s4 + $0x120] sm:$0xff]  ;;  %v206_v51 = vld [vmem:[%s4364_s4 + $0x128] sm:$0xff]  ;;  %v235_v54 = vpack.c.bf16 %v174_v45, %v173_v44  ;;  %v224_v57 = vld [vmem:[%s4364_s4 + $0x1b8] sm:$0xff]  ;;  %v69_v59 = vrot.slane %v55_v47, %v53_v26  ;;  %v73_v60 = vsel %vm72_vm0, %v62_v48, 0.0  ;;  %v395_v61 = vrot.slane %v381_v49, %v53_v26 }
   0xc   :  { %v251_v55 = vpack.c.bf16 %v206_v51, %v205_v46  ;;  %v175_v58 = vld [vmem:[%s4364_s4 + $0x30] sm:$0xff]  ;;  %v176_v63 = vld [vmem:[%s4364_s4 + $0x38] sm:$0xff]  ;;  %v260_v2 = vpack.c.bf16 %v224_v57, %v223_v56  ;;  %v193_v3 = vld [vmem:[%s4364_s4 + $0xc0] sm:$0xff]  ;;  %v398_v8 = vsel %vm72_vm0, %v388_v50, 0.0 }
   0xd   :  { %2217 = vmatpush3.bf16.msra.mxu0 %v234_v32  ;;  %v207_v0 = vld [vmem:[%s4364_s4 + $0x130] sm:$0xff]  ;;  %v208_v1 = vld [vmem:[%s4364_s4 + $0x138] sm:$0xff]  ;;  %v194_v4 = vld [vmem:[%s4364_s4 + $0xc8] sm:$0xff]  ;;  %v74_v7 = vsel %vm72_vm0, %v69_v59, 0.0  ;;  %v399_v9 = vsel %vm72_vm0, %v395_v61, 0.0  ;;  %v236_v12 = vpack.c.bf16 %v176_v63, %v175_v58 }
   0xe   :  { %2239 = vmatpush3.bf16.msra.mxu1 %v250_v38  ;;  %2218 = vmatprep.subr.bf16.mxu0 %v243_v42  ;;  %v225_v5 = vld [vmem:[%s4364_s4 + $0x1c0] sm:$0xff]  ;;  %v226_v10 = vld [vmem:[%s4364_s4 + $0x1c8] sm:$0xff]  ;;  %v75_v11 = vadd.f32 %v74_v7, %v73_v60  ;;  %v252_v13 = vpack.c.bf16 %v208_v1, %v207_v0  ;;  %v245_v16 = vpack.c.bf16 %v194_v4, %v193_v3  ;;  %v195_v20 = vld [vmem:[%s4364_s4 + $0xd0] sm:$0xff] }
   0xf   :  { %2240 = vmatprep.subr.bf16.mxu1 %v259_v43  ;;  %v177_v14 = vld [vmem:[%s4364_s4 + $0x40] sm:$0xff]  ;;  %v178_v15 = vld [vmem:[%s4364_s4 + $0x48] sm:$0xff]  ;;  %v261_v17 = vpack.c.bf16 %v226_v10, %v225_v5  ;;  %v400_v21 = vadd.f32 %v399_v9, %v398_v8  ;;  %v196_v22 = vld [vmem:[%s4364_s4 + $0xd8] sm:$0xff] }
  0x10   :  { %v209_v18 = vld [vmem:[%s4364_s4 + $0x140] sm:$0xff]  ;;  %v210_v19 = vld [vmem:[%s4364_s4 + $0x148] sm:$0xff]  ;;  %76 = vadd.xlane.f32.xlu0 %v75_v11  ;;  %v227_v23 = vld [vmem:[%s4364_s4 + $0x1d0] sm:$0xff] }
  0x11   :  { %2219 = vmatpush3.bf16.msra.mxu0 %v235_v54  ;;  %v228_v24 = vld [vmem:[%s4364_s4 + $0x1d8] sm:$0xff] }
  0x12   :  { %2241 = vmatpush3.bf16.msra.mxu1 %v251_v55  ;;  %2220 = vmatprep.subr.bf16.mxu0 %v244_v62 }
  0x13   :  { %2242 = vmatprep.subr.bf16.mxu1 %v260_v2 }
  0x14   :  { %15 = vsyncpa [#allocation3], 0  ;;  %v237_v25 = vpack.c.bf16 %v178_v15, %v177_v14  ;;  %v253_v26 = vpack.c.bf16 %v210_v19, %v209_v18  ;;  %v179_v27 = vld [vmem:[%s4364_s4 + $0x50] sm:$0xff]  ;;  %v246_v28 = vpack.c.bf16 %v196_v22, %v195_v20  ;;  %v262_v29 = vpack.c.bf16 %v228_v24, %v227_v23  ;;  %v180_v30 = vld [vmem:[%s4364_s4 + $0x58] sm:$0xff]  ;;  %401 = vadd.xlane.f32.xlu0 %v400_v21  ;;  %s2869_s12 = smov 124   ;;  %s2871_s11 = smov 12  }
  0x15   :  { %2221 = vmatpush3.bf16.msra.mxu0 %v236_v12  ;;  %v211_v31 = vld [vmem:[%s4364_s4 + $0x150] sm:$0xff]  ;;  %v212_v32 = vld [vmem:[%s4364_s4 + $0x158] sm:$0xff]  ;;  %v238_v33 = vpack.c.bf16 %v180_v30, %v179_v27  ;;  %v197_v35 = vld [vmem:[%s4364_s4 + $0xe0] sm:$0xff]  ;;  %v3160_v2 = vsub.s32 0, %v2939_v6  ;;  %v86_v3 = vsub.s32 2, %v2939_v6  ;;  %v94_v4 = vsub.s32 6, %v2939_v6 }
  0x16   :  { %2243 = vmatpush3.bf16.msra.mxu1 %v252_v13  ;;  %2222 = vmatprep.subr.bf16.mxu0 %v245_v16  ;;  %v254_v34 = vpack.c.bf16 %v212_v32, %v211_v31  ;;  %v198_v36 = vld [vmem:[%s4364_s4 + $0xe8] sm:$0xff]  ;;  %v229_v37 = vld [vmem:[%s4364_s4 + $0x1e0] sm:$0xff]  ;;  %v199_v46 = vld [vmem:[%s4364_s4 + $0xf0] sm:$0xff]  ;;  %v90_v5 = vsub.s32 4, %v2939_v6  ;;  %v410_v14 = vsub.s32 3, %v2939_v6  ;;  %v418_v15 = vsub.s32 7, %v2939_v6 }
  0x17   :  { %2244 = vmatprep.subr.bf16.mxu1 %v261_v17  ;;  %v247_v38 = vpack.c.bf16 %v198_v36, %v197_v35  ;;  %v230_v39 = vld [vmem:[%s4364_s4 + $0x1e8] sm:$0xff]  ;;  %v181_v40 = vld [vmem:[%s4364_s4 + $0x60] sm:$0xff]  ;;  %v200_v48 = vld [vmem:[%s4364_s4 + $0xf8] sm:$0xff]  ;;  %4382 = vst [vmem:[#allocation5_spill] sm:$0xff] %v3160_v2  ;;  %v3198_v31 = vsub.s32 1, %v2939_v6  ;;  %vm801_vm1 = vcmask 25600  }
  0x18   :  { %v182_v41 = vld [vmem:[%s4364_s4 + $0x68] sm:$0xff]  ;;  %v263_v42 = vpack.c.bf16 %v230_v39, %v229_v37  ;;  %v213_v44 = vld [vmem:[%s4364_s4 + $0x160] sm:$0xff]  ;;  %v231_v49 = vld [vmem:[%s4364_s4 + $0x1f0] sm:$0xff]  ;;  %v248_v51 = vpack.c.bf16 %v200_v48, %v199_v46  ;;  %vm1729_vm2 = vcmask 24576   ;;  %vm2095_vm3 = vcmask 31744   ;;  %s2874_s15 = smov [#allocation2]  }
  0x19   :  { %2223 = vmatpush3.bf16.msra.mxu0 %v237_v25  ;;  %v239_v43 = vpack.c.bf16 %v182_v41, %v181_v40  ;;  %v214_v45 = vld [vmem:[%s4364_s4 + $0x168] sm:$0xff]  ;;  %v232_v50 = vld [vmem:[%s4364_s4 + $0x1f8] sm:$0xff]  ;;  %v183_v53 = vld [vmem:[%s4364_s4 + $0x70] sm:$0xff]  ;;  %vm2109_vm4 = vcmask 64512   ;;  %vm2111_vm5 = vcmask 97280   ;;  %vm2113_vm6 = vcmask 130048  }
  0x1a   :  { %2245 = vmatpush3.bf16.msra.mxu1 %v253_v26  ;;  %2224 = vmatprep.subr.bf16.mxu0 %v246_v28  ;;  %v255_v47 = vpack.c.bf16 %v214_v45, %v213_v44  ;;  %v264_v52 = vpack.c.bf16 %v232_v50, %v231_v49  ;;  %v184_v54 = vld [vmem:[%s4364_s4 + $0x78] sm:$0xff]  ;;  %v215_v55 = vld [vmem:[%s4364_s4 + $0x170] sm:$0xff]  ;;  %v2154_v59 = vld [vmem:[%s4364_s4 + $0x280] sm:$0xff]  ;;  %vm2115_vm7 = vcmask 162816   ;;  %vm2117_vm8 = vcmask 171008  }
  0x1b   :  { %2246 = vmatprep.subr.bf16.mxu1 %v262_v29  ;;  %v240_v56 = vpack.c.bf16 %v184_v54, %v183_v53  ;;  %v216_v57 = vld [vmem:[%s4364_s4 + $0x178] sm:$0xff]  ;;  %v2155_v60 = vld [vmem:[%s4364_s4 + $0x288] sm:$0xff]  ;;  %v2186_v61 = vld [vmem:[%s4364_s4 + $0x380] sm:$0xff] }
  0x1c   :  { %v256_v58 = vpack.c.bf16 %v216_v57, %v215_v55  ;;  %v565_v62 = vpack.c.bf16 %v2155_v60, %v2154_v59  ;;  %v2187_v63 = vld [vmem:[%s4364_s4 + $0x388] sm:$0xff]  ;;  %v3156_v1 = vld [vmem:[%s4365_s5] ss:$0 sm:$0xff]  ;;  %v2156_v49 = vld [vmem:[%s4364_s4 + $0x290] sm:$0xff]  ;;  %s2126_s5 = sshll.u32 %s2874_s15, 4  ;;  %s2127_s5 = int_to_ptr.vmem [resolvable:$true] %s2126_s5 }
  0x1d   :  { %2225 = vmatpush3.bf16.msra.mxu0 %v238_v33  ;;  %v581_v0 = vpack.c.bf16 %v2187_v63, %v2186_v61  ;;  %589 = vrot.lane.b32.xlu1 %v3156_v1, %s2869_s12  ;;  %v3168_v7 = vld [vmem:[%s4362_s2] sm:$0xff]  ;;  %v2139_v46 = vld [vmem:[%s4364_s4 + $0x208] sm:$0xff]  ;;  %v2157_v50 = vld [vmem:[%s4364_s4 + $0x298] sm:$0xff]  ;;  %s2872_s12 = smov 8   ;;  %s2844_s2 = scalar_lea.vmem %s2127_s5, 32 }
  0x1e   :  { %2247 = vmatpush3.bf16.msra.mxu1 %v254_v34  ;;  %2226 = vmatprep.subr.bf16.mxu0 %v247_v38  ;;  %v3173_v8 = vld [vmem:[%s4363_s3] sm:$0xff]  ;;  %v87_v9 = vrot.slane %v3168_v7, %v86_v3  ;;  %v95_v10 = vrot.slane %v3168_v7, %v94_v4  ;;  %v83_v11 = vrot.slane %v3168_v7, %v3160_v2  ;;  %v2171_v48 = vld [vmem:[%s4364_s4 + $0x308] sm:$0xff]  ;;  %v2189_v59 = vld [vmem:[%s4364_s4 + $0x398] sm:$0xff]  ;;  %p2845_p0 = scmp.ne.s32.totalorder %s2127_s5, %s2844_s2  ;;  %p2849_p1 = scmp.lt.s32.totalorder %s2127_s5, %s2127_s5 }
  0x1f   :  { %2248 = vmatprep.subr.bf16.mxu1 %v263_v42  ;;  %v91_v12 = vrot.slane %v3168_v7, %v90_v5  ;;  %v128_v13 = vrot.slane %v3173_v8, %v86_v3  ;;  %v136_v16 = vrot.slane %v3173_v8, %v94_v4  ;;  %v124_v17 = vrot.slane %v3173_v8, %v3160_v2  ;;  %v2138_v38 = vld [vmem:[%s4364_s4 + $0x200] sm:$0xff]  ;;  %p2850_p2 = scmp.lt.s32.totalorder %s2844_s2, %s2844_s2 }
  0x20   :  { %v132_v18 = vrot.slane %v3173_v8, %v90_v5  ;;  %v107_v19 = vrot.slane %v87_v9, %v3160_v2  ;;  %v115_v20 = vrot.slane %v95_v10, %v3160_v2  ;;  %v103_v21 = vrot.slane %v83_v11, %v3160_v2  ;;  %v2140_v9 = vld [vmem:[%s4364_s4 + $0x210] sm:$0xff]  ;;  %v2141_v10 = vld [vmem:[%s4364_s4 + $0x218] sm:$0xff] }
  0x21   :  { %2227 = vmatpush3.bf16.msra.mxu0 %v239_v43  ;;  %v111_v22 = vrot.slane %v91_v12, %v3160_v2  ;;  %v148_v24 = vrot.slane %v128_v13, %v3160_v2  ;;  %v411_v25 = vrot.slane %v3168_v7, %v410_v14  ;;  %v419_v26 = vrot.slane %v3168_v7, %v418_v15  ;;  %v2172_v11 = vld [vmem:[%s4364_s4 + $0x310] sm:$0xff]  ;;  %p2851_p3 = por %p2850_p2, %p2849_p1 }
  0x22   :  { %2249 = vmatpush3.bf16.msra.mxu1 %v255_v47  ;;  %2228 = vmatprep.subr.bf16.mxu0 %v248_v51  ;;  %v156_v28 = vrot.slane %v136_v16, %v3160_v2  ;;  %v144_v29 = vrot.slane %v124_v17, %v3160_v2  ;;  %v152_v30 = vrot.slane %v132_v18, %v3160_v2  ;;  %v2170_v47 = vld [vmem:[%s4364_s4 + $0x300] sm:$0xff]  ;;  %v2159_v16 = vld [vmem:[%s4364_s4 + $0x2a8] sm:$0xff] }
  0x23   :  { %2250 = vmatprep.subr.bf16.mxu1 %v264_v52  ;;  %v451_v32 = vrot.slane %v3173_v8, %v410_v14  ;;  %v459_v33 = vrot.slane %v3173_v8, %v418_v15  ;;  %v431_v40 = vrot.slane %v411_v25, %v3198_v31  ;;  %v439_v41 = vrot.slane %v419_v26, %v3198_v31  ;;  %v2173_v14 = vld [vmem:[%s4364_s4 + $0x318] sm:$0xff]  ;;  %v2158_v15 = vld [vmem:[%s4364_s4 + $0x2a0] sm:$0xff]  ;;  %p2852_p4 = pnand %p2851_p3, %p2845_p0 }
  0x24   :  { %v557_v60 = vpack.c.bf16 %v2139_v46, %v2138_v38  ;;  %v573_v61 = vpack.c.bf16 %v2171_v48, %v2170_v47  ;;  %v566_v12 = vpack.c.bf16 %v2157_v50, %v2156_v49  ;;  %v567_v25 = vpack.c.bf16 %v2159_v16, %v2158_v15  ;;  %v2142_v26 = vld [vmem:[%s4364_s4 + $0x220] sm:$0xff]  ;;  %v2163_v47 = vld [vmem:[%s4364_s4 + $0x2c8] sm:$0xff]  ;;  %v2181_v15 = vld [vmem:[%s4364_s4 + $0x358] sm:$0xff] }
  0x25   :  { %2229 = vmatpush3.bf16.msra.mxu0 %v240_v56  ;;  %v471_v52 = vrot.slane %v451_v32, %v3198_v31  ;;  %v479_v53 = vrot.slane %v459_v33, %v3198_v31  ;;  %v2160_v32 = vld [vmem:[%s4364_s4 + $0x2b0] sm:$0xff]  ;;  %v414_v38 = vsub.s32 5, %v2939_v6  ;;  %v2162_v46 = vld [vmem:[%s4364_s4 + $0x2c0] sm:$0xff]  ;;  %v2195_v49 = vld [vmem:[%s4364_s4 + $0x3c8] sm:$0xff]  ;;  %v407_v50 = vrot.slane %v3168_v7, %v3198_v31 }
  0x26   :  { %2251 = vmatpush3.bf16.msra.mxu1 %v256_v58  ;;  %2258 = vmatprep.subr.bf16.mxu0 %v565_v62  ;;  %v2188_v58 = vld [vmem:[%s4364_s4 + $0x390] sm:$0xff]  ;;  %v2194_v48 = vld [vmem:[%s4364_s4 + $0x3c0] sm:$0xff] }
  0x27   :  { %2280 = vmatprep.subr.bf16.mxu1 %v581_v0  ;;  %v582_v13 = vpack.c.bf16 %v2189_v59, %v2188_v58  ;;  %v2176_v6 = vld [vmem:[%s4364_s4 + $0x330] sm:$0xff]  ;;  %v585_v58 = vpack.c.bf16 %v2195_v49, %v2194_v48  ;;  %v2179_v59 = vld [vmem:[%s4364_s4 + $0x348] sm:$0xff]  ;;  %v2166_v16 = vld [vmem:[%s4364_s4 + $0x2e0] sm:$0xff] }
  0x9d   :  { %v77_v23 = vpop.xlane.xlu0 %76 }
  0x9e   :  { %v78_v27 = vmul.f32 0.00390625, %v77_v23  ;;  %v558_v23 = vpack.c.bf16 %v2141_v10, %v2140_v9 }
  0xa0   :  { %v117_v34 = vmul.f32 %v107_v19, %v78_v27  ;;  %v119_v35 = vmul.f32 %v115_v20, %v78_v27  ;;  %v116_v36 = vmul.f32 %v103_v21, %v78_v27  ;;  %v118_v37 = vmul.f32 %v111_v22, %v78_v27  ;;  %v2190_v19 = vld [vmem:[%s4364_s4 + $0x3a0] sm:$0xff]  ;;  %v2191_v20 = vld [vmem:[%s4364_s4 + $0x3a8] sm:$0xff] }
  0xa1   :  { %v402_v39 = vpop.xlane.xlu0 %401  ;;  %v2143_v27 = vld [vmem:[%s4364_s4 + $0x228] sm:$0xff] }
  0xa2   :  { %v158_v42 = vadd.f32 %v148_v24, %v117_v34  ;;  %v160_v43 = vadd.f32 %v156_v28, %v119_v35  ;;  %v157_v44 = vadd.f32 %v144_v29, %v116_v36  ;;  %v159_v45 = vadd.f32 %v152_v30, %v118_v37  ;;  %v2174_v29 = vld [vmem:[%s4364_s4 + $0x320] sm:$0xff]  ;;  %v2175_v30 = vld [vmem:[%s4364_s4 + $0x328] sm:$0xff]  ;;  %v2161_v35 = vld [vmem:[%s4364_s4 + $0x2b8] sm:$0xff] }
  0xa3   :  { %v3222_v51 = vmul.f32 0.00390625, %v402_v39  ;;  %v574_v24 = vpack.c.bf16 %v2173_v14, %v2172_v11  ;;  %v583_v28 = vpack.c.bf16 %v2191_v20, %v2190_v19  ;;  %v2192_v36 = vld [vmem:[%s4364_s4 + $0x3b0] sm:$0xff]  ;;  %v2193_v37 = vld [vmem:[%s4364_s4 + $0x3b8] sm:$0xff]  ;;  %v559_v39 = vpack.c.bf16 %v2143_v27, %v2142_v26  ;;  %v2199_v19 = vld [vmem:[%s4364_s4 + $0x3e8] sm:$0xff] }
  0xa4   :  { %v162_v54 = vmax.f32 %v158_v42, 0.0  ;;  %v164_v55 = vmax.f32 %v160_v43, 0.0  ;;  %v161_v56 = vmax.f32 %v157_v44, 0.0  ;;  %v163_v57 = vmax.f32 %v159_v45, 0.0  ;;  %v2145_v42 = vld [vmem:[%s4364_s4 + $0x238] sm:$0xff]  ;;  %v2148_v11 = vld [vmem:[%s4364_s4 + $0x250] sm:$0xff] }
  0xa5   :  { %v441_v62 = vmul.f32 %v431_v40, %v3222_v51  ;;  %v443_v63 = vmul.f32 %v439_v41, %v3222_v51  ;;  %v575_v40 = vpack.c.bf16 %v2175_v30, %v2174_v29  ;;  %v2144_v41 = vld [vmem:[%s4364_s4 + $0x230] sm:$0xff]  ;;  %v568_v43 = vpack.c.bf16 %v2161_v35, %v2160_v32  ;;  %v2177_v45 = vld [vmem:[%s4364_s4 + $0x338] sm:$0xff]  ;;  %v2150_v26 = vld [vmem:[%s4364_s4 + $0x260] sm:$0xff] }
  0xa6   :  { %v166_v0 = vpack.c.bf16 %v162_v54, %v162_v54  ;;  %v168_v3 = vpack.c.bf16 %v164_v55, %v164_v55  ;;  %v165_v4 = vpack.c.bf16 %v161_v56, %v161_v56  ;;  %v167_v5 = vpack.c.bf16 %v163_v57, %v163_v57  ;;  %v2146_v55 = vld [vmem:[%s4364_s4 + $0x240] sm:$0xff]  ;;  %v2147_v56 = vld [vmem:[%s4364_s4 + $0x248] sm:$0xff]  ;;  %v2168_v30 = vld [vmem:[%s4364_s4 + $0x2f0] sm:$0xff] }
  0xa7   :  { %v481_v17 = vadd.f32 %v471_v52, %v441_v62  ;;  %v483_v18 = vadd.f32 %v479_v53, %v443_v63  ;;  %v584_v44 = vpack.c.bf16 %v2193_v37, %v2192_v36  ;;  %v415_v52 = vrot.slane %v3168_v7, %v414_v38  ;;  %v2178_v7 = vld [vmem:[%s4364_s4 + $0x340] sm:$0xff]  ;;  %v2196_v62 = vld [vmem:[%s4364_s4 + $0x3d0] sm:$0xff]  ;;  %v2197_v63 = vld [vmem:[%s4364_s4 + $0x3d8] sm:$0xff] }
  0xa8   :  { %303 = vmatprep.mubr.bf16.mxu0 %v166_v0  ;;  %343 = vmatprep.mubr.bf16.mxu1 %v168_v3  ;;  %v560_v53 = vpack.c.bf16 %v2145_v42, %v2144_v41  ;;  %v576_v54 = vpack.c.bf16 %v2177_v45, %v2176_v6  ;;  %v569_v57 = vpack.c.bf16 %v2163_v47, %v2162_v46  ;;  %v2151_v27 = vld [vmem:[%s4364_s4 + $0x268] sm:$0xff]  ;;  %v2169_v32 = vld [vmem:[%s4364_s4 + $0x2f8] sm:$0xff]  ;;  %v3406_v6 = vld.sshfl [vmem:[%s4361_s1] sm:$0x33 pattern:$0x76325410] }
  0xa9   :  { %304 = vmatmul.mubr.bf16.vlgmr.msra.gmra.mrb[0].mxu0 %v165_v4  ;;  %344 = vmatmul.mubr.bf16.vlgmr.msra.gmra.mrb[0].mxu1 %v167_v5  ;;  %v485_v21 = vmax.f32 %v481_v17, 0.0  ;;  %v487_v22 = vmax.f32 %v483_v18, 0.0  ;;  %v427_v0 = vrot.slane %v407_v50, %v3198_v31  ;;  %v435_v3 = vrot.slane %v415_v52, %v3198_v31  ;;  %v2167_v17 = vld [vmem:[%s4364_s4 + $0x2e8] sm:$0xff]  ;;  %v2198_v18 = vld [vmem:[%s4364_s4 + $0x3e0] sm:$0xff] }
  0xaa   :  { %2259 = vmatpush3.bf16.msra.mxu0 %v557_v60  ;;  %2281 = vmatpush3.bf16.msra.mxu1 %v573_v61  ;;  %v2164_v60 = vld [vmem:[%s4364_s4 + $0x2d0] sm:$0xff]  ;;  %v2165_v61 = vld [vmem:[%s4364_s4 + $0x2d8] sm:$0xff]  ;;  %v447_v4 = vrot.slane %v3173_v8, %v3198_v31  ;;  %v455_v5 = vrot.slane %v3173_v8, %v414_v38  ;;  %v561_v9 = vpack.c.bf16 %v2147_v56, %v2146_v55  ;;  %v2183_v29 = vld [vmem:[%s4364_s4 + $0x368] sm:$0xff] }
  0xab   :  { %2260 = vmatprep.subr.bf16.mxu0 %v566_v12  ;;  %2282 = vmatprep.subr.bf16.mxu1 %v582_v13  ;;  %v489_v33 = vpack.c.bf16 %v485_v21, %v485_v21  ;;  %v491_v34 = vpack.c.bf16 %v487_v22, %v487_v22  ;;  %v577_v10 = vpack.c.bf16 %v2179_v59, %v2178_v7  ;;  %v2149_v12 = vld [vmem:[%s4364_s4 + $0x258] sm:$0xff]  ;;  %v2180_v8 = vld [vmem:[%s4364_s4 + $0x350] sm:$0xff]  ;;  %v712_v45 = vld [vmem:[%s4366_s6 + $0x80] sm:$0xff] }
  0xac   :  { %v570_v13 = vpack.c.bf16 %v2165_v61, %v2164_v60  ;;  %v586_v14 = vpack.c.bf16 %v2197_v63, %v2196_v62  ;;  %v440_v20 = vmul.f32 %v427_v0, %v3222_v51  ;;  %v442_v21 = vmul.f32 %v435_v3, %v3222_v51  ;;  %v713_v46 = vld [vmem:[%s4366_s6 + $0x88] sm:$0xff]  ;;  %v714_v56 = vld [vmem:[%s4366_s6 + $0x90] sm:$0xff]  ;;  %v699_v63 = vld [vmem:[%s4366_s6 + $0x18] sm:$0xff] }
  0xad   :  { %624 = vmatprep.mubr.bf16.mxu0 %v489_v33  ;;  %664 = vmatprep.mubr.bf16.mxu1 %v491_v34  ;;  %v467_v22 = vrot.slane %v447_v4, %v3198_v31  ;;  %v587_v51 = vpack.c.bf16 %v2199_v19, %v2198_v18  ;;  %v2200_v33 = vld [vmem:[%s4364_s4 + $0x3f0] sm:$0xff]  ;;  %v2201_v34 = vld [vmem:[%s4364_s4 + $0x3f8] sm:$0xff]  ;;  %v563_v37 = vpack.c.bf16 %v2151_v27, %v2150_v26  ;;  %v697_v55 = vld [vmem:[%s4366_s6 + $0x8] sm:$0xff] }
  0xae   :  { %2261 = vmatpush3.bf16.msra.mxu0 %v558_v23  ;;  %2283 = vmatpush3.bf16.msra.mxu1 %v574_v24  ;;  %v475_v23 = vrot.slane %v455_v5, %v3198_v31  ;;  %v562_v24 = vpack.c.bf16 %v2149_v12, %v2148_v11  ;;  %v2182_v31 = vld [vmem:[%s4364_s4 + $0x360] sm:$0xff]  ;;  %v572_v41 = vpack.c.bf16 %v2169_v32, %v2168_v30  ;;  %v698_v62 = vld [vmem:[%s4366_s6 + $0x10] sm:$0xff]  ;;  %v717_v3 = vld [vmem:[%s4366_s6 + $0xa8] sm:$0xff] }
  0xaf   :  { %2262 = vmatprep.subr.bf16.mxu0 %v567_v25  ;;  %2284 = vmatprep.subr.bf16.mxu1 %v583_v28  ;;  %v578_v25 = vpack.c.bf16 %v2181_v15, %v2180_v8  ;;  %v571_v28 = vpack.c.bf16 %v2167_v17, %v2166_v16  ;;  %v480_v35 = vadd.f32 %v467_v22, %v440_v20  ;;  %v716_v0 = vld [vmem:[%s4366_s6 + $0xa0] sm:$0xff]  ;;  %v718_v11 = vld [vmem:[%s4366_s6 + $0xb0] sm:$0xff]  ;;  %v719_v12 = vld [vmem:[%s4366_s6 + $0xb8] sm:$0xff] }
  0xb0   :  { %v482_v36 = vadd.f32 %v475_v23, %v442_v21  ;;  %v579_v38 = vpack.c.bf16 %v2183_v29, %v2182_v31  ;;  %v588_v42 = vpack.c.bf16 %v2201_v34, %v2200_v33  ;;  %v691_v52 = vcombine.high %v3406_v6, %v3406_v6  ;;  %v702_v8 = vld [vmem:[%s4366_s6 + $0x30] sm:$0xff]  ;;  %v703_v15 = vld [vmem:[%s4366_s6 + $0x38] sm:$0xff]  ;;  %v720_v16 = vld [vmem:[%s4366_s6 + $0xc0] sm:$0xff] }
  0xb1   :  { %v484_v47 = vmax.f32 %v480_v35, 0.0  ;;  %v729_v4 = vpack.c.bf16 %v699_v63, %v698_v62  ;;  %v738_v5 = vpack.c.bf16 %v717_v3, %v716_v0  ;;  %v721_v17 = vld [vmem:[%s4366_s6 + $0xc8] sm:$0xff]  ;;  %v731_v18 = vpack.c.bf16 %v703_v15, %v702_v8  ;;  %v704_v20 = vld [vmem:[%s4366_s6 + $0x40] sm:$0xff]  ;;  %v722_v22 = vld [vmem:[%s4366_s6 + $0xd0] sm:$0xff] }
  0xb2   :  { %2263 = vmatpush3.bf16.msra.mxu0 %v559_v39  ;;  %2285 = vmatpush3.bf16.msra.mxu1 %v575_v40  ;;  %v2152_v39 = vld [vmem:[%s4364_s4 + $0x270] sm:$0xff]  ;;  %v2153_v40 = vld [vmem:[%s4364_s4 + $0x278] sm:$0xff]  ;;  %v486_v48 = vmax.f32 %v482_v36, 0.0  ;;  %v695_v60 = vpack.c.bf16 %v691_v52, %v691_v52  ;;  %v740_v19 = vpack.c.bf16 %v721_v17, %v720_v16  ;;  %v705_v21 = vld [vmem:[%s4366_s6 + $0x48] sm:$0xff] }
  0xb3   :  { %2264 = vmatprep.subr.bf16.mxu0 %v568_v43  ;;  %2286 = vmatprep.subr.bf16.mxu1 %v584_v44  ;;  %v2184_v43 = vld [vmem:[%s4364_s4 + $0x370] sm:$0xff]  ;;  %v2185_v44 = vld [vmem:[%s4364_s4 + $0x378] sm:$0xff]  ;;  %v564_v49 = vpack.c.bf16 %v2153_v40, %v2152_v39  ;;  %v708_v30 = vld [vmem:[%s4366_s6 + $0x60] sm:$0xff]  ;;  %v694_v40 = vpack.c.bf16 %v3406_v6, %v3406_v6 }
  0xb4   :  { %v580_v50 = vpack.c.bf16 %v2185_v44, %v2184_v43  ;;  %v490_v7 = vpack.c.bf16 %v486_v48, %v486_v48  ;;  %v723_v23 = vld [vmem:[%s4366_s6 + $0xd8] sm:$0xff]  ;;  %v706_v26 = vld [vmem:[%s4366_s6 + $0x50] sm:$0xff]  ;;  %v709_v32 = vld [vmem:[%s4366_s6 + $0x68] sm:$0xff] }
  0xb5   :  { %v707_v27 = vld [vmem:[%s4366_s6 + $0x58] sm:$0xff]  ;;  %v726_v33 = vld [vmem:[%s4366_s6 + $0xf0] sm:$0xff]  ;;  %v734_v35 = vpack.c.bf16 %v709_v32, %v708_v30  ;;  %v38_v32 = vld [vmem:[%s4369_s9] sm:$0x3] }
  0xb6   :  { %2265 = vmatpush3.bf16.msra.mxu0 %v560_v53  ;;  %2287 = vmatpush3.bf16.msra.mxu1 %v576_v54  ;;  %v736_v53 = vpack.c.bf16 %v713_v46, %v712_v45  ;;  %v696_v54 = vld [vmem:[%s4366_s6] sm:$0xff]  ;;  %v733_v31 = vpack.c.bf16 %v707_v27, %v706_v26  ;;  %v727_v34 = vld [vmem:[%s4366_s6 + $0xf8] sm:$0xff] }
  0xb7   :  { %2266 = vmatprep.subr.bf16.mxu0 %v569_v57  ;;  %2288 = vmatprep.subr.bf16.mxu1 %v585_v58  ;;  %v715_v57 = vld [vmem:[%s4366_s6 + $0x98] sm:$0xff]  ;;  %v488_v58 = vpack.c.bf16 %v484_v47, %v484_v47  ;;  %v728_v59 = vpack.c.bf16 %v697_v55, %v696_v54  ;;  %v743_v36 = vpack.c.bf16 %v727_v34, %v726_v33 }
  0xb8   :  { %v737_v61 = vpack.c.bf16 %v715_v57, %v714_v56 }
  0xba   :  { %2267 = vmatpush3.bf16.msra.mxu0 %v561_v9  ;;  %2289 = vmatpush3.bf16.msra.mxu1 %v577_v10  ;;  %v700_v9 = vld [vmem:[%s4366_s6 + $0x20] sm:$0xff]  ;;  %v701_v10 = vld [vmem:[%s4366_s6 + $0x28] sm:$0xff] }
  0xbb   :  { %2268 = vmatprep.subr.bf16.mxu0 %v570_v13  ;;  %2290 = vmatprep.subr.bf16.mxu1 %v586_v14  ;;  %v730_v13 = vpack.c.bf16 %v701_v10, %v700_v9  ;;  %v739_v14 = vpack.c.bf16 %v719_v12, %v718_v11 }
  0xbe   :  { %2269 = vmatpush3.bf16.msra.mxu0 %v562_v24  ;;  %2291 = vmatpush3.bf16.msra.mxu1 %v578_v25  ;;  %v732_v24 = vpack.c.bf16 %v705_v21, %v704_v20  ;;  %v741_v25 = vpack.c.bf16 %v723_v23, %v722_v22  ;;  %v2203_v22 = vld [vmem:[%s4367_s7] ss:$0 sm:$0xff] }
  0xbf   :  { %2270 = vmatprep.subr.bf16.mxu0 %v571_v28  ;;  %2292 = vmatprep.subr.bf16.mxu1 %v587_v51  ;;  %v724_v28 = vld [vmem:[%s4366_s6 + $0xe0] sm:$0xff]  ;;  %v725_v51 = vld [vmem:[%s4366_s6 + $0xe8] sm:$0xff] }
  0xc0   :  { %v742_v29 = vpack.c.bf16 %v725_v51, %v724_v28 }
  0xc2   :  { %2271 = vmatpush3.bf16.msra.mxu0 %v563_v37  ;;  %2293 = vmatpush3.bf16.msra.mxu1 %v579_v38  ;;  %v710_v37 = vld [vmem:[%s4366_s6 + $0x70] sm:$0xff]  ;;  %v711_v38 = vld [vmem:[%s4366_s6 + $0x78] sm:$0xff] }
  0xc3   :  { %2272 = vmatprep.subr.bf16.mxu0 %v572_v41  ;;  %2294 = vmatprep.subr.bf16.mxu1 %v588_v42  ;;  %v735_v39 = vpack.c.bf16 %v711_v38, %v710_v37 }
  0xc6   :  { %2273 = vmatpush3.bf16.msra.mxu0 %v564_v49  ;;  %2295 = vmatpush3.bf16.msra.mxu1 %v580_v50 }
  0xc7   :  { %2302 = vmatprep.subr.bf16.mxu0 %v736_v53 }
  0xc9   :  { %625 = vmatmul.mubr.bf16.vlgmr.msra.gmra.mrb[4].mxu0 %v488_v58  ;;  %665 = vmatmul.mubr.bf16.vlgmr.msra.gmra.mrb[4].mxu1 %v490_v7  ;;  %v590_v58 = vpop.permute.xlu1 %589 }
  0xca   :  { %2303 = vmatpush3.bf16.msra.mxu0 %v728_v59  ;;  %783 = vmatprep.mubr.bf16.mxu0 %v695_v60 }
  0xcb   :  { %2304 = vmatprep.subr.bf16.mxu0 %v737_v61 }
  0xce   :  { %2305 = vmatpush3.bf16.msra.mxu0 %v729_v4 }
  0xcf   :  { %2306 = vmatprep.subr.bf16.mxu0 %v738_v5 }
  0xd2   :  { %2307 = vmatpush3.bf16.msra.mxu0 %v730_v13 }
  0xd3   :  { %2308 = vmatprep.subr.bf16.mxu0 %v739_v14 }
  0xd6   :  { %2309 = vmatpush3.bf16.msra.mxu0 %v731_v18 }
  0xd7   :  { %2310 = vmatprep.subr.bf16.mxu0 %v740_v19 }
  0xda   :  { %2311 = vmatpush3.bf16.msra.mxu0 %v732_v24 }
  0xdb   :  { %2312 = vmatprep.subr.bf16.mxu0 %v741_v25 }
  0xde   :  { %2313 = vmatpush3.bf16.msra.mxu0 %v733_v31 }
  0xdf   :  { %2314 = vmatprep.subr.bf16.mxu0 %v742_v29 }
  0xe2   :  { %2315 = vmatpush3.bf16.msra.mxu0 %v734_v35 }
  0xe3   :  { %2316 = vmatprep.subr.bf16.mxu0 %v743_v36  ;;  %v3528_v36 = vsub.f32 1.0, %v38_v32 }
  0xe6   :  { %2317 = vmatpush3.bf16.msra.mxu0 %v735_v39 }
  0xe9   :  { %784 = vmatmul.mubr.bf16.vlgmr.msra.gmra.mrb[8].mxu0 %v694_v40 }
 0x17c   :  { %v2230_v41 = vpop.f32.mrb[0].mxu0  ;;  %v2252_v42 = vpop.f32.mrb[0].mxu1 }
 0x17d   :  { %v2231_v43 = vpop.f32.mrb[1].mxu0  ;;  %v2253_v44 = vpop.f32.mrb[1].mxu1 }
 0x17e   :  { %v2232_v45 = vadd.f32 %v2231_v43, %v2230_v41  ;;  %v2254_v46 = vadd.f32 %v2253_v44, %v2252_v42  ;;  %v2233_v47 = vpop.f32.mrb[2].mxu0  ;;  %v2255_v48 = vpop.f32.mrb[2].mxu1 }
 0x17f   :  { %v2234_v49 = vpop.f32.mrb[3].mxu0  ;;  %v2256_v50 = vpop.f32.mrb[3].mxu1 }
 0x180   :  { %v306_v52 = vadd.f32 %v2232_v45, %v3156_v1  ;;  %v3512_v1 = vld [vmem:[%s4368_s8] ss:$0 sm:$0xff] }
 0x181   :  { %v3533_v38 = vmul.f32 %v3512_v1, %v38_v32 }
 0x182   :  { %v346_v53 = vadd.f32 %v2254_v46, %v306_v52 }
 0x184   :  { %v352_v54 = vand.u32 2147483647, %v346_v53  ;;  %v351_v11 = vmax.f32 %v346_v53, 0.0 }
 0x186   :  { %v353_v55 = vsub.f32 0.0, %v352_v54 }
 0x188   :  { %v354_v56 = vmul.f32 1.442695, %v353_v55 }
 0x18a   :  { %2331 = vpow2.f32 %v354_v56 }
 0x194   :  { %v2332_v6 = vpop.eup %2331 }
 0x195   :  { %v356_v57 = vadd.f32 1.0, %v2332_v6 }
 0x197   :  { %2333 = vlog2.f32 %v356_v57 }
 0x19c   :  { %v2274_v7 = vpop.f32.mrb[4].mxu0  ;;  %v2296_v59 = vpop.f32.mrb[4].mxu1 }
 0x19d   :  { %v2275_v60 = vpop.f32.mrb[5].mxu0  ;;  %v2297_v61 = vpop.f32.mrb[5].mxu1 }
 0x19e   :  { %v2276_v62 = vadd.f32 %v2275_v60, %v2274_v7  ;;  %v2298_v63 = vadd.f32 %v2297_v61, %v2296_v59  ;;  %v2277_v0 = vpop.f32.mrb[6].mxu0  ;;  %v2299_v3 = vpop.f32.mrb[6].mxu1 }
 0x19f   :  { %v2278_v4 = vpop.f32.mrb[7].mxu0  ;;  %v2300_v5 = vpop.f32.mrb[7].mxu1 }
 0x1a0   :  { %v627_v9 = vadd.f32 %v2276_v62, %v590_v58 }
 0x1a1   :  { %v2334_v10 = vpop.eup %2333 }
 0x1a2   :  { %v358_v12 = vmul.f32 0.6931472, %v2334_v10  ;;  %v667_v13 = vadd.f32 %v2298_v63, %v627_v9 }
 0x1a4   :  { %v359_v14 = vadd.f32 %v358_v12, %v351_v11  ;;  %v673_v8 = vand.u32 2147483647, %v667_v13  ;;  %v672_v31 = vmax.f32 %v667_v13, 0.0 }
 0x1a6   :  { %v3515_v15 = vadd.f32 %v3512_v1, %v359_v14  ;;  %v674_v16 = vsub.f32 0.0, %v673_v8 }
 0x1a8   :  { %4383 = vst [vmem:[#allocation6_spill] sm:$0xff] %v3515_v15  ;;  %v675_v17 = vmul.f32 1.442695, %v674_v16  ;;  %v802_v18 = vsel %vm801_vm1, %v3515_v15, 0.0 }
 0x1a9   :  { %803 = vadd.xlane.f32.xlu1 %v802_v18 }
 0x1aa   :  { %2335 = vpow2.f32 %v675_v17 }
 0x1b4   :  { %v2336_v19 = vpop.eup %2335 }
 0x1b5   :  { %v677_v20 = vadd.f32 1.0, %v2336_v19 }
 0x1b7   :  { %2337 = vlog2.f32 %v677_v20 }
 0x1bc   :  { %v2318_v21 = vpop.f32.mrb[8].mxu0 }
 0x1bd   :  { %v2319_v23 = vpop.f32.mrb[9].mxu0 }
 0x1be   :  { %v2320_v24 = vadd.f32 %v2319_v23, %v2318_v21  ;;  %v2321_v25 = vpop.f32.mrb[10].mxu0 }
 0x1bf   :  { %v2322_v26 = vpop.f32.mrb[11].mxu0 }
 0x1c0   :  { %v786_v27 = vadd.f32 %v2320_v24, %v2203_v22 }
 0x1c1   :  { %v2338_v28 = vpop.eup %2337 }
 0x1c2   :  { %v792_v51 = vand.u32 2147483647, %v786_v27  ;;  %v679_v29 = vmul.f32 0.6931472, %v2338_v28  ;;  %v791_v52 = vmax.f32 %v786_v27, 0.0 }
 0x1c4   :  { %v793_v30 = vsub.f32 0.0, %v792_v51  ;;  %v680_v33 = vadd.f32 %v679_v29, %v672_v31 }
 0x1c6   :  { %v794_v34 = vmul.f32 1.442695, %v793_v30  ;;  %v3526_v35 = vadd.f32 %v3512_v1, %v680_v33 }
 0x1c8   :  { %4384 = vst [vmem:[#allocation7_spill] sm:$0xff] %v3526_v35  ;;  %2339 = vpow2.f32 %v794_v34  ;;  %v805_v37 = vsel %vm801_vm1, %v3526_v35, 0.0  ;;  %v1262_v39 = vmul.f32 %v3528_v36, %v3526_v35 }
 0x1c9   :  { %806 = vadd.xlane.f32.xlu0 %v805_v37  ;;  %v1067_v37 = vadd.f32 1.0, %v3515_v15 }
 0x1ca   :  { %v3538_v40 = vadd.f32 %v1262_v39, %v3533_v38 }
 0x1cc   :  { %v3541_v41 = vadd.f32 1.0, %v3538_v40 }
 0x1ce   :  { %v3544_v42 = vadd.f32 1.0, %v3541_v41 }
 0x1d0   :  { %v3547_v43 = vadd.f32 1.0, %v3544_v42 }
 0x1d2   :  { %v2340_v44 = vpop.eup %2339  ;;  %v3550_v46 = vadd.f32 1.0, %v3547_v43 }
 0x1d3   :  { %v796_v45 = vadd.f32 1.0, %v2340_v44 }
 0x1d4   :  { %v3553_v47 = vadd.f32 1.0, %v3550_v46 }
 0x1d5   :  { %2341 = vlog2.f32 %v796_v45 }
 0x1d6   :  { %v3556_v48 = vadd.f32 1.0, %v3553_v47 }
 0x1d8   :  { %v3559_v49 = vadd.f32 1.0, %v3556_v48 }
 0x1da   :  { %v3562_v50 = vadd.f32 1.0, %v3559_v49 }
 0x1dc   :  { %2343 = vrcp.f32 %v3562_v50 }
 0x1dd   :  { %2345 = vlog2.f32 %v3562_v50 }
 0x1de   :  { %2347 = vrcp.f32 %v3541_v41 }
 0x1df   :  { %v2342_v53 = vpop.eup %2341  ;;  %2349 = vrcp.f32 %v3544_v42 }
 0x1e0   :  { %v798_v54 = vmul.f32 0.6931472, %v2342_v53  ;;  %2351 = vrcp.f32 %v3538_v40 }
 0x1e1   :  { %2353 = vrcp.f32 %v3547_v43 }
 0x1e2   :  { %v799_v55 = vadd.f32 %v798_v54, %v791_v52  ;;  %2355 = vrcp.f32 %v3550_v46  ;;  %v1083_v52 = vadd.f32 1.0, %v1067_v37 }
 0x1e3   :  { %2357 = vrcp.f32 %v3553_v47 }
 0x1e4   :  { %v3567_v56 = vadd.f32 %v3512_v1, %v799_v55  ;;  %2359 = vrcp.f32 %v3556_v48 }
 0x1e5   :  { %2361 = vrcp.f32 %v3559_v49 }
 0x1e6   :  { %4385 = vst [vmem:[#allocation8_spill] sm:$0xff] %v3567_v56  ;;  %v1263_v6 = vmul.f32 %v3528_v36, %v3567_v56  ;;  %v3571_v57 = vpop.eup %2343 }
 0x1e7   :  { %v2346_v58 = vpop.eup %2345  ;;  %v1886_v60 = vmul.f32 0.5, %v3571_v57  ;;  %v3584_v62 = vmul.f32 %v3571_v57, %v3571_v57 }
 0x1e8   :  { %v3574_v7 = vadd.f32 %v1263_v6, %v3533_v38  ;;  %v3576_v59 = vmul.f32 0.6931472, %v2346_v58  ;;  %v2348_v9 = vpop.eup %2347 }
 0x1e9   :  { %v1894_v3 = vmul.f32 0.003968254, %v3584_v62  ;;  %v2350_v10 = vpop.eup %2349 }
 0x1ea   :  { %v1275_v61 = vsel %vm801_vm1, %v3574_v7, 0.0  ;;  %v1890_v63 = vsub.f32 %v3576_v59, %v1886_v60  ;;  %v3591_v0 = vadd.f32 1.0, %v3574_v7  ;;  %v2352_v11 = vpop.eup %2351  ;;  %2363 = vrcp.f32 %v3574_v7 }
 0x1eb   :  { %1276 = vadd.xlane.f32.xlu1 %v1275_v61  ;;  %v1898_v5 = vsub.f32 0.008333334, %v1894_v3  ;;  %v1810_v13 = vadd.f32 %v2352_v11, %v2348_v9  ;;  %v2354_v8 = vpop.eup %2353  ;;  %v1099_v61 = vadd.f32 1.0, %v1083_v52 }
 0x1ec   :  { %v3597_v4 = vadd.f32 1.0, %v3591_v0  ;;  %v2356_v17 = vpop.eup %2355  ;;  %2365 = vrcp.f32 %v3591_v0 }
 0x1ed   :  { %v1902_v14 = vmul.f32 %v1898_v5, %v3584_v62  ;;  %v1822_v16 = vadd.f32 %v2350_v10, %v1810_v13  ;;  %v2358_v21 = vpop.eup %2357 }
 0x1ee   :  { %v3602_v12 = vadd.f32 1.0, %v3597_v4  ;;  %v2360_v24 = vpop.eup %2359 }
 0x1ef   :  { %v1906_v18 = vsub.f32 0.083333336, %v1902_v14  ;;  %v1834_v20 = vadd.f32 %v2354_v8, %v1822_v16  ;;  %v2362_v28 = vpop.eup %2361  ;;  %v1115_v14 = vadd.f32 1.0, %v1099_v61 }
 0x1f0   :  { %v3606_v19 = vadd.f32 1.0, %v3602_v12 }
 0x1f1   :  { %v1910_v22 = vmul.f32 %v1906_v18, %v3584_v62  ;;  %v1846_v23 = vadd.f32 %v2356_v17, %v1834_v20 }
 0x1f2   :  { %v3612_v26 = vadd.f32 1.0, %v3606_v19 }
 0x1f3   :  { %v3609_v25 = vsub.f32 %v1890_v63, %v1910_v22  ;;  %v1858_v27 = vadd.f32 %v2358_v21, %v1846_v23 }
 0x1f4   :  { %v3615_v31 = vadd.f32 1.0, %v3612_v26  ;;  %v2364_v34 = vpop.eup %2363 }
 0x1f5   :  { %4386 = vst [vmem:[#allocation9_spill] sm:$0xff] %v3609_v25  ;;  %v1870_v51 = vadd.f32 %v2360_v24, %v1858_v27  ;;  %v1131_v24 = vadd.f32 1.0, %v1115_v14 }
 0x1f6   :  { %v3622_v32 = vadd.f32 1.0, %v3615_v31  ;;  %v2366_v39 = vpop.eup %2365 }
 0x1f7   :  { %v3617_v29 = vadd.f32 %v2362_v28, %v1870_v51  ;;  %v1811_v54 = vadd.f32 %v2366_v39, %v2364_v34  ;;  %v1147_v34 = vadd.f32 1.0, %v1131_v24 }
 0x1f8   :  { %v3625_v33 = vadd.f32 1.0, %v3622_v32 }
 0x1f9   :  { %4387 = vst [vmem:[#allocation10_spill] sm:$0xff] %v3617_v29  ;;  %v1163_v39 = vadd.f32 1.0, %v1147_v34 }
 0x1fa   :  { %2367 = vrcp.f32 %v3625_v33 }
 0x1fb   :  { %2369 = vrcp.f32 %v3597_v4 }
 0x1fc   :  { %2371 = vrcp.f32 %v3602_v12 }
 0x1fd   :  { %2373 = vrcp.f32 %v3606_v19 }
 0x1fe   :  { %2375 = vlog2.f32 %v3625_v33 }
 0x1ff   :  { %2377 = vrcp.f32 %v3612_v26 }
 0x200   :  { %2379 = vrcp.f32 %v3615_v31 }
 0x201   :  { %2381 = vrcp.f32 %v3622_v32 }
 0x204   :  { %v3636_v44 = vpop.eup %2367 }
 0x205   :  { %v2370_v45 = vpop.eup %2369  ;;  %v3642_v53 = vmul.f32 %v3636_v44, %v3636_v44  ;;  %v1887_v17 = vmul.f32 0.5, %v3636_v44 }
 0x206   :  { %v2372_v55 = vpop.eup %2371  ;;  %v1823_v6 = vadd.f32 %v2370_v45, %v1811_v54  ;;  %v1179_v45 = vadd.f32 1.0, %v1163_v39 }
 0x207   :  { %v1895_v58 = vmul.f32 0.003968254, %v3642_v53  ;;  %v2374_v60 = vpop.eup %2373 }
 0x208   :  { %v2376_v63 = vpop.eup %2375  ;;  %v1835_v3 = vadd.f32 %v2372_v55, %v1823_v6  ;;  %2383 = vrcp.f32 %v1179_v45 }
 0x209   :  { %v1899_v5 = vsub.f32 0.008333334, %v1895_v58  ;;  %v2378_v9 = vpop.eup %2377  ;;  %v3646_v8 = vmul.f32 0.6931472, %v2376_v63  ;;  %2385 = vrcp.f32 %v1067_v37 }
 0x20a   :  { %v1847_v10 = vadd.f32 %v2374_v60, %v1835_v3  ;;  %v2380_v13 = vpop.eup %2379 }
 0x20b   :  { %v1903_v11 = vmul.f32 %v1899_v5, %v3642_v53  ;;  %v2382_v20 = vpop.eup %2381  ;;  %v1891_v22 = vsub.f32 %v3646_v8, %v1887_v17 }
 0x20c   :  { %v1859_v16 = vadd.f32 %v2378_v9, %v1847_v10 }
 0x20d   :  { %v1907_v18 = vsub.f32 0.083333336, %v1903_v11 }
 0x20e   :  { %v1871_v21 = vadd.f32 %v2380_v13, %v1859_v16 }
 0x20f   :  { %v1911_v23 = vmul.f32 %v1907_v18, %v3642_v53 }
 0x210   :  { %v3651_v27 = vadd.f32 %v2382_v20, %v1871_v21 }
 0x211   :  { %v3653_v28 = vsub.f32 %v1891_v22, %v1911_v23 }
 0x212   :  { %v2384_v3 = vpop.eup %2383 }
 0x213   :  { %v2386_v9 = vpop.eup %2385  ;;  %v1191_v13 = vmul.f32 %v2384_v3, %v2384_v3 }
 0x236   :  { %v804_v54 = vpop.xlane.xlu1 %803 }
 0x237   :  { %v883_v55 = vadd.f32 1.0, %v804_v54 }
 0x239   :  { %2387 = vrcp.f32 %v883_v55  ;;  %v899_v6 = vadd.f32 1.0, %v883_v55 }
 0x23a   :  { %2389 = vrcp.f32 %v3515_v15 }
 0x23b   :  { %2391 = vrcp.f32 %v804_v54  ;;  %v915_v58 = vadd.f32 1.0, %v899_v6 }
 0x23c   :  { %2393 = vrcp.f32 %v1083_v52 }
 0x23d   :  { %2395 = vrcp.f32 %v899_v6  ;;  %v931_v60 = vadd.f32 1.0, %v915_v58 }
 0x23e   :  { %2397 = vrcp.f32 %v1099_v61  ;;  %v1211_v61 = vmul.f32 0.003968254, %v1191_v13 }
 0x23f   :  { %v947_v63 = vadd.f32 1.0, %v931_v60  ;;  %2399 = vrcp.f32 %v915_v58 }
 0x240   :  { %2401 = vrcp.f32 %v1115_v14  ;;  %v1215_v14 = vsub.f32 0.008333334, %v1211_v61 }
 0x241   :  { %v963_v5 = vadd.f32 1.0, %v947_v63  ;;  %2403 = vrcp.f32 %v931_v60 }
 0x242   :  { %2405 = vrcp.f32 %v1131_v24 }
 0x243   :  { %v2388_v10 = vpop.eup %2387  ;;  %v979_v11 = vadd.f32 1.0, %v963_v5 }
 0x244   :  { %v2390_v16 = vpop.eup %2389 }
 0x245   :  { %v3658_v37 = vpop.eup %2391  ;;  %v995_v17 = vadd.f32 1.0, %v979_v11  ;;  %v1079_v18 = vadd.f32 %v2390_v16, %v2386_v9  ;;  %v1219_v16 = vmul.f32 %v1215_v14, %v1191_v13 }
 0x246   :  { %v2394_v20 = vpop.eup %2393  ;;  %v895_v52 = vadd.f32 %v3658_v37, %v2388_v10 }
 0x247   :  { %v2396_v21 = vpop.eup %2395  ;;  %2407 = vrcp.f32 %v995_v17  ;;  %v1095_v22 = vadd.f32 %v2394_v20, %v1079_v18 }
 0x248   :  { %2409 = vlog2.f32 %v1179_v45  ;;  %v2398_v23 = vpop.eup %2397  ;;  %v911_v54 = vadd.f32 %v2396_v21, %v895_v52  ;;  %v1223_v52 = vsub.f32 0.083333336, %v1219_v16 }
 0x249   :  { %2411 = vrcp.f32 %v947_v63  ;;  %v2400_v55 = vpop.eup %2399  ;;  %v1111_v6 = vadd.f32 %v2398_v23, %v1095_v22 }
 0x24a   :  { %2413 = vlog2.f32 %v995_v17  ;;  %v2402_v58 = vpop.eup %2401  ;;  %v927_v60 = vadd.f32 %v2400_v55, %v911_v54  ;;  %v1203_v54 = vmul.f32 0.5, %v2384_v3 }
 0x24b   :  { %2415 = vrcp.f32 %v1147_v34  ;;  %v2404_v9 = vpop.eup %2403  ;;  %v1127_v30 = vadd.f32 %v2402_v58, %v1111_v6 }
 0x24c   :  { %2417 = vrcp.f32 %v963_v5  ;;  %v2406_v10 = vpop.eup %2405  ;;  %v943_v63 = vadd.f32 %v2404_v9, %v927_v60 }
 0x24d   :  { %2419 = vrcp.f32 %v1163_v39  ;;  %v1143_v61 = vadd.f32 %v2406_v10, %v1127_v30  ;;  %v1227_v39 = vmul.f32 %v1223_v52, %v1191_v13 }
 0x24e   :  { %2421 = vrcp.f32 %v979_v11 }
 0x251   :  { %v2408_v24 = vpop.eup %2407 }
 0x252   :  { %v2410_v45 = vpop.eup %2409  ;;  %v1007_v18 = vmul.f32 %v2408_v24, %v2408_v24  ;;  %v1019_v6 = vmul.f32 0.5, %v2408_v24  ;;  %v814_v24 = vmul.f32 4.0, %v3658_v37 }
 0x253   :  { %v2412_v20 = vpop.eup %2411  ;;  %v1196_v23 = vmul.f32 0.6931472, %v2410_v45 }
 0x254   :  { %v1027_v21 = vmul.f32 0.003968254, %v1007_v18  ;;  %v2414_v17 = vpop.eup %2413  ;;  %v959_v5 = vadd.f32 %v2412_v20, %v943_v63 }
 0x255   :  { %v2416_v34 = vpop.eup %2415  ;;  %v1012_v11 = vmul.f32 0.6931472, %v2414_v17  ;;  %v1207_v2 = vsub.f32 %v1196_v23, %v1203_v54 }
 0x256   :  { %v1031_v22 = vsub.f32 0.008333334, %v1027_v21  ;;  %v2418_v55 = vpop.eup %2417  ;;  %v3661_v14 = vpop.xlane.xlu0 %806  ;;  %v1159_v51 = vadd.f32 %v2416_v34, %v1143_v61 }
 0x257   :  { %2423 = vrcp.f32 %v3661_v14  ;;  %v2420_v60 = vpop.eup %2419  ;;  %v975_v9 = vadd.f32 %v2418_v55, %v959_v5  ;;  %v1023_v10 = vsub.f32 %v1012_v11, %v1019_v6  ;;  %v1231_v20 = vsub.f32 %v1207_v2, %v1227_v39 }
 0x258   :  { %v1035_v58 = vmul.f32 %v1031_v22, %v1007_v18  ;;  %v2422_v30 = vpop.eup %2421  ;;  %v1175_v21 = vadd.f32 %v2420_v60, %v1159_v51  ;;  %v812_v51 = vsub.f32 %v3526_v35, %v3512_v1 }
 0x259   :  { %v991_v45 = vadd.f32 %v2422_v30, %v975_v9 }
 0x25a   :  { %v1039_v16 = vsub.f32 0.083333336, %v1035_v58  ;;  %v1235_v25 = vsub.f32 %v1231_v20, %v1175_v21 }
 0x25c   :  { %v1043_v63 = vmul.f32 %v1039_v16, %v1007_v18 }
 0x25e   :  { %v1047_v3 = vsub.f32 %v1023_v10, %v1043_v63 }
 0x260   :  { %v1051_v29 = vsub.f32 %v1047_v3, %v991_v45 }
 0x261   :  { %v3664_v13 = vpop.eup %2423 }
 0x262   :  { %v1239_v52 = vsub.f32 %v1051_v29, %v1235_v25  ;;  %v815_v17 = vmul.f32 4.0, %v3664_v13  ;;  %v810_v25 = vsub.f32 %v3515_v15, %v3512_v1  ;;  %v813_v29 = vmul.f32 %v3664_v13, %v812_v51 }
 0x264   :  { %v1243_v5 = vsel %vm801_vm1, %v1239_v52, 0.0  ;;  %v816_v61 = vadd.f32 %v815_v17, %v814_v24  ;;  %v817_v34 = vmul.f32 %v815_v17, %v814_v24  ;;  %v811_v55 = vmul.f32 %v3658_v37, %v810_v25 }
 0x265   :  { %1244 = vadd.xlane.f32.xlu1 %v1243_v5  ;;  %v821_v6 = vmul.f32 %v814_v24, %v813_v29 }
 0x266   :  { %v818_v22 = vsub.f32 %v816_v61, %v817_v34  ;;  %v820_v11 = vmul.f32 %v815_v17, %v811_v55 }
 0x268   :  { %2425 = vrcp.f32 %v818_v22  ;;  %v822_v9 = vadd.f32 %v821_v6, %v820_v11  ;;  %v832_v6 = vsel %vm801_vm1, %v3567_v56, 0.0 }
 0x272   :  { %v2426_v2 = vpop.eup %2425 }
 0x273   :  { %v824_v18 = vmul.f32 %v2426_v2, %v817_v34  ;;  %v823_v30 = vmul.f32 %v2426_v2, %v822_v9 }
 0x275   :  { %2427 = vrcp.f32 %v824_v18 }
 0x278   :  { %v1277_v23 = vpop.xlane.xlu1 %1276 }
 0x279   :  { %2429 = vlog2.f32 %v1277_v23  ;;  %v1295_v54 = vadd.f32 1.0, %v1277_v23 }
 0x27a   :  { %2431 = vrcp.f32 %v1277_v23 }
 0x27b   :  { %2433 = vlog2.f32 %v1295_v54  ;;  %v1311_v39 = vadd.f32 1.0, %v1295_v54 }
 0x27c   :  { %2435 = vrcp.f32 %v1295_v54 }
 0x27d   :  { %2437 = vlog2.f32 %v1311_v39  ;;  %v1327_v58 = vadd.f32 1.0, %v1311_v39 }
 0x27e   :  { %2439 = vrcp.f32 %v1311_v39 }
 0x27f   :  { %2441 = vlog2.f32 %v1327_v58  ;;  %v1343_v60 = vadd.f32 1.0, %v1327_v58  ;;  %v2428_v16 = vpop.eup %2427 }
 0x280   :  { %2443 = vrcp.f32 %v1327_v58  ;;  %v826_v10 = vmul.f32 4.0, %v2428_v16 }
 0x281   :  { %v1359_v63 = vadd.f32 1.0, %v1343_v60  ;;  %2445 = vlog2.f32 %v1343_v60 }
 0x282   :  { %v827_v45 = vmul.f32 %v826_v10, %v823_v30  ;;  %2447 = vrcp.f32 %v1343_v60 }
 0x283   :  { %v2430_v20 = vpop.eup %2429  ;;  %v1375_v37 = vadd.f32 1.0, %v1359_v63  ;;  %2449 = vlog2.f32 %v1359_v63 }
 0x284   :  { %v2432_v3 = vpop.eup %2431  ;;  %v1286_v21 = vmul.f32 0.6931472, %v2430_v20  ;;  %v3676_v24 = vadd.f32 %v3512_v1, %v827_v45  ;;  %2451 = vrcp.f32 %v1359_v63 }
 0x285   :  { %v2434_v52 = vpop.eup %2433  ;;  %v1391_v17 = vadd.f32 1.0, %v1375_v37  ;;  %2453 = vlog2.f32 %v1375_v37 }
 0x286   :  { %v2436_v5 = vpop.eup %2435  ;;  %v1302_v61 = vmul.f32 0.6931472, %v2434_v52  ;;  %v829_v2 = vsel %vm801_vm1, %v3676_v24, 0.0 }
 0x287   :  { %v2438_v34 = vpop.eup %2437  ;;  %v1943_v22 = vadd.f32 %v2436_v5, %v2432_v3  ;;  %v1407_v18 = vadd.f32 1.0, %v1391_v17  ;;  %830 = vadd.xlane.f32.xlu0 %v829_v2 }
 0x288   :  { %v2440_v51 = vpop.eup %2439  ;;  %v1307_v25 = vadd.f32 %v1302_v61, %v1286_v21  ;;  %v1318_v29 = vmul.f32 0.6931472, %v2438_v34 }
 0x289   :  { %v2442_v23 = vpop.eup %2441  ;;  %2455 = vrcp.f32 %v1407_v18  ;;  %v1955_v39 = vadd.f32 %v2440_v51, %v1943_v22  ;;  %v2206_v2 = vadd.f32 -0.5, %v1407_v18 }
 0x28a   :  { %v1323_v54 = vadd.f32 %v1318_v29, %v1307_v25  ;;  %v1334_v55 = vmul.f32 0.6931472, %v2442_v23  ;;  %2457 = vlog2.f32 %v1391_v17  ;;  %v2444_v11 = vpop.eup %2443 }
 0x28b   :  { %2459 = vlog2.f32 %v1407_v18  ;;  %833 = vadd.xlane.f32.xlu0 %v832_v6  ;;  %v2446_v60 = vpop.eup %2445  ;;  %v1967_v9 = vadd.f32 %v2444_v11, %v1955_v39 }
 0x28c   :  { %v1339_v58 = vadd.f32 %v1334_v55, %v1323_v54  ;;  %2461 = vrcp.f32 %v1375_v37  ;;  %v2448_v16 = vpop.eup %2447  ;;  %v1350_v30 = vmul.f32 0.6931472, %v2446_v60 }
 0x28d   :  { %v2450_v10 = vpop.eup %2449  ;;  %2463 = vrcp.f32 %v1391_v17  ;;  %v1979_v21 = vadd.f32 %v2448_v16, %v1967_v9 }
 0x28e   :  { %v2452_v63 = vpop.eup %2451  ;;  %v1355_v20 = vadd.f32 %v1350_v30, %v1339_v58  ;;  %v1366_v45 = vmul.f32 0.6931472, %v2450_v10  ;;  %2465 = vlog2.f32 %v3538_v40 }
 0x28f   :  { %v2454_v3 = vpop.eup %2453  ;;  %v1991_v54 = vadd.f32 %v2452_v63, %v1979_v21  ;;  %2467 = vlog2.f32 %v3541_v41 }
 0x290   :  { %v1371_v5 = vadd.f32 %v1366_v45, %v1355_v20  ;;  %v1382_v61 = vmul.f32 0.6931472, %v2454_v3  ;;  %2469 = vlog2.f32 %v3544_v42 }
 0x291   :  { %2471 = vlog2.f32 %v3547_v43 }
 0x292   :  { %v1387_v25 = vadd.f32 %v1382_v61, %v1371_v5  ;;  %2473 = vlog2.f32 %v3550_v46 }
 0x293   :  { %v2456_v52 = vpop.eup %2455  ;;  %2475 = vrcp.f32 %v3567_v56 }
 0x294   :  { %v2458_v34 = vpop.eup %2457  ;;  %v1419_v22 = vmul.f32 %v2456_v52, %v2456_v52  ;;  %v2019_v58 = vmul.f32 0.5, %v2456_v52 }
 0x295   :  { %v2460_v51 = vpop.eup %2459  ;;  %v1398_v37 = vmul.f32 0.6931472, %v2458_v34 }
 0x296   :  { %v1430_v29 = vmul.f32 0.6931472, %v2460_v51  ;;  %v1447_v23 = vmul.f32 0.0007936508, %v1419_v22  ;;  %v2027_v55 = vmul.f32 0.003968254, %v1419_v22  ;;  %v2462_v39 = vpop.eup %2461 }
 0x297   :  { %v3682_v11 = vadd.f32 %v1398_v37, %v1387_v25  ;;  %v2003_v30 = vadd.f32 %v2462_v39, %v1991_v54  ;;  %v2464_v20 = vpop.eup %2463 }
 0x298   :  { %v1435_v6 = vmul.f32 %v2206_v2, %v1430_v29  ;;  %v1451_v17 = vsub.f32 0.0027777778, %v1447_v23  ;;  %v2031_v60 = vsub.f32 0.008333334, %v2027_v55  ;;  %v2023_v5 = vsub.f32 %v1430_v29, %v2019_v58 }
 0x299   :  { %4388 = vst [vmem:[#allocation11_spill] sm:$0xff] %v3682_v11  ;;  %v2015_v51 = vadd.f32 %v2464_v20, %v2003_v30  ;;  %v4390_v23 = vsub.f32 %v3653_v28, %v3651_v27 }
 0x29a   :  { %v1439_v9 = vsub.f32 %v1435_v6, %v1407_v18  ;;  %v1455_v16 = vmul.f32 %v1451_v17, %v1419_v22  ;;  %v2035_v10 = vmul.f32 %v2031_v60, %v1419_v22  ;;  %v1787_v18 = vsub.f32 %v3574_v7, %v3512_v1 }
 0x29c   :  { %v1443_v45 = vadd.f32 0.9189385, %v1439_v9  ;;  %v1459_v3 = vsub.f32 0.083333336, %v1455_v16  ;;  %v2039_v61 = vsub.f32 0.083333336, %v2035_v10  ;;  %v3708_v16 = vpop.eup %2465 }
 0x29d   :  { %v2468_v41 = vpop.eup %2467 }
 0x29e   :  { %v1463_v34 = vmul.f32 %v2456_v52, %v1459_v3  ;;  %v2043_v63 = vmul.f32 %v2039_v61, %v1419_v22  ;;  %v1069_v52 = vadd.f32 1.0, %v3567_v56  ;;  %v3710_v43 = vpop.eup %2469 }
 0x29f   :  { %v3713_v30 = vpop.eup %2471 }
 0x2a0   :  { %v3684_v21 = vadd.f32 %v1463_v34, %v1443_v45  ;;  %v2047_v25 = vsub.f32 %v2023_v5, %v2043_v63  ;;  %v1085_v29 = vadd.f32 1.0, %v1069_v52  ;;  %2477 = vrcp.f32 %v1069_v52  ;;  %v3716_v10 = vpop.eup %2473 }
 0x2a1   :  { %v2476_v20 = vpop.eup %2475 }
 0x2a2   :  { %4389 = vst [vmem:[#allocation12_spill] sm:$0xff] %v3684_v21  ;;  %v2051_v37 = vsub.f32 %v2047_v25, %v2015_v51  ;;  %v1101_v22 = vadd.f32 1.0, %v1085_v29 }
 0x2a4   :  { %v2055_v54 = vsub.f32 %v4390_v23, %v2051_v37  ;;  %v1117_v39 = vadd.f32 1.0, %v1101_v22 }
 0x2a6   :  { %v3693_v55 = vmul.f32 %v2055_v54, %v1787_v18  ;;  %v1133_v6 = vadd.f32 1.0, %v1117_v39 }
 0x2a8   :  { %v3696_v17 = vadd.f32 1.0, %v1133_v6 }
 0x2aa   :  { %v3699_v58 = vadd.f32 1.0, %v3696_v17  ;;  %v2478_v3 = vpop.eup %2477 }
 0x2ab   :  { %v1081_v23 = vadd.f32 %v2478_v3, %v2476_v20 }
 0x2ac   :  { %v1181_v28 = vadd.f32 1.0, %v3699_v58 }
 0x314   :  { %v831_v27 = vpop.xlane.xlu0 %830 }
 0x315   :  { %2479 = vrcp.f32 %v831_v27 }
 0x316   :  { %2481 = vrcp.f32 %v1181_v28 }
 0x318   :  { %v834_v60 = vpop.xlane.xlu0 %833 }
 0x319   :  { %2483 = vrcp.f32 %v834_v60  ;;  %v885_v9 = vadd.f32 1.0, %v834_v60 }
 0x31a   :  { %2485 = vrcp.f32 %v1085_v29 }
 0x31b   :  { %2487 = vrcp.f32 %v885_v9  ;;  %v901_v42 = vadd.f32 1.0, %v885_v9 }
 0x31c   :  { %2489 = vlog2.f32 %v3553_v47  ;;  %v837_v47 = vsub.f32 %v3676_v24, %v3512_v1 }
 0x31d   :  { %v917_v46 = vadd.f32 1.0, %v901_v42  ;;  %2491 = vlog2.f32 %v3574_v7  ;;  %v839_v7 = vsub.f32 %v3567_v56, %v3512_v1 }
 0x31e   :  { %2493 = vrcp.f32 %v1101_v22 }
 0x31f   :  { %2495 = vrcp.f32 %v901_v42  ;;  %v933_v45 = vadd.f32 1.0, %v917_v46  ;;  %v2480_v5 = vpop.eup %2479 }
 0x320   :  { %2497 = vlog2.f32 %v3591_v0  ;;  %v3719_v34 = vpop.eup %2481  ;;  %v838_v18 = vmul.f32 %v2480_v5, %v837_v47  ;;  %v841_v29 = vmul.f32 4.0, %v2480_v5 }
 0x321   :  { %v949_v61 = vadd.f32 1.0, %v933_v45  ;;  %2499 = vrcp.f32 %v1117_v39  ;;  %v3728_v24 = vmul.f32 %v3719_v34, %v3719_v34 }
 0x322   :  { %2501 = vlog2.f32 %v3597_v4 }
 0x323   :  { %v2484_v51 = vpop.eup %2483  ;;  %2503 = vrcp.f32 %v917_v46  ;;  %v965_v63 = vadd.f32 1.0, %v949_v61 }
 0x324   :  { %v2486_v25 = vpop.eup %2485  ;;  %v840_v37 = vmul.f32 %v2484_v51, %v839_v7  ;;  %v842_v0 = vmul.f32 4.0, %v2484_v51  ;;  %2505 = vrcp.f32 %v1133_v6  ;;  %v1213_v7 = vmul.f32 0.003968254, %v3728_v24 }
 0x325   :  { %v2488_v54 = vpop.eup %2487  ;;  %v981_v52 = vadd.f32 1.0, %v965_v63  ;;  %2507 = vlog2.f32 %v1181_v28  ;;  %v1097_v5 = vadd.f32 %v2486_v25, %v1081_v23  ;;  %v843_v28 = vsel %vm801_vm1, %v838_v18, 0.0 }
 0x326   :  { %v3730_v22 = vpop.eup %2489  ;;  %v846_v4 = vsel %vm801_vm1, %v840_v37, 0.0  ;;  %v850_v39 = vmul.f32 %v840_v37, %v838_v18  ;;  %v857_v27 = vmul.f32 %v842_v0, %v838_v18  ;;  %2509 = vrcp.f32 %v933_v45 }
 0x327   :  { %v2492_v60 = vpop.eup %2491  ;;  %847 = vadd.xlane.f32.xlu0 %v846_v4  ;;  %v859_v9 = vmul.f32 %v841_v29, %v840_v37  ;;  %v3733_v42 = vmul.f32 %v842_v0, %v841_v29  ;;  %v997_v46 = vadd.f32 1.0, %v981_v52  ;;  %v897_v6 = vadd.f32 %v2488_v54, %v2484_v51 }
 0x328   :  { %v2494_v20 = vpop.eup %2493  ;;  %v858_v3 = vadd.f32 %v857_v27, %v850_v39  ;;  %2511 = vlog2.f32 %v3602_v12  ;;  %v1492_v37 = vmul.f32 0.6931472, %v2468_v41  ;;  %v1476_v12 = vmul.f32 0.6931472, %v3708_v16 }
 0x329   :  { %v2496_v47 = vpop.eup %2495  ;;  %2513 = vrcp.f32 %v997_v46  ;;  %v1113_v25 = vadd.f32 %v2494_v20, %v1097_v5  ;;  %v1217_v54 = vsub.f32 0.008333334, %v1213_v7  ;;  %v1478_v29 = vmul.f32 0.6931472, %v2492_v60 }
 0x32a   :  { %v2498_v2 = vpop.eup %2497  ;;  %v3738_v11 = vadd.f32 %v859_v9, %v858_v3  ;;  %2515 = vrcp.f32 %v3696_v17  ;;  %v913_v0 = vadd.f32 %v2496_v47, %v897_v6  ;;  %v851_v4 = vsel %vm801_vm1, %v850_v39, 0.0 }
 0x32b   :  { %v2500_v45 = vpop.eup %2499  ;;  %2517 = vrcp.f32 %v949_v61  ;;  %844 = vadd.xlane.f32.xlu0 %v843_v28  ;;  %v1494_v18 = vmul.f32 0.6931472, %v2498_v2  ;;  %v1498_v41 = vadd.f32 %v1492_v37, %v1476_v12  ;;  %v1508_v61 = vmul.f32 0.6931472, %v3710_v43 }
 0x32c   :  { %v2502_v51 = vpop.eup %2501  ;;  %2519 = vlog2.f32 %v3606_v19  ;;  %v1638_v27 = vmul.f32 0.0007936508, %v3584_v62  ;;  %v1129_v19 = vadd.f32 %v2500_v45, %v1113_v25  ;;  %v1221_v2 = vmul.f32 %v1217_v54, %v3728_v24 }
 0x32d   :  { %v2504_v23 = vpop.eup %2503  ;;  %2521 = vlog2.f32 %v997_v46  ;;  %v1499_v39 = vadd.f32 %v1494_v18, %v1478_v29  ;;  %v1514_v43 = vadd.f32 %v1508_v61, %v1498_v41  ;;  %v1524_v20 = vmul.f32 0.6931472, %v3713_v30 }
 0x32e   :  { %2523 = vrcp.f32 %v3699_v58  ;;  %v2506_v17 = vpop.eup %2505  ;;  %v929_v9 = vadd.f32 %v2504_v23, %v913_v0  ;;  %v1510_v58 = vmul.f32 0.6931472, %v2502_v51  ;;  %v1642_v6 = vsub.f32 0.0027777778, %v1638_v27 }
 0x32f   :  { %2525 = vrcp.f32 %v965_v63  ;;  %852 = vadd.xlane.f32.xlu0 %v851_v4  ;;  %v2508_v16 = vpop.eup %2507  ;;  %v1205_v7 = vmul.f32 0.5, %v3719_v34  ;;  %v1639_v30 = vmul.f32 0.0007936508, %v3642_v53  ;;  %v1530_v12 = vadd.f32 %v1524_v20, %v1514_v43 }
 0x330   :  { %2527 = vlog2.f32 %v3612_v26  ;;  %v2510_v46 = vpop.eup %2509  ;;  %v1145_v26 = vadd.f32 %v2506_v17, %v1129_v19  ;;  %v1200_v45 = vmul.f32 0.6931472, %v2508_v16  ;;  %v1515_v37 = vadd.f32 %v1510_v58, %v1499_v39 }
 0x331   :  { %2529 = vlog2.f32 %v3556_v48  ;;  %v945_v5 = vadd.f32 %v2510_v46, %v929_v9  ;;  %v1225_v48 = vsub.f32 0.083333336, %v1221_v2  ;;  %v1540_v23 = vmul.f32 0.6931472, %v3716_v10 }
 0x332   :  { %v2512_v60 = vpop.eup %2511  ;;  %2531 = vlog2.f32 %v3615_v31  ;;  %v2209_v31 = vadd.f32 -0.5, %v3562_v50  ;;  %v1646_v54 = vmul.f32 %v1642_v6, %v3584_v62  ;;  %v2210_v17 = vadd.f32 -0.5, %v3625_v33 }
 0x333   :  { %v2514_v63 = vpop.eup %2513  ;;  %2533 = vrcp.f32 %v981_v52  ;;  %v1526_v51 = vmul.f32 0.6931472, %v2512_v60  ;;  %v1229_v61 = vmul.f32 %v1225_v48, %v3728_v24  ;;  %v1643_v2 = vsub.f32 0.0027777778, %v1639_v30 }
 0x334   :  { %v2516_v3 = vpop.eup %2515  ;;  %v1009_v47 = vmul.f32 %v2514_v63, %v2514_v63  ;;  %2535 = vlog2.f32 %v3559_v49  ;;  %v1209_v49 = vsub.f32 %v1200_v45, %v1205_v7  ;;  %v1021_v46 = vmul.f32 0.5, %v2514_v63 }
 0x335   :  { %v2518_v28 = vpop.eup %2517  ;;  %2537 = vlog2.f32 %v3622_v32  ;;  %v1161_v4 = vadd.f32 %v2516_v3, %v1145_v26  ;;  %v1531_v27 = vadd.f32 %v1526_v51, %v1515_v37  ;;  %v1556_v32 = vmul.f32 0.6931472, %v3730_v22 }
 0x336   :  { %v2520_v0 = vpop.eup %2519  ;;  %v1029_v25 = vmul.f32 0.003968254, %v1009_v47  ;;  %v961_v29 = vadd.f32 %v2518_v28, %v945_v5  ;;  %v1626_v39 = vmul.f32 %v2209_v31, %v3576_v59  ;;  %v1546_v20 = vadd.f32 %v1540_v23, %v1530_v12 }
 0x337   :  { %v2522_v52 = vpop.eup %2521  ;;  %v1542_v16 = vmul.f32 0.6931472, %v2520_v0  ;;  %v1650_v6 = vsub.f32 0.083333336, %v1646_v54  ;;  %v1233_v24 = vsub.f32 %v1209_v49, %v1229_v61  ;;  %v1627_v63 = vmul.f32 %v2210_v17, %v3646_v8  ;;  %v3773_v61 = vld [vmem:[%s4368_s8] sm:$0x1] }
 0x338   :  { %v2524_v34 = vpop.eup %2523  ;;  %v1033_v18 = vsub.f32 0.008333334, %v1029_v25  ;;  %v1016_v19 = vmul.f32 0.6931472, %v2522_v52  ;;  %v1647_v48 = vmul.f32 %v1643_v2, %v3642_v53  ;;  %v1630_v22 = vsub.f32 %v1626_v39, %v3562_v50  ;;  %s2870_s8 = smov 4  }
 0x339   :  { %v2526_v41 = vpop.eup %2525  ;;  %v1177_v5 = vadd.f32 %v2524_v34, %v1161_v4  ;;  %v1547_v26 = vadd.f32 %v1542_v16, %v1531_v27  ;;  %v1562_v0 = vadd.f32 %v1556_v32, %v1546_v20  ;;  %v1654_v30 = vmul.f32 %v3571_v57, %v1650_v6 }
 0x33a   :  { %v2528_v9 = vpop.eup %2527  ;;  %v1037_v10 = vmul.f32 %v1033_v18, %v1009_v47  ;;  %v977_v60 = vadd.f32 %v2526_v41, %v961_v29  ;;  %v1025_v28 = vsub.f32 %v1016_v19, %v1021_v46  ;;  %v1651_v34 = vsub.f32 0.083333336, %v1647_v48 }
 0x33b   :  { %v2530_v62 = vpop.eup %2529  ;;  %v1558_v7 = vmul.f32 0.6931472, %v2528_v9  ;;  %v1237_v54 = vsub.f32 %v1233_v24, %v1177_v5  ;;  %v1634_v8 = vadd.f32 0.9189385, %v1630_v22  ;;  %v884_v2 = vadd.f32 1.0, %v3661_v14 }
 0x33c   :  { %v2532_v58 = vpop.eup %2531  ;;  %v1041_v43 = vsub.f32 0.083333336, %v1037_v10  ;;  %v1572_v25 = vmul.f32 0.6931472, %v2530_v62  ;;  %v1655_v57 = vmul.f32 %v3636_v44, %v1651_v34  ;;  %v1068_v62 = vadd.f32 1.0, %v3526_v35 }
 0x33d   :  { %v2534_v3 = vpop.eup %2533  ;;  %v1563_v52 = vadd.f32 %v1558_v7, %v1547_v26  ;;  %v1574_v12 = vmul.f32 0.6931472, %v2532_v58  ;;  %v1658_v50 = vadd.f32 %v1654_v30, %v1634_v8  ;;  %v900_v32 = vadd.f32 1.0, %v884_v2 }
 0x33e   :  { %v1045_v45 = vmul.f32 %v1041_v43, %v1009_v47  ;;  %v2536_v37 = vpop.eup %2535  ;;  %v993_v59 = vadd.f32 %v2534_v3, %v977_v60  ;;  %v1631_v47 = vsub.f32 %v1627_v63, %v3625_v33  ;;  %v1578_v53 = vadd.f32 %v1572_v25, %v1562_v0 }
 0x33f   :  { %v2538_v31 = vpop.eup %2537  ;;  %v1588_v18 = vmul.f32 0.6931472, %v2536_v37  ;;  %v1579_v41 = vadd.f32 %v1574_v12, %v1563_v52  ;;  %v1733_v33 = vsel %vm1729_vm2, %v3773_v61, 0.0  ;;  %v1084_v39 = vadd.f32 1.0, %v1068_v62 }
 0x340   :  { %v1049_v51 = vsub.f32 %v1025_v28, %v1045_v45  ;;  %v1590_v4 = vmul.f32 0.6931472, %v2538_v31  ;;  %v1635_v49 = vadd.f32 0.9189385, %v1631_v47  ;;  %v916_v58 = vadd.f32 1.0, %v900_v32 }
 0x341   :  { %v1594_v27 = vadd.f32 %v1588_v18, %v1578_v53  ;;  %v1100_v60 = vadd.f32 1.0, %v1084_v39  ;;  %2539 = vrcp.f32 %v1068_v62 }
 0x342   :  { %v1053_v23 = vsub.f32 %v1049_v51, %v993_v59  ;;  %v1595_v9 = vadd.f32 %v1590_v4, %v1579_v41  ;;  %v1659_v19 = vadd.f32 %v1655_v57, %v1635_v49  ;;  %v932_v43 = vadd.f32 1.0, %v916_v58 }
 0x343   :  { %v1662_v16 = vsub.f32 %v1658_v50, %v1594_v27  ;;  %v1116_v20 = vadd.f32 1.0, %v1100_v60 }
 0x344   :  { %v1241_v29 = vsub.f32 %v1053_v23, %v1237_v54  ;;  %v1663_v10 = vsub.f32 %v1659_v19, %v1595_v9  ;;  %v948_v6 = vadd.f32 1.0, %v932_v43 }
 0x345   :  { %v1668_v46 = vsel %vm801_vm1, %v1662_v16, 0.0  ;;  %v1132_v3 = vadd.f32 1.0, %v1116_v20 }
 0x346   :  { %v1249_v17 = vsel %vm801_vm1, %v1241_v29, 0.0  ;;  %v1671_v44 = vsel %vm801_vm1, %v1663_v10, 0.0  ;;  %v964_v5 = vadd.f32 1.0, %v948_v6 }
 0x347   :  { %1250 = vadd.xlane.f32.xlu1 %v1249_v17  ;;  %v1148_v24 = vadd.f32 1.0, %v1132_v3 }
 0x348   :  { %v980_v7 = vadd.f32 1.0, %v964_v5 }
 0x349   :  { %v3781_v28 = vadd.f32 1.0, %v1148_v24 }
 0x34a   :  { %v996_v63 = vadd.f32 1.0, %v980_v7 }
 0x34b   :  { %1734 = vadd.xlane.f32.xlu1 %v1733_v33  ;;  %v1180_v14 = vadd.f32 1.0, %v3781_v28  ;;  %v2540_v51 = vpop.eup %2539 }
 0x34c   :  { %2541 = vrcp.f32 %v996_v63 }
 0x34d   :  { %2543 = vrcp.f32 %v1180_v14 }
 0x34e   :  { %2545 = vrcp.f32 %v884_v2 }
 0x34f   :  { %1669 = vadd.xlane.f32.xlu1 %v1668_v46 }
 0x353   :  { %1672 = vadd.xlane.f32.xlu1 %v1671_v44 }
 0x356   :  { %v2542_v0 = vpop.eup %2541 }
 0x357   :  { %v2544_v25 = vpop.eup %2543  ;;  %v1008_v52 = vmul.f32 %v2542_v0, %v2542_v0 }
 0x358   :  { %v2546_v31 = vpop.eup %2545  ;;  %v1192_v23 = vmul.f32 %v2544_v25, %v2544_v25 }
 0x359   :  { %v896_v47 = vadd.f32 %v2546_v31, %v3664_v13  ;;  %v1028_v53 = vmul.f32 0.003968254, %v1008_v52 }
 0x35a   :  { %v1212_v18 = vmul.f32 0.003968254, %v1192_v23 }
 0x35c   :  { %v1216_v49 = vsub.f32 0.008333334, %v1212_v18 }
 0x35e   :  { %v1220_v19 = vmul.f32 %v1216_v49, %v1192_v23 }
 0x3b4   :  { %v848_v26 = vpop.xlane.xlu0 %847 }
 0x3b8   :  { %v845_v45 = vpop.xlane.xlu0 %844 }
 0x3b9   :  { %v849_v48 = vmul.f32 %v848_v26, %v845_v45 }
 0x3bc   :  { %v853_v22 = vpop.xlane.xlu0 %852 }
 0x3bd   :  { %v854_v37 = vsub.f32 %v849_v48, %v853_v22 }
 0x3bf   :  { %v855_v59 = vsub.f32 1.0, %v854_v37 }
 0x3c1   :  { %2547 = vrcp.f32 %v855_v59 }
 0x3c2   :  { %2549 = vrcp.f32 %v3526_v35 }
 0x3c3   :  { %2551 = vrcp.f32 %v900_v32  ;;  %v1261_v32 = vmul.f32 %v3528_v36, %v3515_v15 }
 0x3c4   :  { %2553 = vrcp.f32 %v1084_v39 }
 0x3c5   :  { %2555 = vrcp.f32 %v916_v58 }
 0x3c6   :  { %2557 = vrcp.f32 %v1100_v60 }
 0x3c7   :  { %2559 = vrcp.f32 %v932_v43 }
 0x3c8   :  { %2561 = vrcp.f32 %v1116_v20 }
 0x3cb   :  { %v2548_v30 = vpop.eup %2547 }
 0x3cc   :  { %v863_v12 = vmul.f32 %v2548_v30, %v3733_v42  ;;  %v2550_v54 = vpop.eup %2549  ;;  %v1032_v42 = vsub.f32 0.008333334, %v1028_v53  ;;  %v861_v10 = vmul.f32 %v2548_v30, %v3738_v11  ;;  %v1020_v11 = vmul.f32 0.5, %v2542_v0 }
 0x3cd   :  { %v2552_v34 = vpop.eup %2551  ;;  %v1080_v8 = vadd.f32 %v2550_v54, %v2540_v51 }
 0x3ce   :  { %2563 = vrcp.f32 %v863_v12  ;;  %v2554_v29 = vpop.eup %2553  ;;  %v912_v50 = vadd.f32 %v2552_v34, %v896_v47  ;;  %v1036_v16 = vmul.f32 %v1032_v42, %v1008_v52 }
 0x3cf   :  { %2565 = vrcp.f32 %v948_v6  ;;  %v2556_v4 = vpop.eup %2555  ;;  %v1096_v17 = vadd.f32 %v2554_v29, %v1080_v8  ;;  %v1224_v6 = vsub.f32 0.083333336, %v1220_v19 }
 0x3d0   :  { %2567 = vlog2.f32 %v996_v63  ;;  %v2558_v41 = vpop.eup %2557  ;;  %v928_v57 = vadd.f32 %v2556_v4, %v912_v50  ;;  %v1040_v43 = vsub.f32 0.083333336, %v1036_v16 }
 0x3d1   :  { %2569 = vrcp.f32 %v1132_v3  ;;  %v2560_v13 = vpop.eup %2559  ;;  %v1112_v33 = vadd.f32 %v2558_v41, %v1096_v17  ;;  %v1228_v51 = vmul.f32 %v1224_v6, %v1192_v23 }
 0x3d2   :  { %2571 = vlog2.f32 %v1180_v14  ;;  %v2562_v27 = vpop.eup %2561  ;;  %v944_v2 = vadd.f32 %v2560_v13, %v928_v57  ;;  %v1204_v14 = vmul.f32 0.5, %v2544_v25  ;;  %v1272_v25 = vsel %vm801_vm1, %v3538_v40, 0.0 }
 0x3d3   :  { %2573 = vrcp.f32 %v964_v5  ;;  %v1128_v39 = vadd.f32 %v2562_v27, %v1112_v33 }
 0x3d4   :  { %2575 = vrcp.f32 %v1148_v24 }
 0x3d5   :  { %2577 = vrcp.f32 %v980_v7  ;;  %v3795_v7 = vadd.f32 %v1261_v32, %v3533_v38 }
 0x3d6   :  { %2579 = vrcp.f32 %v3781_v28  ;;  %v1044_v28 = vmul.f32 %v1040_v43, %v1008_v52 }
 0x3d7   :  { %v1269_v0 = vsel %vm801_vm1, %v3795_v7, 0.0  ;;  %v1485_v17 = vadd.f32 1.0, %v3795_v7  ;;  %2581 = vrcp.f32 %v3795_v7 }
 0x3d8   :  { %v2564_v9 = vpop.eup %2563 }
 0x3d9   :  { %v2566_v46 = vpop.eup %2565  ;;  %v865_v44 = vmul.f32 4.0, %v2564_v9  ;;  %v1501_v41 = vadd.f32 1.0, %v1485_v17  ;;  %2583 = vrcp.f32 %v1485_v17 }
 0x3da   :  { %v2568_v62 = vpop.eup %2567  ;;  %v960_v5 = vadd.f32 %v2566_v46, %v944_v2  ;;  %2585 = vlog2.f32 %v3795_v7 }
 0x3db   :  { %v2570_v58 = vpop.eup %2569  ;;  %v866_v60 = vmul.f32 %v865_v44, %v861_v10  ;;  %v1014_v24 = vmul.f32 0.6931472, %v2568_v62  ;;  %v1517_v42 = vadd.f32 1.0, %v1501_v41  ;;  %2587 = vlog2.f32 %v1485_v17 }
 0x3dc   :  { %v2572_v20 = vpop.eup %2571  ;;  %v1144_v45 = vadd.f32 %v2570_v58, %v1128_v39  ;;  %2589 = vlog2.f32 %v1501_v41 }
 0x3dd   :  { %v3792_v3 = vadd.f32 %v3512_v1, %v866_v60  ;;  %v2574_v26 = vpop.eup %2573  ;;  %v1198_v48 = vmul.f32 0.6931472, %v2572_v20  ;;  %v1024_v59 = vsub.f32 %v1014_v24, %v1020_v11  ;;  %v1533_v49 = vadd.f32 1.0, %v1517_v42 }
 0x3de   :  { %v2576_v22 = vpop.eup %2575  ;;  %v976_v37 = vadd.f32 %v2574_v26, %v960_v5  ;;  %2591 = vlog2.f32 %v1517_v42  ;;  %v3831_v24 = vadd.f32 1.0, %v3773_v61 }
 0x3df   :  { %4391 = vst [vmem:[#allocation13_spill] sm:$0xff] %v3792_v3  ;;  %v868_v63 = vsel %vm801_vm1, %v3792_v3, 0.0  ;;  %v2578_v31 = vpop.eup %2577  ;;  %v1264_v30 = vmul.f32 %v3528_v36, %v3792_v3  ;;  %v1048_v12 = vsub.f32 %v1024_v59, %v1044_v28  ;;  %v1160_v54 = vadd.f32 %v2576_v22, %v1144_v45 }
 0x3e0   :  { %869 = vadd.xlane.f32.xlu0 %v868_v63  ;;  %v1208_v47 = vsub.f32 %v1198_v48, %v1204_v14  ;;  %v2580_v34 = vpop.eup %2579  ;;  %v992_v52 = vadd.f32 %v2578_v31, %v976_v37  ;;  %v1549_v57 = vadd.f32 1.0, %v1533_v49  ;;  %v1070_v13 = vadd.f32 1.0, %v3792_v3 }
 0x3e1   :  { %v3806_v29 = vadd.f32 %v1264_v30, %v3533_v38  ;;  %v1176_v53 = vadd.f32 %v2580_v34, %v1160_v54  ;;  %2593 = vlog2.f32 %v1533_v49  ;;  %v2582_v46 = vpop.eup %2581 }
 0x3e2   :  { %v1232_v8 = vsub.f32 %v1208_v47, %v1228_v51  ;;  %v1052_v23 = vsub.f32 %v1048_v12, %v992_v52  ;;  %v1565_v38 = vadd.f32 1.0, %v1549_v57  ;;  %v1086_v27 = vadd.f32 1.0, %v1070_v13 }
 0x3e3   :  { %4392 = vst [vmem:[#allocation14_spill] sm:$0xff] %v3806_v29  ;;  %v1278_v36 = vsel %vm801_vm1, %v3806_v29, 0.0  ;;  %v3818_v9 = vadd.f32 1.0, %v3806_v29  ;;  %v2584_v44 = vpop.eup %2583  ;;  %v3847_v51 = vadd.f32 1.0, %v3831_v24 }
 0x3e4   :  { %1270 = vadd.xlane.f32.xlu0 %v1269_v0  ;;  %v1236_v18 = vsub.f32 %v1232_v8, %v1176_v53  ;;  %v1581_v33 = vadd.f32 1.0, %v1565_v38  ;;  %v1102_v19 = vadd.f32 1.0, %v1086_v27  ;;  %v2586_v62 = vpop.eup %2585 }
 0x3e5   :  { %v3822_v10 = vadd.f32 1.0, %v3818_v9  ;;  %v2588_v32 = vpop.eup %2587  ;;  %v1474_v28 = vmul.f32 0.6931472, %v2586_v62 }
 0x3e6   :  { %v1240_v50 = vsub.f32 %v1052_v23, %v1236_v18  ;;  %v3815_v16 = vadd.f32 1.0, %v1581_v33  ;;  %v1118_v2 = vadd.f32 1.0, %v1102_v19  ;;  %v2590_v39 = vpop.eup %2589  ;;  %v1490_v5 = vmul.f32 0.6931472, %v2588_v32 }
 0x3e7   :  { %v3826_v58 = vadd.f32 1.0, %v3822_v10  ;;  %v1506_v59 = vmul.f32 0.6931472, %v2590_v39 }
 0x3e8   :  { %1273 = vadd.xlane.f32.xlu0 %v1272_v25  ;;  %v1246_v4 = vsel %vm801_vm1, %v1240_v50, 0.0  ;;  %2595 = vrcp.f32 %v3815_v16  ;;  %v2592_v60 = vpop.eup %2591  ;;  %v1134_v43 = vadd.f32 1.0, %v1118_v2  ;;  %v1497_v37 = vadd.f32 %v1490_v5, %v1474_v28 }
 0x3e9   :  { %2597 = vlog2.f32 %v1549_v57  ;;  %v3835_v26 = vadd.f32 1.0, %v3826_v58  ;;  %v1522_v8 = vmul.f32 0.6931472, %v2592_v60  ;;  %v3859_v25 = vadd.f32 1.0, %v3847_v51 }
 0x3ea   :  { %2599 = vlog2.f32 %v1565_v38  ;;  %v1150_v63 = vadd.f32 1.0, %v1134_v43  ;;  %v1513_v52 = vadd.f32 %v1506_v59, %v1497_v37  ;;  %v1809_v50 = vadd.f32 %v2584_v44, %v2582_v46 }
 0x3eb   :  { %2601 = vlog2.f32 %v1581_v33  ;;  %v2594_v20 = vpop.eup %2593  ;;  %v3851_v0 = vadd.f32 1.0, %v3835_v26 }
 0x3ec   :  { %1279 = vadd.xlane.f32.xlu0 %v1278_v36  ;;  %2603 = vlog2.f32 %v3815_v16  ;;  %v1166_v12 = vadd.f32 1.0, %v1150_v63 }
 0x3ed   :  { %2605 = vrcp.f32 %v1501_v41  ;;  %v3865_v53 = vadd.f32 1.0, %v3851_v0 }
 0x3ee   :  { %2607 = vrcp.f32 %v1517_v42  ;;  %v1182_v36 = vadd.f32 1.0, %v1166_v12  ;;  %v1529_v42 = vadd.f32 %v1522_v8, %v1513_v52 }
 0x3ef   :  { %2609 = vrcp.f32 %v1533_v49  ;;  %v1538_v49 = vmul.f32 0.6931472, %v2594_v20 }
 0x3f0   :  { %1247 = vadd.xlane.f32.xlu0 %v1246_v4  ;;  %2611 = vrcp.f32 %v1549_v57  ;;  %v3871_v57 = vadd.f32 1.0, %v3859_v25 }
 0x3f1   :  { %2613 = vrcp.f32 %v1565_v38  ;;  %v1545_v60 = vadd.f32 %v1538_v49, %v1529_v42 }
 0x3f2   :  { %v3828_v6 = vpop.eup %2595  ;;  %2615 = vrcp.f32 %v1581_v33 }
 0x3f3   :  { %v2598_v11 = vpop.eup %2597  ;;  %2617 = vrcp.f32 %v3792_v3  ;;  %v3844_v14 = vmul.f32 %v3828_v6, %v3828_v6 }
 0x3f4   :  { %v3837_v45 = vpop.eup %2599  ;;  %2619 = vrcp.f32 %v1070_v13  ;;  %v1554_v44 = vmul.f32 0.6931472, %v2598_v11 }
 0x3f5   :  { %v3839_v48 = vpop.eup %2601  ;;  %2621 = vrcp.f32 %v3806_v29  ;;  %v1637_v47 = vmul.f32 0.0007936508, %v3844_v14  ;;  %v1893_v33 = vmul.f32 0.003968254, %v3844_v14 }
 0x3f6   :  { %v2604_v22 = vpop.eup %2603  ;;  %2623 = vrcp.f32 %v1086_v27  ;;  %v3880_v27 = vadd.f32 1.0, %v3865_v53 }
 0x3f7   :  { %v2606_v31 = vpop.eup %2605  ;;  %2625 = vrcp.f32 %v3818_v9  ;;  %v1641_v17 = vsub.f32 0.0027777778, %v1637_v47  ;;  %v3875_v13 = vmul.f32 0.6931472, %v2604_v22  ;;  %v1570_v47 = vmul.f32 0.6931472, %v3837_v45 }
 0x3f8   :  { %v2608_v30 = vpop.eup %2607  ;;  %2627 = vrcp.f32 %v1102_v19  ;;  %v3893_v11 = vadd.f32 1.0, %v3880_v27 }
 0x3f9   :  { %v3853_v54 = vpop.eup %2609  ;;  %2629 = vrcp.f32 %v1118_v2  ;;  %v2208_v2 = vadd.f32 -0.5, %v3815_v16  ;;  %v1645_v62 = vmul.f32 %v1641_v17, %v3844_v14 }
 0x3fa   :  { %v3856_v34 = vpop.eup %2611  ;;  %2631 = vrcp.f32 %v1134_v43  ;;  %v3887_v43 = vadd.f32 1.0, %v3871_v57 }
 0x3fb   :  { %v3861_v23 = vpop.eup %2613  ;;  %2633 = vlog2.f32 %v3806_v29  ;;  %v1625_v5 = vmul.f32 %v2208_v2, %v3875_v13  ;;  %v1649_v59 = vsub.f32 0.083333336, %v1645_v62 }
 0x3fc   :  { %v3867_v18 = vpop.eup %2615  ;;  %2635 = vrcp.f32 %v1150_v63  ;;  %v1897_v63 = vsub.f32 0.008333334, %v1893_v33  ;;  %v3901_v52 = vadd.f32 1.0, %v3887_v43  ;;  %v1586_v33 = vmul.f32 0.6931472, %v3839_v48 }
 0x3fd   :  { %v2618_v4 = vpop.eup %2617  ;;  %2637 = vlog2.f32 %v3818_v9  ;;  %v1821_v9 = vadd.f32 %v2606_v31, %v1809_v50 }
 0x3fe   :  { %v2620_v41 = vpop.eup %2619  ;;  %2639 = vrcp.f32 %v1166_v12  ;;  %v1901_v50 = vmul.f32 %v1897_v63, %v3844_v14 }
 0x3ff   :  { %v3873_v38 = vpop.eup %2621  ;;  %2641 = vlog2.f32 %v3822_v10  ;;  %v1082_v39 = vadd.f32 %v2620_v41, %v2618_v4  ;;  %v1833_v22 = vadd.f32 %v2608_v30, %v1821_v9  ;;  %v1629_v30 = vsub.f32 %v1625_v5, %v3815_v16 }
 0x400   :  { %v2624_v19 = vpop.eup %2623  ;;  %2643 = vrcp.f32 %v1182_v36  ;;  %v1653_v41 = vmul.f32 %v3828_v6, %v1649_v59  ;;  %v3915_v16 = vadd.f32 1.0, %v3901_v52 }
 0x401   :  { %v3882_v46 = vpop.eup %2625  ;;  %2645 = vlog2.f32 %v1182_v36  ;;  %v1098_v12 = vadd.f32 %v2624_v19, %v1082_v39  ;;  %v1561_v36 = vadd.f32 %v1554_v44, %v1545_v60  ;;  %v1845_v17 = vadd.f32 %v3853_v54, %v1833_v22 }
 0x402   :  { %v2628_v32 = vpop.eup %2627  ;;  %2647 = vlog2.f32 %v3826_v58  ;;  %v1633_v44 = vadd.f32 0.9189385, %v1629_v30  ;;  %v1905_v54 = vsub.f32 0.083333336, %v1901_v50  ;;  %v3925_v5 = vadd.f32 1.0, %v3915_v16 }
 0x403   :  { %v2630_v20 = vpop.eup %2629  ;;  %2649 = vlog2.f32 %v3835_v26  ;;  %v1114_v49 = vadd.f32 %v2628_v32, %v1098_v12  ;;  %v1577_v9 = vadd.f32 %v1570_v47, %v1561_v36  ;;  %v1857_v62 = vadd.f32 %v3856_v34, %v1845_v17 }
 0x404   :  { %v2632_v28 = vpop.eup %2631  ;;  %2651 = vlog2.f32 %v3851_v0  ;;  %v1657_v48 = vadd.f32 %v1653_v41, %v1633_v44  ;;  %v3979_v44 = vsel %vm801_vm1, %v3693_v55, 0.0 }
 0x405   :  { %v2634_v37 = vpop.eup %2633  ;;  %2653 = vlog2.f32 %v3865_v53  ;;  %v1593_v63 = vadd.f32 %v1586_v33, %v1577_v9  ;;  %4393 = vst [vmem:[#allocation15_spill] sm:$0xff] %v3979_v44 }
 0x406   :  { %v3897_v31 = vpop.eup %2635  ;;  %2655 = vlog2.f32 %v3880_v27  ;;  %v1480_v34 = vmul.f32 0.6931472, %v2634_v37 }
 0x407   :  { %v2638_v8 = vpop.eup %2637  ;;  %2657 = vrcp.f32 %v3893_v11  ;;  %v1661_v59 = vsub.f32 %v1657_v48, %v1593_v63 }
 0x408   :  { %v3907_v4 = vpop.eup %2639  ;;  %2659 = vlog2.f32 %v3893_v11  ;;  %v1496_v39 = vmul.f32 0.6931472, %v2638_v8 }
 0x409   :  { %v2642_v45 = vpop.eup %2641  ;;  %2661 = vrcp.f32 %v3822_v10  ;;  %v1885_v10 = vmul.f32 0.5, %v3828_v6  ;;  %v1909_v6 = vmul.f32 %v1905_v54, %v3844_v14 }
 0x40a   :  { %v2644_v42 = vpop.eup %2643  ;;  %2663 = vrcp.f32 %v3826_v58  ;;  %v1130_v58 = vadd.f32 %v2630_v20, %v1114_v49  ;;  %v1500_v12 = vadd.f32 %v1496_v39, %v1480_v34 }
 0x40b   :  { %v2646_v19 = vpop.eup %2645  ;;  %2665 = vrcp.f32 %v3835_v26  ;;  %v3931_v22 = vmul.f32 %v2644_v42, %v2644_v42  ;;  %v1889_v20 = vsub.f32 %v3875_v13, %v1885_v10  ;;  %v3969_v49 = vmul.f32 0.5, %v2644_v42 }
 0x40c   :  { %v2648_v2 = vpop.eup %2647  ;;  %2667 = vrcp.f32 %v3851_v0  ;;  %v1146_v14 = vadd.f32 %v2632_v28, %v1130_v58  ;;  %v3967_v41 = vmul.f32 0.6931472, %v2646_v19  ;;  %v3983_v42 = vadd.f32 -0.5, %v3893_v11 }
 0x40d   :  { %v2650_v32 = vpop.eup %2649  ;;  %2669 = vrcp.f32 %v3865_v53  ;;  %v1869_v53 = vadd.f32 %v3861_v23, %v1857_v62  ;;  %v3947_v13 = vsub.f32 %v1889_v20, %v1909_v6  ;;  %v1528_v50 = vmul.f32 0.6931472, %v2648_v2 }
 0x40e   :  { %v2652_v60 = vpop.eup %2651  ;;  %2671 = vlog2.f32 %v3773_v61  ;;  %v1544_v62 = vmul.f32 0.6931472, %v2650_v32 }
 0x40f   :  { %v2654_v26 = vpop.eup %2653  ;;  %2673 = vlog2.f32 %v3831_v24  ;;  %v1512_v24 = vmul.f32 0.6931472, %v2642_v45  ;;  %v3956_v8 = vadd.f32 %v3867_v18, %v1869_v53  ;;  %v1560_v39 = vmul.f32 0.6931472, %v2652_v60 }
 0x410   :  { %v3929_v0 = vpop.eup %2655  ;;  %2675 = vrcp.f32 %v3880_v27 }
 0x411   :  { %v3936_v61 = vpop.eup %2657  ;;  %2677 = vlog2.f32 %v3847_v51  ;;  %v1214_v51 = vmul.f32 0.003968254, %v3931_v22  ;;  %v1516_v30 = vadd.f32 %v1512_v24, %v1500_v12 }
 0x412   :  { %v3939_v47 = vpop.eup %2659  ;;  %2679 = vrcp.f32 %v3925_v5 }
 0x413   :  { %v3942_v37 = vpop.eup %2661  ;;  %2681 = vlog2.f32 %v3859_v25  ;;  %v3961_v25 = vsel %vm801_vm1, %v1661_v59, 0.0  ;;  %v1532_v2 = vadd.f32 %v1528_v50, %v1516_v30 }
 0x414   :  { %v3949_v27 = vpop.eup %2663  ;;  %2683 = vlog2.f32 %v3871_v57  ;;  %v1162_v57 = vadd.f32 %v3897_v31, %v1146_v14  ;;  %v1218_v31 = vsub.f32 0.008333334, %v1214_v51  ;;  %v4000_v14 = vmul.f32 0.6931472, %v3929_v0 }
 0x415   :  { %v3958_v36 = vpop.eup %2665  ;;  %2685 = vlog2.f32 %v3925_v5  ;;  %v1548_v12 = vadd.f32 %v1544_v62, %v1532_v2  ;;  %v4007_v51 = vmul.f32 0.5, %v3936_v61  ;;  %v4015_v62 = vmul.f32 0.6931472, %v3939_v47 }
 0x416   :  { %v3964_v17 = vpop.eup %2667  ;;  %2687 = vlog2.f32 %v3887_v43  ;;  %v1812_v43 = vadd.f32 %v3882_v46, %v3873_v38  ;;  %v3990_v48 = vadd.f32 %v3907_v4, %v1162_v57  ;;  %v1576_v46 = vmul.f32 0.6931472, %v2654_v26  ;;  %4394 = vst [vmem:[#allocation16_spill] sm:$0xff] %v4000_v14 }
 0x417   :  { %v3972_v18 = vpop.eup %2669  ;;  %2689 = vlog2.f32 %v3901_v52  ;;  %v1222_v32 = vmul.f32 %v1218_v31, %v3931_v22  ;;  %v4004_v26 = vmul.f32 %v3936_v61, %v3936_v61  ;;  %v1564_v2 = vadd.f32 %v1560_v39, %v1548_v12 }
 0x418   :  { %v2672_v54 = vpop.eup %2671  ;;  %2691 = vlog2.f32 %v3915_v16  ;;  %v1824_v47 = vadd.f32 %v3942_v37, %v1812_v43  ;;  %v4045_v37 = vmul.f32 %v3983_v42, %v4015_v62 }
 0x419   :  { %v2674_v19 = vpop.eup %2673  ;;  %v1682_v34 = vmul.f32 0.6931472, %v2672_v54  ;;  %v1226_v54 = vsub.f32 0.083333336, %v1222_v32  ;;  %v4033_v39 = vmul.f32 0.003968254, %v4004_v26 }
 0x41a   :  { %v3987_v10 = vpop.eup %2675  ;;  %v1686_v53 = vmul.f32 0.6931472, %v2674_v19 }
 0x41b   :  { %v2678_v58 = vpop.eup %2677  ;;  %v1230_v12 = vmul.f32 %v1226_v54, %v3931_v22 }
 0x41c   :  { %v3994_v6 = vpop.eup %2679  ;;  %v1687_v31 = vadd.f32 %v1686_v53, %v1682_v34  ;;  %v1690_v0 = vmul.f32 0.6931472, %v2678_v58  ;;  %v4027_v58 = vmul.f32 0.0007936508, %v4004_v26 }
 0x41d   :  { %v2682_v20 = vpop.eup %2681  ;;  %v4024_v23 = vmul.f32 %v3994_v6, %v3994_v6 }
 0x41e   :  { %v2684_v24 = vpop.eup %2683  ;;  %v1694_v9 = vmul.f32 0.6931472, %v2682_v20 }
 0x41f   :  { %v2686_v30 = vpop.eup %2685  ;;  %v1722_v22 = vmul.f32 0.0007936508, %v4024_v23 }
 0x420   :  { %v1718_v21 = vmul.f32 0.6931472, %v2686_v30 }
 0x46d   :  { %v870_v45 = vpop.xlane.xlu0 %869 }
 0x46e   :  { %v886_v33 = vadd.f32 1.0, %v870_v45  ;;  %2693 = vrcp.f32 %v870_v45 }
 0x470   :  { %v902_v52 = vadd.f32 1.0, %v886_v33  ;;  %2695 = vrcp.f32 %v886_v33  ;;  %v2688_v33 = vpop.eup %2687 }
 0x471   :  { %v1271_v55 = vpop.xlane.xlu0 %1270  ;;  %v4012_v19 = vpop.eup %2689 }
 0x472   :  { %2697 = vrcp.f32 %v902_v52  ;;  %v918_v63 = vadd.f32 1.0, %v902_v52  ;;  %v1293_v38 = vadd.f32 1.0, %v1271_v55 }
 0x473   :  { %2699 = vlog2.f32 %v1271_v55 }
 0x474   :  { %2701 = vrcp.f32 %v918_v63  ;;  %v934_v4 = vadd.f32 1.0, %v918_v63  ;;  %v1309_v59 = vadd.f32 1.0, %v1293_v38  ;;  %v4017_v63 = vpop.eup %2691 }
 0x475   :  { %2703 = vlog2.f32 %v1293_v38  ;;  %v3997_v60 = vpop.xlane.xlu0 %1273 }
 0x476   :  { %2705 = vrcp.f32 %v934_v4  ;;  %v950_v50 = vadd.f32 1.0, %v934_v4  ;;  %v1325_v45 = vadd.f32 1.0, %v1309_v59  ;;  %v4010_v57 = vadd.f32 1.0, %v3997_v60 }
 0x477   :  { %2707 = vlog2.f32 %v1309_v59 }
 0x478   :  { %2709 = vrcp.f32 %v950_v50  ;;  %v966_v52 = vadd.f32 1.0, %v950_v50  ;;  %v4020_v4 = vadd.f32 1.0, %v4010_v57  ;;  %v2694_v32 = vpop.eup %2693  ;;  %v1691_v50 = vadd.f32 %v1690_v0, %v1687_v31 }
 0x479   :  { %2711 = vlog2.f32 %v1325_v45  ;;  %v4037_v16 = vadd.f32 1.0, %v1325_v45  ;;  %v4039_v15 = vpop.xlane.xlu0 %1279  ;;  %v1698_v31 = vmul.f32 0.6931472, %v2684_v24  ;;  %v1644_v0 = vsub.f32 0.0027777778, %v4027_v58 }
 0x47a   :  { %2713 = vrcp.f32 %v966_v52  ;;  %v4029_v34 = vadd.f32 1.0, %v966_v52  ;;  %v2696_v53 = vpop.eup %2695  ;;  %v4041_v52 = vadd.f32 %v1576_v46, %v1564_v2  ;;  %v2212_v46 = vadd.f32 -0.5, %v3925_v5 }
 0x47b   :  { %2715 = vrcp.f32 %v1271_v55  ;;  %v1326_v55 = vadd.f32 1.0, %v4020_v4  ;;  %v4056_v42 = vadd.f32 1.0, %v4039_v15  ;;  %v1723_v58 = vsub.f32 0.0027777778, %v1722_v22 }
 0x47c   :  { %v2698_v28 = vpop.eup %2697  ;;  %2717 = vrcp.f32 %v4029_v34  ;;  %4395 = vst [vmem:[#allocation17_spill] sm:$0xff] %v4041_v52  ;;  %v898_v22 = vadd.f32 %v2696_v53, %v2694_v32 }
 0x47d   :  { %v2700_v43 = vpop.eup %2699  ;;  %2719 = vrcp.f32 %v1293_v38  ;;  %v1695_v38 = vadd.f32 %v1694_v9, %v1691_v50  ;;  %v4063_v20 = vadd.f32 1.0, %v1326_v55  ;;  %v1702_v50 = vmul.f32 0.6931472, %v2688_v33 }
 0x47e   :  { %v4051_v54 = vpop.eup %2701  ;;  %2721 = vrcp.f32 %v1309_v59  ;;  %v1282_v3 = vmul.f32 0.6931472, %v2700_v43  ;;  %v1836_v59 = vadd.f32 %v3949_v27, %v1824_v47  ;;  %v4071_v27 = vadd.f32 1.0, %v4056_v42 }
 0x47f   :  { %v2704_v2 = vpop.eup %2703  ;;  %2723 = vrcp.f32 %v1325_v45  ;;  %v1900_v45 = vsub.f32 0.008333334, %v4033_v39  ;;  %v1699_v47 = vadd.f32 %v1698_v31, %v1695_v38  ;;  %v1724_v53 = vmul.f32 %v1723_v58, %v4024_v23 }
 0x480   :  { %v4058_v56 = vpop.eup %2705  ;;  %v1298_v35 = vmul.f32 0.6931472, %v2704_v2  ;;  %2725 = vrcp.f32 %v4037_v16  ;;  %v1719_v2 = vmul.f32 %v2212_v46, %v1718_v21  ;;  %v1632_v21 = vsub.f32 %v4045_v37, %v3893_v11 }
 0x481   :  { %v2708_v24 = vpop.eup %2707  ;;  %2727 = vlog2.f32 %v3997_v60  ;;  %v4095_v46 = vmul.f32 %v1644_v0, %v4004_v26  ;;  %v1848_v0 = vadd.f32 %v3958_v36, %v1836_v59  ;;  %v1710_v36 = vmul.f32 0.6931472, %v4017_v63 }
 0x482   :  { %v4066_v29 = vpop.eup %2709  ;;  %v1305_v9 = vadd.f32 %v1298_v35, %v1282_v3  ;;  %v1314_v30 = vmul.f32 0.6931472, %v2708_v24  ;;  %2729 = vlog2.f32 %v4010_v57  ;;  %v4078_v35 = vadd.f32 1.0, %v4063_v20 }
 0x483   :  { %v2712_v43 = vpop.eup %2711  ;;  %2731 = vlog2.f32 %v4020_v4  ;;  %v4396_v3 = vsub.f32 %v3967_v41, %v3969_v49  ;;  %v1328_v41 = vadd.f32 1.0, %v4071_v27  ;;  %v1703_v49 = vadd.f32 %v1702_v50, %v1699_v47 }
 0x484   :  { %v4073_v14 = vpop.eup %2713  ;;  %v1321_v52 = vadd.f32 %v1314_v30, %v1305_v9  ;;  %v1330_v39 = vmul.f32 0.6931472, %v2712_v43  ;;  %2733 = vlog2.f32 %v1326_v55  ;;  %v4105_v24 = vadd.f32 1.0, %v4037_v16 }
 0x485   :  { %v4075_v44 = vpop.eup %2715  ;;  %2735 = vrcp.f32 %v3997_v60  ;;  %v4084_v33 = vsub.f32 %v4396_v3, %v1230_v12  ;;  %v1706_v12 = vmul.f32 0.6931472, %v4012_v19  ;;  %v1720_v23 = vsub.f32 %v1719_v2, %v3925_v5 }
 0x486   :  { %v4088_v31 = vpop.eup %2717  ;;  %v4090_v32 = vadd.f32 %v1330_v39, %v1321_v52  ;;  %2737 = vrcp.f32 %v4010_v57  ;;  %v914_v52 = vadd.f32 %v2698_v28, %v898_v22  ;;  %v1904_v19 = vmul.f32 %v1900_v45, %v4004_v26 }
 0x487   :  { %v4097_v60 = vpop.eup %2719  ;;  %2739 = vrcp.f32 %v4020_v4  ;;  %v4112_v4 = vadd.f32 1.0, %v4078_v35  ;;  %v1652_v5 = vsub.f32 0.083333336, %v4095_v46  ;;  %v4123_v30 = vadd.f32 1.0, %v1328_v41 }
 0x488   :  { %v4102_v38 = vpop.eup %2721  ;;  %2741 = vrcp.f32 %v1326_v55  ;;  %v1725_v55 = vsub.f32 0.083333336, %v1724_v53  ;;  %v1707_v50 = vadd.f32 %v1706_v12, %v1703_v49  ;;  %v930_v45 = vadd.f32 %v4051_v54, %v914_v52 }
 0x489   :  { %v4108_v57 = vpop.eup %2723  ;;  %2743 = vrcp.f32 %v4063_v20  ;;  %v1721_v43 = vadd.f32 0.9189385, %v1720_v23  ;;  %v4129_v47 = vadd.f32 1.0, %v4105_v24  ;;  %v4132_v3 = vadd.f32 1.0, %v4112_v4 }
 0x48a   :  { %v4116_v58 = vpop.eup %2725  ;;  %2745 = vlog2.f32 %v4039_v15  ;;  %v998_v63 = vadd.f32 1.0, %v4029_v34  ;;  %v1726_v49 = vmul.f32 %v3994_v6, %v1725_v55  ;;  %v4138_v23 = vadd.f32 1.0, %v4123_v30 }
 0x48b   :  { %v2728_v9 = vpop.eup %2727  ;;  %2747 = vlog2.f32 %v4056_v42  ;;  %v946_v6 = vadd.f32 %v4058_v56, %v930_v45  ;;  %v4148_v55 = vadd.f32 1.0, %v4132_v3  ;;  %v1941_v11 = vadd.f32 %v4097_v60, %v4075_v44 }
 0x48c   :  { %v2730_v59 = vpop.eup %2729  ;;  %2749 = vlog2.f32 %v4071_v27  ;;  %v1284_v22 = vmul.f32 0.6931472, %v2728_v9 }
 0x48d   :  { %v2732_v2 = vpop.eup %2731  ;;  %v1300_v39 = vmul.f32 0.6931472, %v2730_v59  ;;  %2751 = vlog2.f32 %v1328_v41  ;;  %v4143_v59 = vadd.f32 1.0, %v4129_v47  ;;  %v962_v37 = vadd.f32 %v4066_v29, %v946_v6 }
 0x48e   :  { %v2734_v53 = vpop.eup %2733  ;;  %v1316_v46 = vmul.f32 0.6931472, %v2732_v2  ;;  %2753 = vrcp.f32 %v4039_v15  ;;  %v1860_v15 = vadd.f32 %v3964_v17, %v1848_v0  ;;  %v1908_v2 = vsub.f32 0.083333336, %v1904_v19 }
 0x48f   :  { %v2736_v54 = vpop.eup %2735  ;;  %v1306_v12 = vadd.f32 %v1300_v39, %v1284_v22  ;;  %v1332_v52 = vmul.f32 0.6931472, %v2734_v53  ;;  %2755 = vrcp.f32 %v4056_v42  ;;  %v1711_v42 = vadd.f32 %v1710_v36, %v1707_v50 }
 0x490   :  { %v2738_v9 = vpop.eup %2737  ;;  %2757 = vrcp.f32 %v4071_v27  ;;  %v1636_v27 = vadd.f32 0.9189385, %v1632_v21  ;;  %v1727_v0 = vadd.f32 %v1726_v49, %v1721_v43  ;;  %v1656_v19 = vmul.f32 %v3936_v61, %v1652_v5 }
 0x491   :  { %v2740_v34 = vpop.eup %2739  ;;  %v1322_v28 = vadd.f32 %v1316_v46, %v1306_v12  ;;  %2759 = vrcp.f32 %v1328_v41  ;;  %v1942_v39 = vadd.f32 %v2738_v9, %v2736_v54  ;;  %v4157_v41 = vadd.f32 1.0, %v4138_v23 }
 0x492   :  { %v2742_v22 = vpop.eup %2741  ;;  %2761 = vrcp.f32 %v4123_v30  ;;  %v1872_v45 = vadd.f32 %v3972_v18, %v1860_v15  ;;  %v1912_v50 = vmul.f32 %v1908_v2, %v4004_v26  ;;  %v4167_v21 = vadd.f32 1.0, %v4143_v59 }
 0x493   :  { %v2744_v53 = vpop.eup %2743  ;;  %v4154_v17 = vadd.f32 %v1332_v52, %v1322_v28  ;;  %2763 = vrcp.f32 %v998_v63  ;;  %v1954_v43 = vadd.f32 %v2740_v34, %v1942_v39  ;;  %v1728_v26 = vsub.f32 %v1727_v0, %v1711_v42 }
 0x494   :  { %v2746_v56 = vpop.eup %2745  ;;  %2765 = vlog2.f32 %v998_v63  ;;  %v4172_v44 = vadd.f32 1.0, %v4157_v41  ;;  %v4175_v49 = vadd.f32 %v1656_v19, %v1636_v27  ;;  %v1953_v12 = vadd.f32 %v4102_v38, %v1941_v11 }
 0x495   :  { %4397 = vst [vmem:[#allocation18_spill] sm:$0xff] %v4154_v17  ;;  %v2748_v36 = vpop.eup %2747  ;;  %2767 = vrcp.f32 %v4148_v55  ;;  %v1288_v46 = vmul.f32 0.6931472, %v2746_v56  ;;  %v978_v52 = vadd.f32 %v4073_v14, %v962_v37  ;;  %v4181_v9 = vadd.f32 %v3987_v10, %v1872_v45 }
 0x496   :  { %v2750_v28 = vpop.eup %2749  ;;  %v1304_v63 = vmul.f32 0.6931472, %v2748_v36  ;;  %2769 = vlog2.f32 %v4148_v55  ;;  %v1966_v6 = vadd.f32 %v2742_v22, %v1954_v43  ;;  %v4185_v42 = vsel %vm1729_vm2, %v1728_v26, 0.0 }
 0x497   :  { %v2752_v61 = vpop.eup %2751  ;;  %v1320_v18 = vmul.f32 0.6931472, %v2750_v28  ;;  %2771 = vrcp.f32 %v4078_v35  ;;  %v4189_v38 = vadd.f32 1.0, %v4172_v44  ;;  %v4398_v14 = vsub.f32 %v4015_v62, %v4007_v51 }
 0x498   :  { %v2754_v29 = vpop.eup %2753  ;;  %v1308_v60 = vadd.f32 %v1304_v63, %v1288_v46  ;;  %v1336_v5 = vmul.f32 0.6931472, %v2752_v61  ;;  %2773 = vrcp.f32 %v4112_v4  ;;  %v4200_v56 = vadd.f32 -0.5, %v4167_v21 }
 0x499   :  { %v2756_v54 = vpop.eup %2755  ;;  %2775 = vrcp.f32 %v4132_v3  ;;  %v4194_v10 = vsub.f32 %v4398_v14, %v1912_v50  ;;  %v4203_v45 = vadd.f32 %v4088_v31, %v978_v52  ;;  %v1965_v36 = vadd.f32 %v4108_v57, %v1953_v12 }
 0x49a   :  { %v2758_v15 = vpop.eup %2757  ;;  %v1324_v2 = vadd.f32 %v1320_v18, %v1308_v60  ;;  %v1944_v34 = vadd.f32 %v2756_v54, %v2754_v29  ;;  %2777 = vrcp.f32 %v4167_v21  ;;  %v2205_v51 = vadd.f32 -0.5, %v4148_v55 }
 0x49b   :  { %v2760_v39 = vpop.eup %2759  ;;  %2779 = vlog2.f32 %v4167_v21  ;;  %v1978_v37 = vadd.f32 %v2744_v53, %v1966_v6  ;;  %v4213_v31 = vadd.f32 -0.5, %v4189_v38  ;;  %v1977_v60 = vadd.f32 %v4116_v58, %v1965_v36 }
 0x49c   :  { %v2762_v27 = vpop.eup %2761  ;;  %v4196_v0 = vadd.f32 %v1336_v5, %v1324_v2  ;;  %v1956_v22 = vadd.f32 %v2758_v15, %v1944_v34  ;;  %2781 = vrcp.f32 %v4105_v24 }
 0x49d   :  { %v2764_v19 = vpop.eup %2763  ;;  %2783 = vrcp.f32 %v4129_v47 }
 0x49e   :  { %4399 = vst [vmem:[#allocation19_spill] sm:$0xff] %v4196_v0  ;;  %v2766_v62 = vpop.eup %2765  ;;  %v1010_v50 = vmul.f32 %v2764_v19, %v2764_v19  ;;  %v1022_v11 = vmul.f32 0.5, %v2764_v19  ;;  %2785 = vrcp.f32 %v4143_v59  ;;  %v1968_v46 = vadd.f32 %v2760_v39, %v1956_v22 }
 0x49f   :  { %v4209_v28 = vpop.eup %2767  ;;  %v1018_v43 = vmul.f32 0.6931472, %v2766_v62  ;;  %2787 = vrcp.f32 %v4189_v38 }
 0x4a0   :  { %v2770_v57 = vpop.eup %2769  ;;  %v1030_v63 = vmul.f32 0.003968254, %v1010_v50  ;;  %v4217_v61 = vmul.f32 %v4209_v28, %v4209_v28  ;;  %v2018_v18 = vmul.f32 0.5, %v4209_v28  ;;  %2789 = vlog2.f32 %v4189_v38 }
 0x4a1   :  { %v2772_v53 = vpop.eup %2771  ;;  %v1026_v26 = vsub.f32 %v1018_v43, %v1022_v11  ;;  %v1428_v29 = vmul.f32 0.6931472, %v2770_v57  ;;  %2791 = vrcp.f32 %v4138_v23  ;;  %v1980_v34 = vadd.f32 %v2762_v27, %v1968_v46 }
 0x4a2   :  { %v2774_v5 = vpop.eup %2773  ;;  %v1034_v54 = vsub.f32 0.008333334, %v1030_v63  ;;  %v1990_v12 = vadd.f32 %v2772_v53, %v1978_v37  ;;  %v2026_v52 = vmul.f32 0.003968254, %v4217_v61  ;;  %2793 = vrcp.f32 %v4157_v41 }
 0x4a3   :  { %v2776_v15 = vpop.eup %2775  ;;  %v2022_v2 = vsub.f32 %v1428_v29, %v2018_v18  ;;  %2795 = vrcp.f32 %v4172_v44  ;;  %v4226_v6 = vmul.f32 %v2205_v51, %v1428_v29  ;;  %v4237_v62 = vmul.f32 0.0007936508, %v4217_v61 }
 0x4a4   :  { %v4228_v39 = vpop.eup %2777  ;;  %v1038_v14 = vmul.f32 %v1034_v54, %v1010_v50  ;;  %v2002_v58 = vadd.f32 %v2774_v5, %v1990_v12  ;;  %v2030_v22 = vsub.f32 0.008333334, %v2026_v52  ;;  %2797 = vlog2.f32 %v4037_v16 }
 0x4a5   :  { %v2780_v19 = vpop.eup %2779  ;;  %v1417_v36 = vmul.f32 %v4228_v39, %v4228_v39  ;;  %2799 = vlog2.f32 %v4105_v24  ;;  %v2017_v46 = vmul.f32 0.5, %v4228_v39 }
 0x4a6   :  { %v2782_v51 = vpop.eup %2781  ;;  %v1042_v11 = vsub.f32 0.083333336, %v1038_v14  ;;  %v2034_v37 = vmul.f32 %v2030_v22, %v4217_v61  ;;  %v1426_v43 = vmul.f32 0.6931472, %v2780_v19  ;;  %2801 = vlog2.f32 %v4129_v47 }
 0x4a7   :  { %v2784_v16 = vpop.eup %2783  ;;  %v1989_v57 = vadd.f32 %v2782_v51, %v1977_v60  ;;  %v2025_v63 = vmul.f32 0.003968254, %v1417_v36  ;;  %v1445_v18 = vmul.f32 0.0007936508, %v1417_v36  ;;  %v2014_v29 = vadd.f32 %v2776_v15, %v2002_v58 }
 0x4a8   :  { %v2786_v24 = vpop.eup %2785  ;;  %v1046_v53 = vmul.f32 %v1042_v11, %v1010_v50  ;;  %v2038_v5 = vsub.f32 0.083333336, %v2034_v37  ;;  %2803 = vlog2.f32 %v4143_v59  ;;  %v1433_v14 = vmul.f32 %v4200_v56, %v1426_v43 }
 0x4a9   :  { %v4243_v54 = vpop.eup %2787  ;;  %v2001_v12 = vadd.f32 %v2784_v16, %v1989_v57  ;;  %v2029_v52 = vsub.f32 0.008333334, %v2025_v63  ;;  %v1449_v22 = vsub.f32 0.0027777778, %v1445_v18  ;;  %v2021_v58 = vsub.f32 %v1426_v43, %v2017_v46 }
 0x4aa   :  { %4400 = vst [vmem:[#allocation20_spill] sm:$0xff] %v4243_v54  ;;  %v2790_v19 = vpop.eup %2789  ;;  %v1050_v27 = vsub.f32 %v1026_v26, %v1046_v53  ;;  %v2042_v60 = vmul.f32 %v2038_v5, %v4217_v61  ;;  %v4249_v47 = vmul.f32 %v4243_v54, %v4243_v54  ;;  %v2020_v50 = vmul.f32 0.5, %v4243_v54 }
 0x4ab   :  { %v2792_v15 = vpop.eup %2791  ;;  %v2033_v59 = vmul.f32 %v2029_v52, %v1417_v36  ;;  %v1432_v51 = vmul.f32 0.6931472, %v2790_v19  ;;  %v1437_v11 = vsub.f32 %v1433_v14, %v4167_v21  ;;  %v2013_v18 = vadd.f32 %v2786_v24, %v2001_v12  ;;  %v4403_v24 = vld [vmem:[#allocation10_spill] sm:$0xff] }
 0x4ac   :  { %v2794_v37 = vpop.eup %2793  ;;  %v1054_v56 = vsub.f32 %v1050_v27, %v4203_v45  ;;  %v2046_v16 = vsub.f32 %v2022_v2, %v2042_v60  ;;  %v1992_v57 = vadd.f32 %v2792_v15, %v1980_v34  ;;  %v2028_v26 = vmul.f32 0.003968254, %v4249_v47  ;;  %v4402_v27 = vld [vmem:[#allocation9_spill] sm:$0xff] }
 0x4ad   :  { %v2796_v63 = vpop.eup %2795  ;;  %v2037_v53 = vsub.f32 0.083333336, %v2033_v59  ;;  %v2024_v5 = vsub.f32 %v1432_v51, %v2020_v50  ;;  %v1453_v0 = vmul.f32 %v1449_v22, %v1417_v36  ;;  %v4401_v43 = vsub.f32 %v4084_v33, %v3990_v48 }
 0x4ae   :  { %v2798_v17 = vpop.eup %2797  ;;  %v2050_v52 = vsub.f32 %v2046_v16, %v2014_v29  ;;  %v2032_v19 = vsub.f32 0.008333334, %v2028_v26  ;;  %v1441_v21 = vadd.f32 0.9189385, %v1437_v11  ;;  %2805 = vlog2.f32 %v4063_v20 }
 0x4af   :  { %v1242_v46 = vsub.f32 %v1054_v56, %v4401_v43  ;;  %v2800_v14 = vpop.eup %2799  ;;  %v2041_v54 = vmul.f32 %v2037_v53, %v1417_v36  ;;  %v1346_v45 = vmul.f32 0.6931472, %v2798_v17  ;;  %v1457_v2 = vsub.f32 0.083333336, %v1453_v0 }
 0x4b0   :  { %v4404_v12 = vsub.f32 %v4402_v27, %v4403_v24  ;;  %v2004_v60 = vadd.f32 %v2794_v37, %v1992_v57  ;;  %v2036_v50 = vmul.f32 %v2032_v19, %v4249_v47  ;;  %v2802_v48 = vpop.eup %2801  ;;  %v1362_v15 = vmul.f32 0.6931472, %v2800_v14 }
 0x4b1   :  { %v1252_v34 = vsel %vm801_vm1, %v1242_v46, 0.0  ;;  %v2045_v33 = vsub.f32 %v2021_v58, %v2041_v54  ;;  %v1353_v29 = vadd.f32 %v1346_v45, %v4090_v32  ;;  %v1461_v17 = vmul.f32 %v4228_v39, %v1457_v2 }
 0x4b2   :  { %v2054_v22 = vsub.f32 %v4404_v12, %v2050_v52  ;;  %1253 = vadd.xlane.f32.xlu0 %v1252_v34  ;;  %v2804_v0 = vpop.eup %2803  ;;  %v4405_v20 = vsub.f32 %v3538_v40, %v3512_v1  ;;  %v2040_v59 = vsub.f32 0.083333336, %v2036_v50  ;;  %v1378_v11 = vmul.f32 0.6931472, %v2802_v48  ;;  %v4412_v34 = vld [vmem:[#allocation18_spill] sm:$0xff] }
 0x4b3   :  { %2807 = vlog2.f32 %v4078_v35  ;;  %v2049_v37 = vsub.f32 %v2045_v33, %v2013_v18  ;;  %v1369_v56 = vadd.f32 %v1362_v15, %v1353_v29  ;;  %v1394_v16 = vmul.f32 0.6931472, %v2804_v0 }
 0x4b4   :  { %v2058_v36 = vmul.f32 %v2054_v22, %v4405_v20  ;;  %v4270_v57 = vadd.f32 %v1461_v17, %v1441_v21  ;;  %v2016_v32 = vadd.f32 %v2796_v63, %v2004_v60  ;;  %v2044_v58 = vmul.f32 %v2040_v59, %v4249_v47 }
 0x4b5   :  { %2809 = vlog2.f32 %v4112_v4  ;;  %v4406_v40 = vsub.f32 %v3947_v13, %v3956_v8  ;;  %v1385_v35 = vadd.f32 %v1378_v11, %v1369_v56  ;;  %v1450_v26 = vsub.f32 0.0027777778, %v4237_v62 }
 0x4b6   :  { %v2064_v54 = vsel %vm801_vm1, %v2058_v36, 0.0  ;;  %1666 = vadd.xlane.f32.xlu0 %v3961_v25  ;;  %2811 = vlog2.f32 %v4132_v3  ;;  %v2048_v18 = vsub.f32 %v2024_v5, %v2044_v58  ;;  %v1436_v63 = vmul.f32 %v4213_v31, %v1432_v51  ;;  %v4408_v31 = vld [vmem:[#allocation15_spill] sm:$0xff]  ;;  %v4409_v51 = vld [vmem:[#allocation17_spill] sm:$0xff] }
 0x4b7   :  { %2065 = vadd.xlane.f32.xlu1 %v2064_v54  ;;  %v2053_v39 = vsub.f32 %v4406_v40, %v2049_v37  ;;  %2813 = vlog2.f32 %v4123_v30  ;;  %v1448_v53 = vmul.f32 0.0007936508, %v4249_v47  ;;  %v4407_v25 = vsub.f32 %v3795_v7, %v3512_v1  ;;  %v4410_v7 = vld [vmem:[#allocation16_spill] sm:$0xff]  ;;  %v4415_v37 = vld [vmem:[#allocation19_spill] sm:$0xff] }
 0x4b8   :  { %v4287_v43 = vadd.f32 %v1394_v16, %v1385_v35  ;;  %v1454_v13 = vmul.f32 %v1450_v26, %v4217_v61  ;;  %2815 = vlog2.f32 %v4138_v23  ;;  %v2052_v8 = vsub.f32 %v2048_v18, %v2016_v32  ;;  %v2806_v62 = vpop.eup %2805  ;;  %v4416_v26 = vld [vmem:[#allocation7_spill] sm:$0xff] }
 0x4b9   :  { %v2057_v4 = vmul.f32 %v2053_v39, %v4407_v25  ;;  %2817 = vlog2.f32 %v4157_v41  ;;  %v1440_v3 = vsub.f32 %v1436_v63, %v4189_v38  ;;  %v1452_v30 = vsub.f32 0.0027777778, %v1448_v53  ;;  %v4417_v63 = vld [vmem:[#allocation13_spill] sm:$0xff]  ;;  %v4418_v53 = vld [vmem:[#allocation8_spill] sm:$0xff]  ;;  %v1245_v25 = vpop.xlane.xlu1 %1244 }
 0x4ba   :  { %1731 = vadd.xlane.f32.xlu0 %v4185_v42  ;;  %v1596_v5 = vadd.f32 %v4410_v7, %v4409_v51  ;;  %v1469_v46 = vsub.f32 %v4270_v57, %v4287_v43  ;;  %v1458_v61 = vsub.f32 0.083333336, %v1454_v13  ;;  %2819 = vlog2.f32 %v4172_v44 }
 0x4bb   :  { %2068 = vadd.xlane.f32.xlu1 %v4408_v31  ;;  %v1920_v23 = vsub.f32 %v4194_v10, %v4181_v9  ;;  %v1348_v41 = vmul.f32 0.6931472, %v2806_v62  ;;  %v1456_v38 = vmul.f32 %v1452_v30, %v4249_v47  ;;  %v4411_v42 = vsub.f32 %v4226_v6, %v4148_v55  ;;  %v4414_v55 = vld [vmem:[#allocation20_spill] sm:$0xff] }
 0x4bc   :  { %v1664_v52 = vsub.f32 %v4175_v49, %v1596_v5  ;;  %v1462_v21 = vmul.f32 %v4209_v28, %v1458_v61  ;;  %v2061_v45 = vsel %vm801_vm1, %v2057_v4, 0.0  ;;  %v4413_v49 = vld [vmem:[#allocation14_spill] sm:$0xff]  ;;  %v1444_v12 = vadd.f32 0.9189385, %v1440_v3 }
 0x4bd   :  { %v1442_v19 = vadd.f32 0.9189385, %v4411_v42  ;;  %v2808_v14 = vpop.eup %2807  ;;  %v2056_v2 = vsub.f32 %v1920_v23, %v2052_v8  ;;  %v1354_v44 = vadd.f32 %v1348_v41, %v4412_v34  ;;  %v1460_v27 = vsub.f32 0.083333336, %v1456_v38  ;;  %v1251_v4 = vpop.xlane.xlu1 %1250 }
 0x4be   :  { %2062 = vadd.xlane.f32.xlu0 %v2061_v45  ;;  %v1364_v9 = vmul.f32 0.6931472, %v2808_v14  ;;  %v1788_v24 = vsub.f32 %v4413_v49, %v3512_v1  ;;  %v1674_v48 = vsel %vm801_vm1, %v1664_v52, 0.0 }
 0x4bf   :  { %v4310_v10 = vadd.f32 %v1462_v21, %v1442_v19  ;;  %v2810_v47 = vpop.eup %2809  ;;  %v1464_v6 = vmul.f32 %v4414_v55, %v1460_v27 }
 0x4c0   :  { %v2812_v22 = vpop.eup %2811  ;;  %v1370_v28 = vadd.f32 %v1364_v9, %v1354_v44  ;;  %v1380_v60 = vmul.f32 0.6931472, %v2810_v47  ;;  %v2060_v33 = vmul.f32 %v2056_v2, %v1788_v24 }
 0x4c1   :  { %v2814_v50 = vpop.eup %2813  ;;  %v1396_v29 = vmul.f32 0.6931472, %v2812_v22  ;;  %v4316_v15 = vadd.f32 %v1464_v6, %v1444_v12  ;;  %v1735_v13 = vpop.xlane.xlu1 %1734 }
 0x4c2   :  { %v2816_v17 = vpop.eup %2815  ;;  %1675 = vadd.xlane.f32.xlu0 %v1674_v48  ;;  %v1386_v0 = vadd.f32 %v1380_v60, %v1370_v28  ;;  %v1352_v20 = vmul.f32 0.6931472, %v2814_v50  ;;  %v2070_v54 = vsel %vm801_vm1, %v2060_v33, 0.0  ;;  %v1739_v8 = vadd.f32 1.0, %v1735_v13  ;;  %v1248_v22 = vpop.xlane.xlu0 %1247 }
 0x4c3   :  { %v2818_v36 = vpop.eup %2817  ;;  %v1368_v59 = vmul.f32 0.6931472, %v2816_v17  ;;  %2821 = vlog2.f32 %v1735_v13 }
 0x4c4   :  { %v2820_v1 = vpop.eup %2819  ;;  %v4318_v11 = vadd.f32 %v1396_v29, %v1386_v0  ;;  %v1356_v56 = vadd.f32 %v1352_v20, %v4415_v37  ;;  %v1384_v16 = vmul.f32 0.6931472, %v2818_v36  ;;  %v1743_v3 = vadd.f32 1.0, %v1739_v8  ;;  %v2842_v29 = vld [vmem:[%s4369_s9] sm:$0x3]  ;;  %s2873_s9 = smov 16  }
 0x4c5   :  { %v1400_v40 = vmul.f32 0.6931472, %v2820_v1  ;;  %2823 = vlog2.f32 %v1739_v8  ;;  %v1256_v17 = vmul.f32 %v2842_v29, %v1248_v22  ;;  %v1255_v37 = vmul.f32 %v2842_v29, %v1245_v25 }
 0x4c6   :  { %2071 = vadd.xlane.f32.xlu0 %v2070_v54  ;;  %v1470_v32 = vsub.f32 %v4310_v10, %v4318_v11  ;;  %v1372_v58 = vadd.f32 %v1368_v59, %v1356_v56  ;;  %v1747_v30 = vadd.f32 1.0, %v1743_v3  ;;  %2825 = vlog2.f32 %v1743_v3  ;;  %v1670_v56 = vpop.xlane.xlu1 %1669 }
 0x4c8   :  { %v1388_v39 = vadd.f32 %v1384_v16, %v1372_v58  ;;  %v1751_v62 = vadd.f32 1.0, %v1747_v30  ;;  %v2085_v16 = vadd.f32 %v1256_v17, %v1255_v37 }
 0x4ca   :  { %v4324_v35 = vadd.f32 %v1400_v40, %v1388_v39  ;;  %v1755_v31 = vadd.f32 1.0, %v1751_v62 }
 0x4cc   :  { %2092 = vrot.lane.b32.xlu1 %v4416_v26, %s2870_s8  ;;  %v1472_v18 = vsub.f32 %v4316_v15, %v4324_v35  ;;  %v1759_v51 = vadd.f32 1.0, %v1755_v31  ;;  %v1257_v26 = vmul.f32 %v2842_v29, %v1251_v4  ;;  %v1678_v4 = vsub.f32 %v1470_v32, %v1670_v56 }
 0x4cd   :  { %v2822_v61 = vpop.eup %2821 }
 0x4ce   :  { %v1763_v7 = vadd.f32 1.0, %v1759_v51  ;;  %v1737_v38 = vmul.f32 0.6931472, %v2822_v61  ;;  %v2087_v8 = vadd.f32 %v2085_v16, %v1257_v26  ;;  %v4419_v61 = vld [vmem:[#allocation12_spill] sm:$0xff] }
 0x4cf   :  { %v2824_v23 = vpop.eup %2823 }
 0x4d0   :  { %2102 = vrot.lane.b32.xlu1 %v4417_v63, %s2871_s11  ;;  %v1767_v5 = vadd.f32 1.0, %v1763_v7  ;;  %v2826_v41 = vpop.eup %2825  ;;  %v1741_v52 = vmul.f32 0.6931472, %v2824_v23  ;;  %v1673_v63 = vpop.xlane.xlu1 %1672  ;;  %v4420_v23 = vld [vmem:[#allocation11_spill] sm:$0xff] }
 0x4d1   :  { %v1745_v21 = vmul.f32 0.6931472, %v2826_v41  ;;  %v4421_v41 = vsub.f32 %v4419_v61, %v4420_v23 }
 0x4d2   :  { %2827 = vrcp.f32 %v1767_v5  ;;  %v1742_v19 = vadd.f32 %v1741_v52, %v1737_v38  ;;  %v2213_v24 = vadd.f32 -0.5, %v1767_v5 }
 0x4d3   :  { %2829 = vlog2.f32 %v1747_v30  ;;  %v1679_v38 = vsub.f32 %v4421_v41, %v1673_v63 }
 0x4d4   :  { %2831 = vlog2.f32 %v1751_v62  ;;  %v1746_v34 = vadd.f32 %v1745_v21, %v1742_v19  ;;  %v4422_v19 = vld [vmem:[#allocation5_spill] sm:$0xff] }
 0x4d5   :  { %2833 = vlog2.f32 %v1767_v5 }
 0x4d6   :  { %2835 = vlog2.f32 %v1755_v31 }
 0x4d7   :  { %2837 = vlog2.f32 %v1759_v51 }
 0x4d8   :  { %2839 = vlog2.f32 %v1763_v7 }
 0x4dc   :  { %2098 = vrot.lane.b32.xlu0 %v4418_v53, %s2872_s12  ;;  %v2828_v42 = vpop.eup %2827 }
 0x4dd   :  { %v1770_v14 = vmul.f32 %v2828_v42, %v2828_v42  ;;  %v2830_v45 = vpop.eup %2829 }
 0x4de   :  { %v2832_v2 = vpop.eup %2831  ;;  %v1749_v44 = vmul.f32 0.6931472, %v2830_v45 }
 0x4df   :  { %v1777_v27 = vmul.f32 0.0007936508, %v1770_v14  ;;  %v2834_v9 = vpop.eup %2833  ;;  %v1753_v47 = vmul.f32 0.6931472, %v2832_v2 }
 0x4e0   :  { %v1750_v49 = vadd.f32 %v1749_v44, %v1746_v34  ;;  %v1773_v12 = vmul.f32 0.6931472, %v2834_v9  ;;  %v2836_v6 = vpop.eup %2835 }
 0x4e1   :  { %v1778_v55 = vsub.f32 0.0027777778, %v1777_v27  ;;  %v1757_v60 = vmul.f32 0.6931472, %v2836_v6  ;;  %v2838_v33 = vpop.eup %2837 }
 0x4e2   :  { %v1754_v28 = vadd.f32 %v1753_v47, %v1750_v49  ;;  %v1774_v50 = vmul.f32 %v2213_v24, %v1773_v12  ;;  %v1761_v20 = vmul.f32 0.6931472, %v2838_v33  ;;  %v2840_v1 = vpop.eup %2839 }
 0x4e3   :  { %v1779_v48 = vmul.f32 %v1778_v55, %v1770_v14  ;;  %v1765_v58 = vmul.f32 0.6931472, %v2840_v1  ;;  %v4423_v55 = vld [vmem:[#allocation6_spill] sm:$0xff] }
 0x4e4   :  { %v1758_v0 = vadd.f32 %v1757_v60, %v1754_v28  ;;  %v1775_v36 = vsub.f32 %v1774_v50, %v1767_v5 }
 0x4e5   :  { %v1780_v59 = vsub.f32 0.083333336, %v1779_v48 }
 0x4e6   :  { %v1762_v54 = vadd.f32 %v1761_v20, %v1758_v0  ;;  %v1776_v40 = vadd.f32 0.9189385, %v1775_v36 }
 0x4e7   :  { %v1781_v39 = vmul.f32 %v2828_v42, %v1780_v59 }
 0x4e8   :  { %v1766_v3 = vadd.f32 %v1765_v58, %v1762_v54 }
 0x4e9   :  { %v1782_v30 = vadd.f32 %v1781_v39, %v1776_v40 }
 0x4eb   :  { %v1783_v7 = vsub.f32 %v1782_v30, %v1766_v3 }
 0x53f   :  { %v1254_v53 = vpop.xlane.xlu0 %1253 }
 0x540   :  { %v1258_v13 = vmul.f32 %v2842_v29, %v1254_v53 }
 0x542   :  { %v2089_v62 = vadd.f32 %v2087_v8, %v1258_v13 }
 0x543   :  { %v1667_v31 = vpop.xlane.xlu0 %1666 }
 0x544   :  { %v2066_v51 = vpop.xlane.xlu1 %2065  ;;  %2106 = vrot.lane.b32.xlu1 %v2089_v62, %s2873_s9  ;;  %v1677_v42 = vsub.f32 %v1469_v46, %v1667_v31 }
 0x545   :  { %v2074_v14 = vadd.f32 %v2066_v51, %v1678_v4 }
 0x547   :  { %v1732_v25 = vpop.xlane.xlu0 %1731 }
 0x548   :  { %v2069_v5 = vpop.xlane.xlu1 %2068  ;;  %v1784_v52 = vsub.f32 %v1732_v25, %v1783_v7 }
 0x549   :  { %v2075_v45 = vadd.f32 %v2069_v5, %v1679_v38 }
 0x54a   :  { %v2080_v21 = vrot.slane %v1784_v52, %v4422_v19 }
 0x54b   :  { %v2063_v2 = vpop.xlane.xlu0 %2062 }
 0x54c   :  { %v2073_v34 = vadd.f32 %v2063_v2, %v1677_v42  ;;  %v2082_v44 = vadd.f32 %v2080_v21, %v2074_v14  ;;  %v2083_v9 = vadd.f32 %v2080_v21, %v2075_v45  ;;  %v2093_v46 = vpop.permute.xlu1 %2092 }
 0x54d   :  { %v2096_v6 = vsel %vm2095_vm3, %v4423_v55, %v2093_v46 }
 0x54e   :  { %v2081_v27 = vadd.f32 %v2080_v21, %v2073_v34 }
 0x54f   :  { %v1676_v47 = vpop.xlane.xlu0 %1675 }
 0x550   :  { %v2086_v49 = vadd.f32 %v2082_v44, %v2081_v27  ;;  %v1680_v10 = vsub.f32 %v1472_v18, %v1676_v47  ;;  %v2103_v22 = vpop.permute.xlu1 %2102 }
 0x552   :  { %v2088_v24 = vadd.f32 %v2086_v49, %v2083_v9 }
 0x553   :  { %v2072_v11 = vpop.xlane.xlu0 %2071 }
 0x554   :  { %v2076_v32 = vadd.f32 %v2072_v11, %v1680_v10 }
 0x556   :  { %v2084_v57 = vadd.f32 %v2080_v21, %v2076_v32 }
 0x557   :  { %v2099_v12 = vpop.permute.xlu0 %2098 }
 0x558   :  { %v2090_v43 = vadd.f32 %v2088_v24, %v2084_v57  ;;  %v2110_v28 = vsel %vm2109_vm4, %v2096_v6, %v2099_v12 }
 0x559   :  { %v2112_v60 = vsel %vm2111_vm5, %v2110_v28, %v2103_v22 }
 0x5b6   :  { %v2107_v15 = vpop.permute.xlu1 %2106 }
 0x5b7   :  { %v2114_v35 = vsel %vm2113_vm6, %v2112_v60, %v2107_v15 }
 0x5b8   :  { %v2116_v18 = vsel %vm2115_vm7, %v2114_v35, %v2090_v43 }
 0x5b9   :  { %v2118_v50 = vsel %vm2117_vm8, %v2116_v18, 0.0 }
 0x5ba   :  { %2119 = vst [vmem:[#allocation2] sm:$0x3] %v2118_v50 }
 0x5bb   :  { %2855 = shalt.err (!%p2852_p4)
}
 0x5bc   :  { %s2856_s17 = scalar_lea.hbm %s4370_s10, 32 }
 0x5bd   :  { %p2857_p5 = scmp.ne.s32.totalorder %s4370_s10, %s2856_s17  ;;  %p2860_p6 = scmp.lt.u32.totalorder %s2856_s17, %s4370_s10 }
 0x5bf   :  { %p2862_p7 = pnand %p2860_p6, %p2857_p5 }
 0x5c1   :  { %2865 = shalt.err (!%p2862_p7)
}
 0x5c2   :  { %2129 = dma.vmem_to_hbm [thread:$0]  %s2127_s5, 32, %s4370_s10, [#allocation3]  }
 0x5c3   :  { %2866 = dma.done.wait [#allocation3], 32  }
 0x5c4   :  { %2867 = vsyncadd [#allocation3], 4294967264 }
 0x5c5   :  { %2133 = vsyncpa [#allocation3], 1 }

</bundles_post_ra>
